<compile_context>
chip_gen: v7x
topology: tpu7x:2x2x1
jax: 0.10.0
libtpu: 0.0.40
codegen_flags: <defaults>
</compile_context>

<pallas_src>
import functools

import jax
import jax.numpy as jnp
from jax.experimental import pallas as pl
from jax.experimental.pallas import tpu as pltpu


def _round_up(x, m):
    return (x + m - 1) // m * m


def _cdiv(a, b):
    return (a + b - 1) // b


def _vmem_estimate_bytes(tq, hb, cin, cout, in_bytes):
    """Rough upper bound on VMEM use (lane-padded), for vmem_limit_bytes."""
    lane, f32 = 128, 4
    cin_l = _round_up(max(cin, 1), lane)
    cout_l = _round_up(max(cout, 1), lane)
    k_l = _round_up(max(9 * cin, 1), lane)
    x_bufs = 2 * (tq + hb) * cin_l * in_bytes      # double-buffered tile + halo blocks
    o_bufs = 2 * tq * cout_l * f32                 # double-buffered output tile
    interm = 2 * tq * k_l * max(in_bytes, f32)     # xf + patch working set (upper bound)
    return x_bufs + o_bufs + interm + (2 << 20)    # + Mosaic internal scratch margin


def _zero_conv_kernel(x_ref, h_ref, w_ref, b_ref, o_ref, *, wp, precision):
    # x_ref: (1, TQ, Cin)      current row tile of the flattened padded image
    # h_ref: (1, HB, Cin)      halo rows immediately following the tile
    # w_ref: (9*Cin, Cout)     scale-folded conv weights (dy,dx major, then ci)
    # b_ref: (1, Cout)         scale-folded bias (f32)
    # o_ref: (1, TQ, Cout)     output tile (true Cout, no lane padding)
    tq = x_ref.shape[1]
    cin = x_ref.shape[2]
    xf = jnp.concatenate([x_ref[0], h_ref[0]], axis=0)           # (TQ+HB, Cin)
    offs = [dy * wp + dx for dy in range(3) for dx in range(3)]  # static tap offsets

    if cin < 128:
        # Small-channel path: fold the 9 taps into the matmul K dimension.
        # One MXU dot with K = 9*Cin replaces 9 K=Cin dots + 8 full-tile adds.
        patch = jnp.concatenate([xf[o:o + tq, :] for o in offs], axis=1)  # (TQ, 9*Cin)
        acc = jnp.dot(patch, w_ref[...],
                      preferred_element_type=jnp.float32, precision=precision)
    else:
        # Wide-channel path: K = Cin already saturates the MXU; 9 accumulating dots.
        acc = jnp.zeros((tq, w_ref.shape[1]), jnp.float32)
        for t, o in enumerate(offs):
            acc = acc + jnp.dot(xf[o:o + tq, :],
                                w_ref[t * cin:(t + 1) * cin, :],
                                preferred_element_type=jnp.float32,
                                precision=precision)

    o_ref[0] = (acc + b_ref[...].astype(jnp.float32)).astype(o_ref.dtype)


def zero_conv2d(x_nchw, weight, bias, scale, *, compute_dtype=None, target_rows=1024):
    """ZeroConv2d forward.

    x_nchw: (N, Cin, H, W); weight: (Cout, Cin, 3, 3); bias: (Cout,);
    scale: (1, Cout, 1, 1).  Returns (N, Cout, H, W).
    compute_dtype: optionally stream x/w in bf16 (accumulation stays f32).
    """
    N, Cin, H, W = x_nchw.shape
    Cout = weight.shape[0]
    Wp = W + 2                                  # padded width
    rows_valid = H * Wp                         # flat output rows (incl. 2 junk cols/row)
    maxoff = 2 * Wp + 2                         # largest shifted-read offset
    HB = _round_up(maxoff, 8)                   # halo rows, sublane-aligned

    # Row tile: a multiple of HB near the sweet spot (512-1024 v7x, 1024-2048 v5e/v6e),
    # but never larger than needed for tiny images.
    desired = max(HB, min(target_rows, _round_up(rows_valid, 8)))
    TQ = HB * _cdiv(desired, HB)
    R = _cdiv(rows_valid, TQ)
    rows_out = R * TQ
    x_rows = R * TQ + HB                        # halo block after the last tile must exist
    bpt = TQ // HB                              # halo blocks per row tile

    # Spatial padding with value 1 (F.pad(..., value=1)), then NHWC flat rows.
    xp = jnp.pad(x_nchw, ((0, 0), (0, 0), (1, 1), (1, 1)), constant_values=1.0)
    xp = jnp.transpose(xp, (0, 2, 3, 1))                     # (N, H+2, Wp, Cin)
    x_flat = xp.reshape(N, (H + 2) * Wp, Cin)
    x_flat = jnp.pad(x_flat, ((0, 0), (0, x_rows - (H + 2) * Wp), (0, 0)))

    # Fold exp(scale*3) into weights and bias:  (conv + b) * f == conv(w*f) + b*f.
    f = jnp.exp(scale.reshape(Cout).astype(jnp.float32) * 3.0)          # (Cout,)
    w_mat = jnp.transpose(weight, (2, 3, 1, 0)).reshape(9 * Cin, Cout)
    w_mat = w_mat.astype(jnp.float32) * f[None, :]
    b_row = (bias.astype(jnp.float32) * f).reshape(1, Cout)

    if compute_dtype is not None:
        x_flat = x_flat.astype(compute_dtype)
        w_mat = w_mat.astype(compute_dtype)
        precision = None
    else:
        precision = jax.lax.Precision.HIGHEST   # match true f32 conv numerics

    in_bytes = jnp.dtype(x_flat.dtype).itemsize
    vmem_limit = int(min(max(_vmem_estimate_bytes(TQ, HB, Cin, Cout, in_bytes),
                             8 << 20), 40 << 20))

    kernel = functools.partial(_zero_conv_kernel, wp=Wp, precision=precision)

    out3d = pl.pallas_call(
        kernel,
        out_shape=jax.ShapeDtypeStruct((N, rows_out, Cout), x_nchw.dtype),
        grid=(N, R),
        in_specs=[
            # current row tile
            pl.BlockSpec((1, TQ, Cin), lambda n, r: (n, r, 0)),
            # halo: the HB rows right after the tile (same array, small block)
            pl.BlockSpec((1, HB, Cin), lambda n, r: (n, (r + 1) * bpt, 0)),
            # scale-folded weights / bias (resident constants)
            pl.BlockSpec((9 * Cin, Cout), lambda n, r: (0, 0)),
            pl.BlockSpec((1, Cout), lambda n, r: (0, 0)),
        ],
        out_specs=pl.BlockSpec((1, TQ, Cout), lambda n, r: (n, r, 0)),
        compiler_params=pltpu.CompilerParams(
            dimension_semantics=("parallel", "parallel"),
            vmem_limit_bytes=vmem_limit,
        ),
    )(x_flat, x_flat, w_mat, b_row)

    # Drop padded rows and the 2 junk columns per row; back to NCHW.
    out = out3d[:, :rows_valid, :].reshape(N, H, Wp, Cout)[:, :, :W, :]
    # TODO(synk): if the downstream consumer accepts NHWC, drop this transpose.
    return jnp.transpose(out, (0, 3, 1, 2))


def _reference(x_nchw, weight, bias, scale):
    xp = jnp.pad(x_nchw, ((0, 0), (0, 0), (1, 1), (1, 1)), constant_values=1.0)
    out = jax.lax.conv_general_dilated(
        xp, weight, window_strides=(1, 1), padding="VALID",
        dimension_numbers=("NCHW", "OIHW", "NCHW"),
        precision=jax.lax.Precision.HIGHEST)
    out = out + bias.reshape(1, -1, 1, 1)
    return out * jnp.exp(scale * 3.0)


if __name__ == "__main__":
    key = jax.random.PRNGKey(0)
    k_x, k_w, k_b, k_s = jax.random.split(key, 4)

    N, Cin, Cout, H, W = 2, 4, 8, 16, 16
    x = jax.random.normal(k_x, (N, Cin, H, W), dtype=jnp.float32)

    # Module __init__ parameters: all zero-initialized (ZeroConv2d).
    weight = jnp.zeros((Cout, Cin, 3, 3), dtype=jnp.float32)
    bias = jnp.zeros((Cout,), dtype=jnp.float32)
    scale = jnp.zeros((1, Cout, 1, 1), dtype=jnp.float32)

    out = jax.block_until_ready(zero_conv2d(x, weight, bias, scale))
    ref = _reference(x, weight, bias, scale)
    assert out.shape == (N, Cout, H, W)
    assert jnp.allclose(out, ref, atol=1e-5), "mismatch vs reference (zero init)"

    # Generality check with non-zero parameters (conv + bias + exp(scale*3)), f32 path.
    w2 = 0.1 * jax.random.normal(k_w, (Cout, Cin, 3, 3), dtype=jnp.float32)
    b2 = 0.1 * jax.random.normal(k_b, (Cout,), dtype=jnp.float32)
    s2 = 0.1 * jax.random.normal(k_s, (1, Cout, 1, 1), dtype=jnp.float32)
    out2 = jax.block_until_ready(zero_conv2d(x, w2, b2, s2))
    ref2 = _reference(x, w2, b2, s2)
    assert jnp.allclose(out2, ref2, atol=1e-4, rtol=1e-4), "mismatch vs reference (f32)"

    # bf16-streamed path (halves input HBM bytes); accumulation stays f32.
    out3 = jax.block_until_ready(
        zero_conv2d(x, w2, b2, s2, compute_dtype=jnp.bfloat16))
    assert jnp.allclose(out3, ref2, atol=5e-2, rtol=5e-2), "mismatch vs reference (bf16)"

    print("KERNEL_OK")
</pallas_src>

<mosaic_0001>
module attributes {stable_mosaic.version = 11 : i64} {
  func.func @_zero_conv_kernel(%arg0: i32, %arg1: i32, %arg2: memref<1x320x4xf32, #tpu.memory_space<vmem>>, %arg3: memref<1x40x4xf32, #tpu.memory_space<vmem>>, %arg4: memref<36x8xf32, #tpu.memory_space<vmem>>, %arg5: memref<1x8xf32, #tpu.memory_space<vmem>>, %arg6: memref<1x320x8xf32, #tpu.memory_space<vmem>>) attributes {dimension_semantics = [#tpu.dimension_semantics<parallel>, #tpu.dimension_semantics<parallel>], iteration_bounds = array<i64: 2, 1>, scalar_prefetch = 0 : i64, scratch_operands = 0 : i64, tpu.core_type = #tpu.core_type<tc>, window_params = [{transform_indices = @transform_0, window_bounds = array<i64: 1, 320, 4>}, {transform_indices = @transform_1, window_bounds = array<i64: 1, 40, 4>}, {pipeline_mode = #tpu.pipeline_mode<synchronous>, transform_indices = @transform_2, window_bounds = array<i64: 36, 8>}, {pipeline_mode = #tpu.pipeline_mode<synchronous>, transform_indices = @transform_3, window_bounds = array<i64: 1, 8>}, {transform_indices = @transform_4, window_bounds = array<i64: 1, 320, 8>}]} {
    %c0 = arith.constant 0 : index
    %c0_0 = arith.constant 0 : index
    %c0_1 = arith.constant 0 : index
    %0 = vector.load %arg2[%c0, %c0_0, %c0_1] : memref<1x320x4xf32, #tpu.memory_space<vmem>>, vector<1x320x4xf32>
    %1 = vector.shape_cast %0 : vector<1x320x4xf32> to vector<320x4xf32>
    %c0_2 = arith.constant 0 : index
    %c0_3 = arith.constant 0 : index
    %c0_4 = arith.constant 0 : index
    %2 = vector.load %arg3[%c0_2, %c0_3, %c0_4] : memref<1x40x4xf32, #tpu.memory_space<vmem>>, vector<1x40x4xf32>
    %3 = vector.shape_cast %2 : vector<1x40x4xf32> to vector<40x4xf32>
    %4 = tpu.concatenate %1, %3 in 0 : vector<320x4xf32>, vector<40x4xf32> -> vector<360x4xf32>
    %5 = vector.extract_strided_slice %4 {offsets = [0, 0], sizes = [320, 4], strides = [1, 1]} : vector<360x4xf32> to vector<320x4xf32>
    %6 = vector.extract_strided_slice %4 {offsets = [1, 0], sizes = [320, 4], strides = [1, 1]} : vector<360x4xf32> to vector<320x4xf32>
    %7 = vector.extract_strided_slice %4 {offsets = [2, 0], sizes = [320, 4], strides = [1, 1]} : vector<360x4xf32> to vector<320x4xf32>
    %8 = vector.extract_strided_slice %4 {offsets = [18, 0], sizes = [320, 4], strides = [1, 1]} : vector<360x4xf32> to vector<320x4xf32>
    %9 = vector.extract_strided_slice %4 {offsets = [19, 0], sizes = [320, 4], strides = [1, 1]} : vector<360x4xf32> to vector<320x4xf32>
    %10 = vector.extract_strided_slice %4 {offsets = [20, 0], sizes = [320, 4], strides = [1, 1]} : vector<360x4xf32> to vector<320x4xf32>
    %11 = vector.extract_strided_slice %4 {offsets = [36, 0], sizes = [320, 4], strides = [1, 1]} : vector<360x4xf32> to vector<320x4xf32>
    %12 = vector.extract_strided_slice %4 {offsets = [37, 0], sizes = [320, 4], strides = [1, 1]} : vector<360x4xf32> to vector<320x4xf32>
    %13 = vector.extract_strided_slice %4 {offsets = [38, 0], sizes = [320, 4], strides = [1, 1]} : vector<360x4xf32> to vector<320x4xf32>
    %14 = tpu.concatenate %5, %6, %7, %8, %9, %10, %11, %12, %13 in 1 : vector<320x4xf32>, vector<320x4xf32>, vector<320x4xf32>, vector<320x4xf32>, vector<320x4xf32>, vector<320x4xf32>, vector<320x4xf32>, vector<320x4xf32>, vector<320x4xf32> -> vector<320x36xf32>
    %c0_5 = arith.constant 0 : index
    %c0_6 = arith.constant 0 : index
    %15 = vector.load %arg4[%c0_5, %c0_6] : memref<36x8xf32, #tpu.memory_space<vmem>>, vector<36x8xf32>
    %cst = arith.constant dense<0.000000e+00> : vector<320x8xf32>
    %16 = tpu.matmul %14, %15, %cst {dimension_numbers = #tpu.dot_dimension_numbers<[1], [0], [0], [1], [0, 0, 1, 1], [], []>, precision = #tpu.contract_precision<fp32>} : vector<320x36xf32>, vector<36x8xf32>, vector<320x8xf32> -> vector<320x8xf32>
    %c0_7 = arith.constant 0 : index
    %c0_8 = arith.constant 0 : index
    %17 = vector.load %arg5[%c0_7, %c0_8] : memref<1x8xf32, #tpu.memory_space<vmem>>, vector<1x8xf32>
    %18 = vector.broadcast %17 : vector<1x8xf32> to vector<320x8xf32>
    %19 = arith.addf %16, %18 : vector<320x8xf32>
    %c0_9 = arith.constant 0 : index
    %c0_10 = arith.constant 0 : index
    %c0_11 = arith.constant 0 : index
    %20 = vector.load %arg6[%c0_9, %c0_10, %c0_11] : memref<1x320x8xf32, #tpu.memory_space<vmem>>, vector<1x320x8xf32>
    %21 = vector.shape_cast %20 : vector<1x320x8xf32> to vector<320x8xf32>
    %22 = vector.shape_cast %19 : vector<320x8xf32> to vector<1x320x8xf32>
    tpu.vector_store %arg6[%c0_9, %c0_10, %c0_11], %22 {strides = array<i32>} : memref<1x320x8xf32, #tpu.memory_space<vmem>>, vector<1x320x8xf32>,
    return
  }
  func.func @transform_0(%arg0: i32, %arg1: i32) -> (i32, i32, i32) {
    %c0_i32 = arith.constant 0 : i32
    %c0_i32_0 = arith.constant 0 : i32
    return %arg0, %arg1, %c0_i32 : i32, i32, i32
  }
  func.func @transform_1(%arg0: i32, %arg1: i32) -> (i32, i32, i32) {
    %c1_i32 = arith.constant 1 : i32
    %0 = arith.addi %arg1, %c1_i32 : i32
    %c8_i32 = arith.constant 8 : i32
    %1 = arith.muli %0, %c8_i32 : i32
    %c0_i32 = arith.constant 0 : i32
    %c0_i32_0 = arith.constant 0 : i32
    return %arg0, %1, %c0_i32 : i32, i32, i32
  }
  func.func @transform_2(%arg0: i32, %arg1: i32) -> (i32, i32) {
    %c0_i32 = arith.constant 0 : i32
    %c0_i32_0 = arith.constant 0 : i32
    %c0_i32_1 = arith.constant 0 : i32
    return %c0_i32, %c0_i32_0 : i32, i32
  }
  func.func @transform_3(%arg0: i32, %arg1: i32) -> (i32, i32) {
    %c0_i32 = arith.constant 0 : i32
    %c0_i32_0 = arith.constant 0 : i32
    %c0_i32_1 = arith.constant 0 : i32
    return %c0_i32, %c0_i32_0 : i32, i32
  }
  func.func @transform_4(%arg0: i32, %arg1: i32) -> (i32, i32, i32) {
    %c0_i32 = arith.constant 0 : i32
    %c0_i32_0 = arith.constant 0 : i32
    return %arg0, %arg1, %c0_i32 : i32, i32, i32
  }
}

</mosaic_0001>

<bundles_post_ra>
// kernel: tpu_custom_call.1
= control target key start
LH: loop header
LB: loop body
LE: loop exit
PB: predicated region body
PF: predicated region fallthrough
CT: control target
= control target key end

     0   :  { %s5788_s15 = smov 0   ;;  %s5790_s16 = smov 0   ;;  %s8866_s0 = inlined_call_operand.vmem [shape: f32[2,360,4], index: 0, kind: input, shape index: {}]   ;;  %s8867_s1 = inlined_call_operand.vmem [shape: f32[2,360,4], index: 1, kind: input, shape index: {}]   ;;  %s8868_s2 = inlined_call_operand.vmem [shape: f32[36,8], index: 2, kind: input, shape index: {}]   ;;  %s8869_s3 = inlined_call_operand.vmem [shape: f32[1,8], index: 3, kind: input, shape index: {}]   ;;  %s8870_s4 = inlined_call_operand.vmem [shape: f32[2,320,8], index: 4, kind: output, shape index: {}]  }
   0x1   :  { %s5792_s17 = smov 0  }
   0x2 LB: > { %s26_s18 = sadd.s32 1, %s5749_s16  ;;  %p4645_p0 = scmp.ge.s32.totalorder %s5753_s17, 1  ;;  %s5753_s17 = sphi %s5792_s17, %s14_s17   ;;  %s5749_s16 = sphi %s5790_s16, %s9165_s16   ;;  %s5745_s15 = sphi %s5788_s15, %s9164_s15  }
   0x3   : > { %p28_p1 = scmp.ge.s32.totalorder %s26_s18, 2  ;;  %p216_p2 = scmp.lt.s32.totalorder %s5753_s17, 3 }
   0x5   : > { %s9167_s18 = smov (%p28_p1, %s26_s18), 0  ;;  %p217_p3 = pnand %p4645_p0, %p216_p2 }
   0x7   : > { %220 = sbr.rel (%p217_p3) target bundleno = 1167 (0x48f), region = 36 }
   0xe   : > { %p270_p4 = scmp.lt.s32.totalorder %s5745_s15, 1  ;;  %vm393_vm0 = vcmask 1046528   ;;  %s5755_s23 = smov 4   ;;  %vm595_vm1 = vcmask 1045504   ;;  %vm923_vm2 = vcmask 1044480   ;;  %vm1125_vm3 = vcmask 1043456  }
   0xf   : > { %s5756_s28 = smov 8   ;;  %s5757_s29 = smov 12   ;;  %vm1453_vm4 = vcmask 1042432   ;;  %vm1655_vm5 = vcmask 1041408   ;;  %vm1857_vm6 = vcmask 31744   ;;  %vm1898_vm7 = vcmask 64512  }
  0x10   : > { %s9169_s15 = smov (!%p270_p4, %s5745_s15), 1  ;;  %s5758_s30 = smov 16   ;;  %vm1939_vm8 = vcmask 97280   ;;  %vm1980_vm9 = vcmask 130048   ;;  %vm2021_vm10 = vcmask 162816   ;;  %vm2062_vm11 = vcmask 195584  }
  0x11   : > { %s5632_s19 = smul.u32 360, %s9169_s15  ;;  %s5759_s5 = smov 20   ;;  %vm2103_vm12 = vcmask 228352   ;;  %vm2144_vm13 = vcmask 261120   ;;  %vm2197_vm14 = vcmask 293888  }
  0x12   : > { %s5760_s6 = smov 24   ;;  %s5761_s11 = smov 28  }
  0x13   : > { %s5814_s22 = scalar_lea.vmem %s8866_s0, %s5632_s19  ;;  %s4653_s24 = sadd.s32 320, %s5632_s19 }
  0x14   : > { %v5817_v0 = vld [vmem:[%s5814_s22 + $0x10] sm:$0xff]  ;;  %v5820_v1 = vld [vmem:[%s5814_s22 + $0x18] sm:$0xff]  ;;  %v5823_v2 = vld [vmem:[%s5814_s22] sm:$0xff]  ;;  %s5983_s27 = scalar_lea.vmem %s8867_s1, %s4653_s24 }
  0x15   : > { %v397_v3 = vrot.slane %v5817_v0, 1  ;;  %v399_v4 = vrot.slane %v5820_v1, 1  ;;  %v5828_v5 = vld [vmem:[%s5814_s22 + $0x8] sm:$0xff]  ;;  %v394_v6 = vrot.slane %v5823_v2, 1  ;;  %v5832_v7 = vld [vmem:[%s5814_s22 + $0x20] sm:$0xff]  ;;  %v5840_v11 = vld [vmem:[%s5814_s22 + $0x30] sm:$0xff] }
  0x16   : > { %v395_v8 = vrot.slane %v5828_v5, 1  ;;  %v401_v9 = vrot.slane %v5832_v7, 1  ;;  %v5837_v10 = vld [vmem:[%s5814_s22 + $0x28] sm:$0xff]  ;;  %v405_v16 = vrot.slane %v5840_v11, 1  ;;  %v5851_v18 = vld [vmem:[%s5814_s22 + $0x38] sm:$0xff]  ;;  %v5854_v19 = vld [vmem:[%s5814_s22 + $0x40] sm:$0xff] }
  0x17   : > { %v400_v12 = vsel %vm393_vm0, %v397_v3, %v399_v4  ;;  %v403_v15 = vrot.slane %v5837_v10, 1  ;;  %v407_v21 = vrot.slane %v5851_v18, 1  ;;  %v409_v22 = vrot.slane %v5854_v19, 1  ;;  %v5863_v24 = vld [vmem:[%s5814_s22 + $0x48] sm:$0xff]  ;;  %v5866_v25 = vld [vmem:[%s5814_s22 + $0x50] sm:$0xff]  ;;  %v5875_v30 = vld [vmem:[%s5814_s22 + $0x58] sm:$0xff] }
  0x18   : > { %479 = vrot.lane.b32.xlu1 %v400_v12, %s5755_s23  ;;  %v396_v13 = vsel %vm393_vm0, %v394_v6, %v395_v8  ;;  %v402_v14 = vsel %vm393_vm0, %v399_v4, %v401_v9  ;;  %v398_v17 = vsel %vm393_vm0, %v395_v8, %v397_v3  ;;  %v411_v27 = vrot.slane %v5863_v24, 1  ;;  %v5878_v31 = vld [vmem:[%s5814_s22 + $0x60] sm:$0xff]  ;;  %v5887_v36 = vld [vmem:[%s5814_s22 + $0x68] sm:$0xff]  ;;  %v5890_v37 = vld [vmem:[%s5814_s22 + $0x70] sm:$0xff] }
  0x19   : > { %475 = vrot.lane.b32.xlu0 %v396_v13, %s5755_s23  ;;  %v406_v20 = vsel %vm393_vm0, %v403_v15, %v405_v16  ;;  %v404_v23 = vsel %vm393_vm0, %v401_v9, %v403_v15  ;;  %v410_v26 = vsel %vm393_vm0, %v407_v21, %v409_v22  ;;  %v413_v28 = vrot.slane %v5866_v25, 1  ;;  %v5899_v42 = vld [vmem:[%s5814_s22 + $0x78] sm:$0xff]  ;;  %v5902_v43 = vld [vmem:[%s5814_s22 + $0x80] sm:$0xff]  ;;  %v5911_v48 = vld [vmem:[%s5814_s22 + $0x88] sm:$0xff] }
  0x1a   : > { %v408_v29 = vsel %vm393_vm0, %v405_v16, %v407_v21  ;;  %v415_v33 = vrot.slane %v5875_v30, 1  ;;  %v417_v34 = vrot.slane %v5878_v31, 1  ;;  %v412_v35 = vsel %vm393_vm0, %v409_v22, %v411_v27  ;;  %v5914_v49 = vld [vmem:[%s5814_s22 + $0x90] sm:$0xff]  ;;  %v326_v54 = vld [vmem:[%s5814_s22 + $0x98] sm:$0xff]  ;;  %v327_v55 = vld [vmem:[%s5814_s22 + $0xa0] sm:$0xff] }
  0x1b   : > { %v414_v32 = vsel %vm393_vm0, %v411_v27, %v413_v28  ;;  %v419_v39 = vrot.slane %v5887_v36, 1  ;;  %v421_v40 = vrot.slane %v5890_v37, 1  ;;  %v423_v45 = vrot.slane %v5899_v42, 1  ;;  %v328_v60 = vld [vmem:[%s5814_s22 + $0xa8] sm:$0xff]  ;;  %v329_v61 = vld [vmem:[%s5814_s22 + $0xb0] sm:$0xff]  ;;  %v330_v6 = vld [vmem:[%s5814_s22 + $0xb8] sm:$0xff] }
  0x1c   : > { %481 = vrot.lane.b32.xlu1 %v402_v14, %s5755_s23  ;;  %v418_v38 = vsel %vm393_vm0, %v415_v33, %v417_v34  ;;  %v416_v41 = vsel %vm393_vm0, %v413_v28, %v415_v33  ;;  %v425_v46 = vrot.slane %v5902_v43, 1  ;;  %v427_v51 = vrot.slane %v5911_v48, 1  ;;  %v331_v8 = vld [vmem:[%s5814_s22 + $0xc0] sm:$0xff]  ;;  %v332_v15 = vld [vmem:[%s5814_s22 + $0xc8] sm:$0xff]  ;;  %v333_v16 = vld [vmem:[%s5814_s22 + $0xd0] sm:$0xff] }
  0x1d   : > { %477 = vrot.lane.b32.xlu0 %v398_v17, %s5755_s23  ;;  %v422_v44 = vsel %vm393_vm0, %v419_v39, %v421_v40  ;;  %v420_v47 = vsel %vm393_vm0, %v417_v34, %v419_v39  ;;  %v429_v52 = vrot.slane %v5914_v49, 1  ;;  %v424_v53 = vsel %vm393_vm0, %v421_v40, %v423_v45  ;;  %v336_v33 = vld [vmem:[%s5814_s22 + $0xe8] sm:$0xff]  ;;  %v337_v34 = vld [vmem:[%s5814_s22 + $0xf0] sm:$0xff] }
  0x1e   : > { %v426_v50 = vsel %vm393_vm0, %v423_v45, %v425_v46  ;;  %v431_v57 = vrot.slane %v326_v54, 1  ;;  %v433_v58 = vrot.slane %v327_v55, 1  ;;  %v428_v59 = vsel %vm393_vm0, %v425_v46, %v427_v51 }
  0x1f   : > { %v430_v56 = vsel %vm393_vm0, %v427_v51, %v429_v52  ;;  %v435_v63 = vrot.slane %v328_v60, 1  ;;  %v437_v3 = vrot.slane %v329_v61, 1  ;;  %v439_v12 = vrot.slane %v330_v6, 1  ;;  %v340_v51 = vld [vmem:[%s5814_s22 + $0x108] sm:$0xff] }
  0x20   : > { %485 = vrot.lane.b32.xlu1 %v406_v20, %s5755_s23  ;;  %v434_v62 = vsel %vm393_vm0, %v431_v57, %v433_v58  ;;  %v432_v4 = vsel %vm393_vm0, %v429_v52, %v431_v57  ;;  %v441_v13 = vrot.slane %v331_v8, 1  ;;  %v443_v20 = vrot.slane %v332_v15, 1  ;;  %v341_v52 = vld [vmem:[%s5814_s22 + $0x110] sm:$0xff]  ;;  %v342_v57 = vld [vmem:[%s5814_s22 + $0x118] sm:$0xff] }
  0x21   : > { %483 = vrot.lane.b32.xlu0 %v404_v23, %s5755_s23  ;;  %v438_v9 = vsel %vm393_vm0, %v435_v63, %v437_v3  ;;  %v436_v14 = vsel %vm393_vm0, %v433_v58, %v435_v63  ;;  %v445_v21 = vrot.slane %v333_v16, 1  ;;  %v440_v22 = vsel %vm393_vm0, %v437_v3, %v439_v12  ;;  %v334_v23 = vld [vmem:[%s5814_s22 + $0xd8] sm:$0xff]  ;;  %v343_v58 = vld [vmem:[%s5814_s22 + $0x120] sm:$0xff]  ;;  %v344_v63 = vld [vmem:[%s5814_s22 + $0x128] sm:$0xff] }
  0x22   : > { %v442_v17 = vsel %vm393_vm0, %v439_v12, %v441_v13  ;;  %v447_v28 = vrot.slane %v334_v23, 1  ;;  %v453_v39 = vrot.slane %v337_v34, 1  ;;  %v459_v54 = vrot.slane %v340_v51, 1  ;;  %v345_v3 = vld [vmem:[%s5814_s22 + $0x130] sm:$0xff]  ;;  %v346_v12 = vld [vmem:[%s5814_s22 + $0x138] sm:$0xff] }
  0x23   : > { %v446_v27 = vsel %vm393_vm0, %v443_v20, %v445_v21  ;;  %v461_v55 = vrot.slane %v341_v52, 1  ;;  %v463_v60 = vrot.slane %v342_v57, 1  ;;  %v465_v61 = vrot.slane %v343_v58, 1 }
  0x24   : > { %489 = vrot.lane.b32.xlu1 %v410_v26, %s5755_s23  ;;  %v335_v26 = vld [vmem:[%s5814_s22 + $0xe0] sm:$0xff]  ;;  %v448_v40 = vsel %vm393_vm0, %v445_v21, %v447_v28  ;;  %v467_v6 = vrot.slane %v344_v63, 1  ;;  %v469_v8 = vrot.slane %v345_v3, 1  ;;  %v471_v15 = vrot.slane %v346_v12, 1 }
  0x25   : > { %487 = vrot.lane.b32.xlu0 %v408_v29, %s5755_s23  ;;  %v449_v29 = vrot.slane %v335_v26, 1  ;;  %v597_v21 = vrot.slane %v5828_v5, 2  ;;  %v596_v26 = vrot.slane %v5823_v2, 2  ;;  %v605_v34 = vrot.slane %v5837_v10, 2 }
  0x26   : > { %v472_v23 = vsel %vm393_vm0, %v469_v8, %v471_v15  ;;  %v617_v52 = vrot.slane %v5875_v30, 2  ;;  %v623_v57 = vrot.slane %v5890_v37, 2  ;;  %v1127_v12 = vrot.slane %v5820_v1, 4 }
  0x28   : > { %493 = vrot.lane.b32.xlu1 %v414_v32, %s5755_s23  ;;  %v444_v32 = vsel %vm393_vm0, %v441_v13, %v443_v20  ;;  %v347_v13 = vld [vmem:[%s5983_s27] sm:$0xff] }
  0x29   : > { %491 = vrot.lane.b32.xlu0 %v412_v35, %s5755_s23  ;;  %v450_v35 = vsel %vm393_vm0, %v447_v28, %v449_v29  ;;  %v473_v16 = vrot.slane %v347_v13, 1  ;;  %v601_v28 = vrot.slane %v5820_v1, 2  ;;  %v1129_v13 = vrot.slane %v5832_v7, 4 }
  0x2b   : > { %v474_v20 = vsel %vm393_vm0, %v471_v15, %v473_v16  ;;  %v1126_v16 = vrot.slane %v5817_v0, 4 }
  0x2c   : > { %497 = vrot.lane.b32.xlu1 %v418_v38, %s5755_s23  ;;  %v451_v38 = vrot.slane %v336_v33, 1 }
  0x2d   : > { %495 = vrot.lane.b32.xlu0 %v416_v41, %s5755_s23  ;;  %v338_v41 = vld [vmem:[%s5814_s22 + $0xf8] sm:$0xff] }
  0x2e   : > { %v454_v45 = vsel %vm393_vm0, %v451_v38, %v453_v39  ;;  %v455_v46 = vrot.slane %v338_v41, 1  ;;  %v611_v41 = vrot.slane %v5854_v19, 2 }
  0x30   : > { %501 = vrot.lane.b32.xlu1 %v422_v44, %s5755_s23  ;;  %v339_v44 = vld [vmem:[%s5814_s22 + $0x100] sm:$0xff] }
  0x31   : > { %499 = vrot.lane.b32.xlu0 %v420_v47, %s5755_s23  ;;  %v457_v47 = vrot.slane %v339_v44, 1 }
  0x34   : > { %505 = vrot.lane.b32.xlu1 %v426_v50, %s5755_s23  ;;  %v452_v50 = vsel %vm393_vm0, %v449_v29, %v451_v38  ;;  %v603_v29 = vrot.slane %v5832_v7, 2 }
  0x35   : > { %503 = vrot.lane.b32.xlu0 %v424_v53, %s5755_s23  ;;  %v458_v53 = vsel %vm393_vm0, %v455_v46, %v457_v47 }
  0x36   : > { %v604_v33 = vsel %vm595_vm1, %v601_v28, %v603_v29  ;;  %v6022_v44 = vsel %vm595_vm1, %v603_v29, %v605_v34  ;;  %v1133_v29 = vrot.slane %v5840_v11, 4 }
  0x38   : > { %509 = vrot.lane.b32.xlu1 %v430_v56, %s5755_s23  ;;  %v456_v56 = vsel %vm393_vm0, %v453_v39, %v455_v46  ;;  %v613_v46 = vrot.slane %v5863_v24, 2 }
  0x39   : > { %507 = vrot.lane.b32.xlu0 %v428_v59, %s5755_s23  ;;  %v462_v59 = vsel %vm393_vm0, %v459_v54, %v461_v55 }
  0x3c   : > { %513 = vrot.lane.b32.xlu1 %v434_v62, %s5755_s23  ;;  %v460_v62 = vsel %vm393_vm0, %v457_v47, %v459_v54  ;;  %v615_v47 = vrot.slane %v5866_v25, 2  ;;  %v6046_v54 = vsel %vm595_vm1, %v611_v41, %v613_v46 }
  0x3d   : > { %511 = vrot.lane.b32.xlu0 %v432_v4, %s5755_s23  ;;  %v466_v4 = vsel %vm393_vm0, %v463_v60, %v465_v61 }
  0x3e   : > { %v6041_v51 = vsel %vm595_vm1, %v613_v46, %v615_v47  ;;  %v6058_v58 = vsel %vm595_vm1, %v615_v47, %v617_v52 }
  0x40   : > { %517 = vrot.lane.b32.xlu1 %v438_v9, %s5755_s23  ;;  %v464_v9 = vsel %vm393_vm0, %v461_v55, %v463_v60  ;;  %v625_v60 = vrot.slane %v5899_v42, 2 }
  0x41   : > { %515 = vrot.lane.b32.xlu0 %v436_v14, %s5755_s23  ;;  %v470_v14 = vsel %vm393_vm0, %v467_v6, %v469_v8  ;;  %v924_v8 = vrot.slane %v5817_v0, 3 }
  0x42   : > { %v6082_v3 = vsel %vm595_vm1, %v623_v57, %v625_v60 }
  0x44   : > { %521 = vrot.lane.b32.xlu1 %v442_v17, %s5755_s23  ;;  %v468_v17 = vsel %vm393_vm0, %v465_v61, %v467_v6  ;;  %v8875_v61 = vrot.slane %v5902_v43, 2  ;;  %v927_v6 = vrot.slane %v5832_v7, 3 }
  0x45   : > { %519 = vrot.lane.b32.xlu0 %v440_v22, %s5755_s23  ;;  %v599_v22 = vrot.slane %v5817_v0, 2  ;;  %v1454_v0 = vrot.slane %v5832_v7, 5 }
  0x46   : > { %v6079_v63 = vsel %vm595_vm1, %v625_v60, %v8875_v61  ;;  %v6159_v60 = vld [vmem:[%s8868_s2 + $0x10] sm:$0xff] }
  0x47   : > { %v602_v38 = vsel %vm595_vm1, %v599_v22, %v601_v28  ;;  %8974 = vst [vmem:[#allocation5_spill] sm:$0xff] %v6159_v60 }
  0x48   : > { %525 = vrot.lane.b32.xlu1 %v446_v27, %s5755_s23  ;;  %v600_v27 = vsel %vm595_vm1, %v597_v21, %v599_v22  ;;  %v1131_v22 = vrot.slane %v5837_v10, 4 }
  0x49   : > { %523 = vrot.lane.b32.xlu0 %v444_v32, %s5755_s23  ;;  %v598_v32 = vsel %vm595_vm1, %v596_v26, %v597_v21  ;;  %v1455_v26 = vrot.slane %v5837_v10, 5 }
  0x4a   : > { %v1132_v28 = vsel %vm1125_vm3, %v1129_v13, %v1131_v22 }
  0x4c   : > { %529 = vrot.lane.b32.xlu1 %v450_v35, %s5755_s23  ;;  %v607_v35 = vrot.slane %v5840_v11, 2 }
  0x4d   : > { %527 = vrot.lane.b32.xlu0 %v448_v40, %s5755_s23  ;;  %v609_v40 = vrot.slane %v5851_v18, 2 }
  0x4e   : > { %v6017_v39 = vsel %vm595_vm1, %v605_v34, %v607_v35  ;;  %v929_v34 = vrot.slane %v5837_v10, 3 }
  0x50   : > { %533 = vrot.lane.b32.xlu1 %v454_v45, %s5755_s23  ;;  %v6029_v45 = vsel %vm595_vm1, %v609_v40, %v611_v41  ;;  %v1134_v41 = vsel %vm1125_vm3, %v1131_v22, %v1133_v29 }
  0x51   : > { %531 = vrot.lane.b32.xlu0 %v452_v50, %s5755_s23  ;;  %v6034_v50 = vsel %vm595_vm1, %v607_v35, %v609_v40  ;;  %v6129_v35 = vld [vmem:[%s8868_s2] sm:$0xff] }
  0x52   : > { %8971 = vst [vmem:[#allocation2_spill] sm:$0xff] %v6129_v35 }
  0x54   : > { %537 = vrot.lane.b32.xlu1 %v458_v53, %s5755_s23  ;;  %v619_v53 = vrot.slane %v5878_v31, 2 }
  0x55   : > { %535 = vrot.lane.b32.xlu0 %v456_v56, %s5755_s23  ;;  %v621_v56 = vrot.slane %v5887_v36, 2 }
  0x56   : > { %v6053_v55 = vsel %vm595_vm1, %v617_v52, %v619_v53 }
  0x58   : > { %541 = vrot.lane.b32.xlu1 %v462_v59, %s5755_s23  ;;  %v6065_v59 = vsel %vm595_vm1, %v621_v56, %v623_v57  ;;  %v1657_v57 = vrot.slane %v5837_v10, 6 }
  0x59   : > { %539 = vrot.lane.b32.xlu0 %v460_v62, %s5755_s23  ;;  %v6070_v62 = vsel %vm595_vm1, %v619_v53, %v621_v56  ;;  %v930_v53 = vsel %vm923_vm2, %v927_v6, %v929_v34  ;;  %v1656_v56 = vrot.slane %v5832_v7, 6  ;;  %v8872_v7 = vand.u32 4294901760, %v6159_v60 }
  0x5c   : > { %545 = vrot.lane.b32.xlu1 %v466_v4, %s5755_s23  ;;  %v925_v4 = vrot.slane %v5820_v1, 3  ;;  %v1128_v1 = vsel %vm1125_vm3, %v1126_v16, %v1127_v12 }
  0x5d   : > { %543 = vrot.lane.b32.xlu0 %v464_v9, %s5755_s23 }
  0x5e   : > { %v928_v9 = vsel %vm923_vm2, %v925_v4, %v927_v6  ;;  %v926_v15 = vsel %vm923_vm2, %v924_v8, %v925_v4  ;;  %v6164_v4 = vld [vmem:[%s8868_s2 + $0x18] sm:$0xff] }
  0x5f   : > { %8975 = vst [vmem:[#allocation6_spill] sm:$0xff] %v6164_v4  ;;  %v8871_v10 = vand.u32 4294901760, %v6164_v4 }
  0x60   : > { %549 = vrot.lane.b32.xlu1 %v470_v14, %s5755_s23 }
  0x61   : > { %547 = vrot.lane.b32.xlu0 %v468_v17, %s5755_s23 }
  0x64   : > { %553 = vrot.lane.b32.xlu1 %v474_v20, %s5755_s23  ;;  %v1130_v20 = vsel %vm1125_vm3, %v1127_v12, %v1129_v13  ;;  %v6182_v12 = vpack.c.bf16 %v8871_v10, %v8872_v7  ;;  %v1658_v13 = vsel %vm1655_vm5, %v1656_v56, %v1657_v57  ;;  %v1459_v10 = vrot.slane %v5851_v18, 5 }
  0x65   : > { %551 = vrot.lane.b32.xlu0 %v472_v23, %s5755_s23  ;;  %s5762_s23 = smov 32  }
  0x66   : > { %8976 = vst [vmem:[#allocation7_spill] sm:$0xff] %v6182_v12 }
  0x68   : > { %679 = vrot.lane.b32.xlu1 %v600_v27, %s5756_s28 }
  0x69   : > { %677 = vrot.lane.b32.xlu0 %v598_v32, %s5756_s28 }
  0x6c   : > { %683 = vrot.lane.b32.xlu1 %v604_v33, %s5756_s28 }
  0x6d   : > { %681 = vrot.lane.b32.xlu0 %v602_v38, %s5756_s28 }
  0x70   : > { %687 = vrot.lane.b32.xlu1 %v6017_v39, %s5756_s28 }
  0x71   : > { %685 = vrot.lane.b32.xlu0 %v6022_v44, %s5756_s28 }
  0x74   : > { %691 = vrot.lane.b32.xlu1 %v6029_v45, %s5756_s28 }
  0x75   : > { %689 = vrot.lane.b32.xlu0 %v6034_v50, %s5756_s28 }
  0x78   : > { %695 = vrot.lane.b32.xlu1 %v6041_v51, %s5756_s28 }
  0x79   : > { %693 = vrot.lane.b32.xlu0 %v6046_v54, %s5756_s28 }
  0x7c   : > { %699 = vrot.lane.b32.xlu1 %v6053_v55, %s5756_s28 }
  0x7d   : > { %697 = vrot.lane.b32.xlu0 %v6058_v58, %s5756_s28 }
  0x80   : > { %703 = vrot.lane.b32.xlu1 %v6065_v59, %s5756_s28 }
  0x81   : > { %701 = vrot.lane.b32.xlu0 %v6070_v62, %s5756_s28 }
  0x84   : > { %707 = vrot.lane.b32.xlu1 %v6079_v63, %s5756_s28 }
  0x85   : > { %705 = vrot.lane.b32.xlu0 %v6082_v3, %s5756_s28 }
  0x88   : > { %805 = vrot.lane.b32.xlu1 %v604_v33, %s5757_s29  ;;  %v1456_v33 = vsel %vm1453_vm4, %v1454_v0, %v1455_v26 }
  0x89   : > { %803 = vrot.lane.b32.xlu0 %v602_v38, %s5757_s29  ;;  %v6134_v38 = vld [vmem:[%s8868_s2 + $0x8] sm:$0xff] }
  0x8a   : > { %v6096_v14 = vpop.permute.xlu1 %479  ;;  %8972 = vst [vmem:[#allocation3_spill] sm:$0xff] %v6134_v38  ;;  %v8873_v46 = vand.u32 4294901760, %v6134_v38 }
  0x8b   : > { %v6100_v17 = vpop.permute.xlu0 %475 }
  0x8c   : > { %1007 = vrot.lane.b32.xlu1 %v928_v9, %s5758_s30  ;;  %v1457_v9 = vrot.slane %v5840_v11, 5 }
  0x8d   : > { %1005 = vrot.lane.b32.xlu0 %v926_v15, %s5758_s30 }
  0x8e   : > { %v6105_v21 = vpop.permute.xlu1 %481  ;;  %v1458_v16 = vsel %vm1453_vm4, %v1455_v26, %v1457_v9 }
  0x8f   : > { %v6109_v23 = vpop.permute.xlu0 %477 }
  0x90   : > { %1209 = vrot.lane.b32.xlu1 %v1130_v20, %s5759_s5  ;;  %v931_v20 = vrot.slane %v5840_v11, 3 }
  0x91   : > { %1207 = vrot.lane.b32.xlu0 %v1128_v1, %s5759_s5  ;;  %v2189_v1 = vld [vmem:[%s8868_s2 + $0x20] sm:$0xf] }
  0x92   : > { %v6115_v27 = vpop.permute.xlu1 %485 }
  0x93   : > { %v6119_v32 = vpop.permute.xlu0 %483 }
  0x94   : > { %807 = vrot.lane.b32.xlu1 %v6022_v44, %s5757_s29  ;;  %v8874_v44 = vand.u32 4294901760, %v6129_v35 }
  0x95   : > { %1333 = vrot.lane.b32.xlu0 %v1132_v28, %s5760_s6 }
  0x96   : > { %v6136_v40 = vpop.permute.xlu1 %489  ;;  %v6150_v52 = vpack.c.bf16 %v8873_v46, %v8874_v44 }
  0x97   : > { %v6143_v47 = vpop.permute.xlu0 %487 }
  0x98   : > { %1535 = vrot.lane.b32.xlu1 %v1456_v33, %s5761_s11  ;;  %8973 = vst [vmem:[#allocation4_spill] sm:$0xff] %v6150_v52  ;;  %5369 = vmatprep.subr.bf16.mxu0 %v6150_v52  ;;  %v932_v33 = vsel %vm923_vm2, %v929_v34, %v931_v20 }
  0x99   : > { %1335 = vrot.lane.b32.xlu0 %v1134_v41, %s5760_s6  ;;  %5345 = vmatprep.subr.bf16.mxu1 %v6150_v52 }
  0x9a   : > { %v6166_v8 = vpop.permute.xlu1 %493  ;;  %5371 = vmatpush3.bf16.msra.mxu0 %v6150_v52  ;;  %5347 = vmatpush3.bf16.msra.mxu1 %v6150_v52 }
  0x9b   : > { %v6173_v6 = vpop.permute.xlu0 %491  ;;  %5373 = vmatprep.subr.bf16.mxu0 %v6182_v12  ;;  %5349 = vmatprep.subr.bf16.mxu1 %v6182_v12 }
  0x9c   : > { %1009 = vrot.lane.b32.xlu1 %v930_v53, %s5758_s30  ;;  %v1659_v53 = vrot.slane %v5840_v11, 6 }
  0x9d   : > { %809 = vrot.lane.b32.xlu0 %v6017_v39, %s5757_s29  ;;  %v6200_v39 = vsel %vm1125_vm3, %v2189_v1, 0 }
  0x9e   : > { %v6187_v15 = vpop.permute.xlu1 %497  ;;  %5375 = vmatpush3.bf16.msra.mxu0 %v6182_v12  ;;  %8977 = vst [vmem:[#allocation8_spill] sm:$0xff] %v6200_v39  ;;  %5351 = vmatpush3.bf16.msra.mxu1 %v6182_v12  ;;  %v6205_v0 = vand.u32 4294901760, %v6200_v39  ;;  %v1660_v34 = vsel %vm1655_vm5, %v1657_v57, %v1659_v53  ;;  %v933_v57 = vrot.slane %v5851_v18, 3 }
  0x9f   : > { %v6196_v22 = vpop.permute.xlu0 %495 }
  0xa0   : > { %1737 = vrot.lane.b32.xlu1 %v1658_v13, %s5762_s23  ;;  %8978 = vst [vmem:[#allocation9_spill] sm:$0xff] %v6205_v0  ;;  %5142 = vmatprep.subr.mxu0 %v6205_v0 }
  0xa1   : > { %1537 = vrot.lane.b32.xlu0 %v1458_v16, %s5761_s11  ;;  %4932 = vmatprep.subr.mxu1 %v6205_v0  ;;  %v1135_v16 = vrot.slane %v5851_v18, 4 }
  0xa2   : > { %v6208_v26 = vpop.permute.xlu1 %501  ;;  %5143 = vmatpush3.msra.mxu0 %v6205_v0  ;;  %4933 = vmatpush3.msra.mxu1 %v6205_v0 }
  0xa3   : > { %v6214_v56 = vpop.permute.xlu0 %499 }
  0xa4   : > { %1211 = vrot.lane.b32.xlu1 %v1132_v28, %s5759_s5  ;;  %v1136_v28 = vsel %vm1125_vm3, %v1133_v29, %v1135_v16  ;;  %v934_v29 = vsel %vm923_vm2, %v931_v20, %v933_v57  ;;  %v935_v20 = vrot.slane %v5854_v19, 3 }
  0xa5   : > { %1011 = vrot.lane.b32.xlu0 %v932_v33, %s5758_s30  ;;  %v1137_v33 = vrot.slane %v5854_v19, 4 }
  0xa6   : > { %v6220_v13 = vpop.permute.xlu1 %505 }
  0xa7   : > { %v6224_v1 = vpop.permute.xlu0 %503  ;;  %v1138_v44 = vsel %vm1125_vm3, %v1135_v16, %v1137_v33 }
  0xa8   : > { %1213 = vrot.lane.b32.xlu1 %v1134_v41, %s5759_s5  ;;  %v1460_v41 = vsel %vm1453_vm4, %v1457_v9, %v1459_v10  ;;  %v1461_v9 = vrot.slane %v5854_v19, 5 }
  0xa9   : > { %1739 = vrot.lane.b32.xlu0 %v1660_v34, %s5762_s23 }
  0xaa   : > { %v6229_v7 = vpop.permute.xlu1 %509  ;;  %v1462_v52 = vsel %vm1453_vm4, %v1459_v10, %v1461_v9 }
  0xab   : > { %v6235_v46 = vpop.permute.xlu0 %507 }
  0xac   : > { %811 = vrot.lane.b32.xlu1 %v6034_v50, %s5757_s29  ;;  %v1661_v50 = vrot.slane %v5851_v18, 6 }
  0xad   : > { %1337 = vrot.lane.b32.xlu0 %v1136_v28, %s5760_s6 }
  0xae   : > { %v6242_v34 = vpop.permute.xlu1 %513  ;;  %v1662_v16 = vsel %vm1655_vm5, %v1659_v53, %v1661_v50 }
  0xaf   : > { %8979 = vst [vmem:[#allocation10_spill] sm:$0xff] %v6242_v34  ;;  %v6245_v11 = vpop.permute.xlu0 %511  ;;  %v1151_v34 = vrot.slane %v5899_v42, 4 }
  0xb0   : > { %8980 = vst [vmem:[#allocation11_spill] sm:$0xff] %v6245_v11  ;;  %1539 = vrot.lane.b32.xlu1 %v1460_v41, %s5761_s11 }
  0xb1   : > { %1339 = vrot.lane.b32.xlu0 %v1138_v44, %s5760_s6 }
  0xb2   : > { %v6251_v61 = vpop.permute.xlu1 %517 }
  0xb3   : > { %8981 = vst [vmem:[#allocation12_spill] sm:$0xff] %v6251_v61  ;;  %v6254_v12 = vpop.permute.xlu0 %515 }
  0xb4   : > { %8982 = vst [vmem:[#allocation13_spill] sm:$0xff] %v6254_v12  ;;  %1013 = vrot.lane.b32.xlu1 %v934_v29, %s5758_s30  ;;  %v936_v29 = vsel %vm923_vm2, %v933_v57, %v935_v20  ;;  %v1141_v57 = vrot.slane %v5866_v25, 4  ;;  %v1675_v12 = vrot.slane %v5890_v37, 6 }
  0xb5   : > { %813 = vrot.lane.b32.xlu0 %v6029_v45, %s5757_s29  ;;  %v1663_v45 = vrot.slane %v5854_v19, 6  ;;  %v1463_v19 = vrot.slane %v5863_v24, 5 }
  0xb6   : > { %v6260_v41 = vpop.permute.xlu1 %521 }
  0xb7   : > { %8983 = vst [vmem:[#allocation14_spill] sm:$0xff] %v6260_v41  ;;  %v6264_v18 = vpop.permute.xlu0 %519  ;;  %v1664_v53 = vsel %vm1655_vm5, %v1661_v50, %v1663_v45  ;;  %v1464_v50 = vsel %vm1453_vm4, %v1461_v9, %v1463_v19  ;;  %v1465_v9 = vrot.slane %v5866_v25, 5 }
  0xb8   : > { %8984 = vst [vmem:[#allocation15_spill] sm:$0xff] %v6264_v18  ;;  %1741 = vrot.lane.b32.xlu1 %v1662_v16, %s5762_s23  ;;  %v1139_v16 = vrot.slane %v5863_v24, 4 }
  0xb9   : > { %1541 = vrot.lane.b32.xlu0 %v1462_v52, %s5761_s11 }
  0xba   : > { %v6268_v39 = vpop.permute.xlu1 %525 }
  0xbb   : > { %8985 = vst [vmem:[#allocation16_spill] sm:$0xff] %v6268_v39  ;;  %v6272_v0 = vpop.permute.xlu0 %523 }
  0xbc   : > { %8986 = vst [vmem:[#allocation17_spill] sm:$0xff] %v6272_v0  ;;  %1215 = vrot.lane.b32.xlu1 %v1136_v28, %s5759_s5  ;;  %v1140_v28 = vsel %vm1125_vm3, %v1137_v33, %v1139_v16 }
  0xbd   : > { %1015 = vrot.lane.b32.xlu0 %v936_v29, %s5758_s30 }
  0xbe   : > { %v6276_v10 = vpop.permute.xlu1 %529 }
  0xbf   : > { %8987 = vst [vmem:[#allocation18_spill] sm:$0xff] %v6276_v10  ;;  %v6280_v4 = vpop.permute.xlu0 %527  ;;  %v1142_v10 = vsel %vm1125_vm3, %v1139_v16, %v1141_v57 }
  0xc0   : > { %8988 = vst [vmem:[#allocation19_spill] sm:$0xff] %v6280_v4  ;;  %1217 = vrot.lane.b32.xlu1 %v1138_v44, %s5759_s5  ;;  %v937_v44 = vrot.slane %v5863_v24, 3 }
  0xc1   : > { %1743 = vrot.lane.b32.xlu0 %v1664_v53, %s5762_s23 }
  0xc2   : > { %v6285_v52 = vpop.permute.xlu1 %533  ;;  %v938_v33 = vsel %vm923_vm2, %v935_v20, %v937_v44  ;;  %v939_v20 = vrot.slane %v5866_v25, 3 }
  0xc3   : > { %8989 = vst [vmem:[#allocation20_spill] sm:$0xff] %v6285_v52  ;;  %v6289_v29 = vpop.permute.xlu0 %531 }
  0xc4   : > { %8990 = vst [vmem:[#allocation21_spill] sm:$0xff] %v6289_v29  ;;  %815 = vrot.lane.b32.xlu1 %v6046_v54, %s5757_s29  ;;  %v1665_v54 = vrot.slane %v5863_v24, 6 }
  0xc5   : > { %1341 = vrot.lane.b32.xlu0 %v1140_v28, %s5760_s6 }
  0xc6   : > { %v6296_v53 = vpop.permute.xlu1 %537  ;;  %v1666_v16 = vsel %vm1655_vm5, %v1663_v45, %v1665_v54 }
  0xc7   : > { %8991 = vst [vmem:[#allocation22_spill] sm:$0xff] %v6296_v53  ;;  %v6299_v52 = vpop.permute.xlu0 %535  ;;  %v1466_v53 = vsel %vm1453_vm4, %v1463_v19, %v1465_v9 }
  0xc8   : > { %8992 = vst [vmem:[#allocation23_spill] sm:$0xff] %v6299_v52  ;;  %1543 = vrot.lane.b32.xlu1 %v1464_v50, %s5761_s11 }
  0xc9   : > { %1343 = vrot.lane.b32.xlu0 %v1142_v10, %s5760_s6 }
  0xca   : > { %v6305_v29 = vpop.permute.xlu1 %541 }
  0xcb   : > { %8993 = vst [vmem:[#allocation24_spill] sm:$0xff] %v6305_v29  ;;  %v6308_v60 = vpop.permute.xlu0 %539 }
  0xcc   : > { %8994 = vst [vmem:[#allocation25_spill] sm:$0xff] %v6308_v60  ;;  %1017 = vrot.lane.b32.xlu1 %v938_v33, %s5758_s30  ;;  %v940_v33 = vsel %vm923_vm2, %v937_v44, %v939_v20 }
  0xcd   : > { %817 = vrot.lane.b32.xlu0 %v6041_v51, %s5757_s29  ;;  %v1667_v51 = vrot.slane %v5866_v25, 6  ;;  %v1467_v25 = vrot.slane %v5875_v30, 5 }
  0xce   : > { %v6314_v50 = vpop.permute.xlu1 %545 }
  0xcf   : > { %8995 = vst [vmem:[#allocation26_spill] sm:$0xff] %v6314_v50  ;;  %v6318_v24 = vpop.permute.xlu0 %543  ;;  %v1668_v19 = vsel %vm1655_vm5, %v1665_v54, %v1667_v51  ;;  %v1468_v54 = vsel %vm1453_vm4, %v1465_v9, %v1467_v25  ;;  %v1469_v9 = vrot.slane %v5878_v31, 5 }
  0xd0   : > { %8996 = vst [vmem:[#allocation27_spill] sm:$0xff] %v6318_v24  ;;  %1745 = vrot.lane.b32.xlu1 %v1666_v16, %s5762_s23  ;;  %v1143_v16 = vrot.slane %v5875_v30, 4 }
  0xd1   : > { %1545 = vrot.lane.b32.xlu0 %v1466_v53, %s5761_s11  ;;  %v1145_v53 = vrot.slane %v5878_v31, 4  ;;  %v1470_v24 = vsel %vm1453_vm4, %v1467_v25, %v1469_v9 }
  0xd2   : > { %v6322_v29 = vpop.permute.xlu1 %549 }
  0xd3   : > { %8997 = vst [vmem:[#allocation28_spill] sm:$0xff] %v6322_v29  ;;  %v6326_v60 = vpop.permute.xlu0 %547 }
  0xd4   : > { %8998 = vst [vmem:[#allocation29_spill] sm:$0xff] %v6326_v60  ;;  %1219 = vrot.lane.b32.xlu1 %v1140_v28, %s5759_s5  ;;  %v1144_v28 = vsel %vm1125_vm3, %v1141_v57, %v1143_v16 }
  0xd5   : > { %1019 = vrot.lane.b32.xlu0 %v940_v33, %s5758_s30 }
  0xd6   : > { %v6330_v45 = vpop.permute.xlu1 %553 }
  0xd7   : > { %8999 = vst [vmem:[#allocation30_spill] sm:$0xff] %v6330_v45  ;;  %v6334_v50 = vpop.permute.xlu0 %551 }
  0xd8   : > { %9000 = vst [vmem:[#allocation31_spill] sm:$0xff] %v6334_v50  ;;  %1221 = vrot.lane.b32.xlu1 %v1142_v10, %s5759_s5  ;;  %v941_v10 = vrot.slane %v5875_v30, 3  ;;  %v1146_v50 = vsel %vm1125_vm3, %v1143_v16, %v1145_v53 }
  0xd9   : > { %1747 = vrot.lane.b32.xlu0 %v1668_v19, %s5762_s23 }
  0xda   : > { %v6339_v44 = vpop.permute.xlu1 %679  ;;  %v942_v57 = vsel %vm923_vm2, %v939_v20, %v941_v10  ;;  %v943_v20 = vrot.slane %v5878_v31, 3 }
  0xdb   : > { %v6343_v33 = vpop.permute.xlu0 %677 }
  0xdc   : > { %819 = vrot.lane.b32.xlu1 %v6058_v58, %s5757_s29  ;;  %v1669_v58 = vrot.slane %v5875_v30, 6 }
  0xdd   : > { %1345 = vrot.lane.b32.xlu0 %v1144_v28, %s5760_s6 }
  0xde   : > { %v6350_v19 = vpop.permute.xlu1 %683  ;;  %v1670_v16 = vsel %vm1655_vm5, %v1667_v51, %v1669_v58 }
  0xdf   : > { %v6353_v45 = vpop.permute.xlu0 %681 }
  0xe0   : > { %1547 = vrot.lane.b32.xlu1 %v1468_v54, %s5761_s11 }
  0xe1   : > { %1347 = vrot.lane.b32.xlu0 %v1146_v50, %s5760_s6 }
  0xe2   : > { %v6359_v29 = vpop.permute.xlu1 %687 }
  0xe3   : > { %v6362_v60 = vpop.permute.xlu0 %685 }
  0xe4   : > { %1021 = vrot.lane.b32.xlu1 %v942_v57, %s5758_s30  ;;  %v944_v57 = vsel %vm923_vm2, %v941_v10, %v943_v20  ;;  %v1149_v10 = vrot.slane %v5890_v37, 4 }
  0xe5   : > { %821 = vrot.lane.b32.xlu0 %v6053_v55, %s5757_s29  ;;  %v1671_v55 = vrot.slane %v5878_v31, 6  ;;  %v1471_v31 = vrot.slane %v5887_v36, 5 }
  0xe6   : > { %v6368_v54 = vpop.permute.xlu1 %691 }
  0xe7   : > { %v6372_v30 = vpop.permute.xlu0 %689  ;;  %v1672_v25 = vsel %vm1655_vm5, %v1669_v58, %v1671_v55  ;;  %v1472_v58 = vsel %vm1453_vm4, %v1469_v9, %v1471_v31  ;;  %v1473_v9 = vrot.slane %v5890_v37, 5 }
  0xe8   : > { %1749 = vrot.lane.b32.xlu1 %v1670_v16, %s5762_s23  ;;  %v1147_v16 = vrot.slane %v5887_v36, 4 }
  0xe9   : > { %1549 = vrot.lane.b32.xlu0 %v1470_v24, %s5761_s11 }
  0xea   : > { %v6376_v52 = vpop.permute.xlu1 %695  ;;  %v1150_v38 = vsel %vm1125_vm3, %v1147_v16, %v1149_v10 }
  0xeb   : > { %v6380_v4 = vpop.permute.xlu0 %693 }
  0xec   : > { %1223 = vrot.lane.b32.xlu1 %v1144_v28, %s5759_s5  ;;  %v1148_v28 = vsel %vm1125_vm3, %v1145_v53, %v1147_v16 }
  0xed   : > { %1023 = vrot.lane.b32.xlu0 %v944_v57, %s5758_s30 }
  0xee   : > { %v6384_v51 = vpop.permute.xlu1 %699 }
  0xef   : > { %v6388_v39 = vpop.permute.xlu0 %697 }
  0xf0   : > { %1225 = vrot.lane.b32.xlu1 %v1146_v50, %s5759_s5  ;;  %v945_v50 = vrot.slane %v5887_v36, 3 }
  0xf1   : > { %1751 = vrot.lane.b32.xlu0 %v1672_v25, %s5762_s23 }
  0xf2   : > { %v6393_v24 = vpop.permute.xlu1 %703  ;;  %v946_v53 = vsel %vm923_vm2, %v943_v20, %v945_v50  ;;  %v947_v20 = vrot.slane %v5890_v37, 3 }
  0xf3   : > { %v6397_v57 = vpop.permute.xlu0 %701 }
  0xf4   : > { %823 = vrot.lane.b32.xlu1 %v6070_v62, %s5757_s29  ;;  %v1673_v62 = vrot.slane %v5887_v36, 6 }
  0xf5   : > { %1349 = vrot.lane.b32.xlu0 %v1148_v28, %s5760_s6 }
  0xf6   : > { %v6404_v25 = vpop.permute.xlu1 %707  ;;  %v1674_v16 = vsel %vm1655_vm5, %v1671_v55, %v1673_v62 }
  0xf7   : > { %v6407_v35 = vpop.permute.xlu0 %705 }
  0xf8   : > { %1551 = vrot.lane.b32.xlu1 %v1472_v58, %s5761_s11  ;;  %v1474_v58 = vsel %vm1453_vm4, %v1471_v31, %v1473_v9  ;;  %v1676_v31 = vsel %vm1655_vm5, %v1673_v62, %v1675_v12  ;;  %v1858_v62 = vsel %vm1857_vm6, %v5823_v2, %v6100_v17  ;;  %v9001_v2 = vrot.slane %v5902_v43, 4 }
  0xf9   : > { %1351 = vrot.lane.b32.xlu0 %v1150_v38, %s5760_s6 }
  0xfa   : > { %v6413_v0 = vpop.permute.xlu1 %805  ;;  %v1154_v17 = vsel %vm1125_vm3, %v1151_v34, %v9001_v2 }
  0xfb   : > { %v804_v41 = vpop.permute.xlu0 %803 }
  0xfc   : > { %1025 = vrot.lane.b32.xlu1 %v946_v53, %s5758_s30  ;;  %v948_v53 = vsel %vm923_vm2, %v945_v50, %v947_v20  ;;  %v1475_v50 = vrot.slane %v5899_v42, 5 }
  0xfd   : > { %825 = vrot.lane.b32.xlu0 %v6065_v59, %s5757_s29 }
  0xfe   : > { %v6420_v18 = vpop.permute.xlu1 %1007 }
  0xff   : > { %v1006_v61 = vpop.permute.xlu0 %1005 }
 0x100   : > { %1753 = vrot.lane.b32.xlu1 %v1674_v16, %s5762_s23 }
 0x101   : > { %1553 = vrot.lane.b32.xlu0 %v1474_v58, %s5761_s11 }
 0x102   : > { %v6426_v36 = vpop.permute.xlu1 %1209 }
 0x103   : > { %v1208_v59 = vpop.permute.xlu0 %1207 }
 0x104   : > { %1227 = vrot.lane.b32.xlu1 %v1148_v28, %s5759_s5  ;;  %v1152_v28 = vsel %vm1125_vm3, %v1149_v10, %v1151_v34  ;;  %v1476_v10 = vsel %vm1453_vm4, %v1473_v9, %v1475_v50 }
 0x105   : > { %1027 = vrot.lane.b32.xlu0 %v948_v53, %s5758_s30 }
 0x106   : > { %v6432_v55 = vpop.permute.xlu1 %807 }
 0x107   : > { %v1334_v16 = vpop.permute.xlu0 %1333 }
 0x108   : > { %1229 = vrot.lane.b32.xlu1 %v1150_v38, %s5759_s5  ;;  %v1899_v38 = vsel %vm1898_vm7, %v1858_v62, %v6343_v33 }
 0x109   : > { %1755 = vrot.lane.b32.xlu0 %v1676_v31, %s5762_s23  ;;  %v949_v31 = vrot.slane %v5899_v42, 3  ;;  %v1940_v58 = vsel %vm1939_vm8, %v1899_v38, %v804_v41  ;;  %v1677_v38 = vrot.slane %v5899_v42, 6 }
 0x10a   : > { %v1536_v37 = vpop.permute.xlu1 %1535 }
 0x10b   : > { %v1336_v53 = vpop.permute.xlu0 %1335  ;;  %v950_v41 = vsel %vm923_vm2, %v947_v20, %v949_v31  ;;  %v1678_v42 = vsel %vm1655_vm5, %v1675_v12, %v1677_v38 }
 0x10c   : > { %827 = vrot.lane.b32.xlu1 %v6082_v3, %s5757_s29  ;;  %v1981_v3 = vsel %vm1980_vm9, %v1940_v58, %v1006_v61  ;;  %v1477_v58 = vrot.slane %v5902_v43, 5 }
 0x10d   : > { %1353 = vrot.lane.b32.xlu0 %v1152_v28, %s5760_s6  ;;  %v2022_v62 = vsel %vm2021_vm10, %v1981_v3, %v1208_v59 }
 0x10e   : > { %v6452_v11 = vpop.permute.xlu1 %1009  ;;  %v2063_v9 = vsel %vm2062_vm11, %v2022_v62, %v1334_v16  ;;  %v1859_v16 = vsel %vm1857_vm6, %v5828_v5, %v6109_v23  ;;  %v1478_v62 = vsel %vm1453_vm4, %v1475_v50, %v1477_v58 }
 0x10f   : > { %v6458_v33 = vpop.permute.xlu0 %809  ;;  %v2104_v34 = vsel %vm2103_vm12, %v2063_v9, %v1536_v37  ;;  %v1900_v20 = vsel %vm1898_vm7, %v1859_v16, %v6339_v44  ;;  %v951_v9 = vrot.slane %v5902_v43, 3 }
 0x110   : > { %1555 = vrot.lane.b32.xlu1 %v1476_v10, %s5761_s11 }
 0x111   : > { %1355 = vrot.lane.b32.xlu0 %v1154_v17, %s5760_s6 }
 0x112   : > { %v1738_v61 = vpop.permute.xlu1 %1737 }
 0x113   : > { %v2145_v2 = vsel %vm2144_vm13, %v2104_v34, %v1738_v61  ;;  %v1538_v59 = vpop.permute.xlu0 %1537  ;;  %v952_v34 = vsel %vm923_vm2, %v949_v31, %v951_v9  ;;  %v1679_v61 = vrot.slane %v5902_v43, 6 }
 0x114   : > { %v2199_v10 = vsel %vm2197_vm14, %v2145_v2, 0  ;;  %1029 = vrot.lane.b32.xlu1 %v950_v41, %s5758_s30  ;;  %v1941_v41 = vsel %vm1939_vm8, %v1900_v20, %v6413_v0 }
 0x115   : > { %v6474_v3 = vand.u32 4294901760, %v2199_v10  ;;  %829 = vrot.lane.b32.xlu0 %v6079_v63, %s5757_s29  ;;  %v1982_v63 = vsel %vm1980_vm9, %v1941_v41, %v6420_v18 }
 0x116   : > { %v1212_v37 = vpop.permute.xlu1 %1211  ;;  %v2023_v12 = vsel %vm2021_vm10, %v1982_v63, %v6426_v36  ;;  %v9004_v63 = vrot.slane %v5902_v43, 2 }
 0x117   : > { %v6486_v5 = vsub.f32 %v2199_v10, %v6474_v3  ;;  %v6488_v23 = vpop.permute.xlu0 %1011  ;;  %v2064_v50 = vsel %vm2062_vm11, %v2023_v12, %v1336_v53 }
 0x118   : > { %1757 = vrot.lane.b32.xlu1 %v1678_v42, %s5762_s23  ;;  %v2105_v2 = vsel %vm2103_vm12, %v2064_v50, %v1538_v59  ;;  %v629_v42 = vrot.slane %v5911_v48, 2  ;;  %v1680_v59 = vsel %vm1655_vm5, %v1677_v38, %v1679_v61 }
 0x119   : > { %9002 = vst [vmem:[#allocation32_spill] sm:$0xff] %v6486_v5  ;;  %1557 = vrot.lane.b32.xlu0 %v1478_v62, %s5761_s11  ;;  %v2393_v44 = vand.u32 4294901760, %v6486_v5  ;;  %v1155_v62 = vrot.slane %v5911_v48, 4 }
 0x11a   : > { %v6498_v0 = vpop.permute.xlu1 %1213  ;;  %v6525_v12 = vsel %vm595_vm1, %v9004_v63, %v629_v42  ;;  %v953_v63 = vrot.slane %v5911_v48, 3 }
 0x11b   : > { %v1740_v18 = vpop.permute.xlu0 %1739  ;;  %5144 = vmatprep.mubr.f32.mxu0 %v2393_v44  ;;  %v2394_v10 = vsub.f32 %v6486_v5, %v2393_v44  ;;  %v1479_v44 = vrot.slane %v5911_v48, 5 }
 0x11c   : > { %v2146_v36 = vsel %vm2144_vm13, %v2105_v2, %v1740_v18  ;;  %1231 = vrot.lane.b32.xlu1 %v1152_v28, %s5759_s5  ;;  %v8887_v18 = vrot.slane %v5914_v49, 4 }
 0x11d   : > { %v2202_v16 = vsel %vm2197_vm14, %v2146_v36, 0  ;;  %1031 = vrot.lane.b32.xlu0 %v952_v34, %s5758_s30  ;;  %v2395_v53 = vand.u32 4294901760, %v2394_v10  ;;  %v9005_v34 = vrot.slane %v5902_v43, 4  ;;  %v5668_v10 = vld [vmem:[%s5814_s22 + $0x10] sm:$0xff] }
 0x11e   : > { %v6509_v31 = vand.u32 4294901760, %v2202_v16  ;;  %v6511_v20 = vpop.permute.xlu1 %811  ;;  %v1860_v36 = vsel %vm1857_vm6, %v5668_v10, %v6096_v14 }
 0x11f   : > { %v1338_v41 = vpop.permute.xlu0 %1337  ;;  %4934 = vmatprep.mubr.f32.mxu1 %v2395_v53  ;;  %v6532_v2 = vsel %vm1125_vm3, %v9005_v34, %v1155_v62  ;;  %v1901_v53 = vsel %vm1898_vm7, %v1860_v36, %v6353_v45  ;;  %v631_v45 = vrot.slane %v5914_v49, 2 }
 0x120   : > { %v6518_v28 = vsub.f32 %v2202_v16, %v6509_v31  ;;  %1233 = vrot.lane.b32.xlu1 %v1154_v17, %s5759_s5  ;;  %v1942_v14 = vsel %vm1939_vm8, %v1901_v53, %v6432_v55 }
 0x121   : > { %1759 = vrot.lane.b32.xlu0 %v1680_v59, %s5762_s23  ;;  %v1480_v59 = vsel %vm1453_vm4, %v1477_v58, %v1479_v44  ;;  %v1983_v36 = vsel %vm1980_vm9, %v1942_v14, %v6452_v11  ;;  %v6575_v14 = vld [vmem:[%s5814_s22 + $0x90] sm:$0xff] }
 0x122   : > { %9003 = vst [vmem:[#allocation33_spill] sm:$0xff] %v6518_v28  ;;  %v1540_v50 = vpop.permute.xlu1 %1539  ;;  %v2403_v38 = vand.u32 4294901760, %v6518_v28  ;;  %v2024_v48 = vsel %vm2021_vm10, %v1983_v36, %v1212_v37  ;;  %v6572_v37 = vsel %vm595_vm1, %v629_v42, %v631_v45 }
 0x123   : > { %v1340_v17 = vpop.permute.xlu0 %1339  ;;  %v2065_v55 = vsel %vm2062_vm11, %v2024_v48, %v1338_v41 }
 0x124   : > { %5145 = vmatmul.mubr.f32.vlgmr.msra.gmra.mrb[0].mxu0 %v2403_v38  ;;  %831 = vrot.lane.b32.xlu1 %v6525_v12, %s5757_s29  ;;  %v2404_v16 = vsub.f32 %v6518_v28, %v2403_v38  ;;  %v6554_v38 = vsel %vm1125_vm3, %v1155_v62, %v8887_v18  ;;  %v954_v62 = vsel %vm923_vm2, %v951_v9, %v953_v63  ;;  %v5671_v9 = vld [vmem:[%s5814_s22 + $0x18] sm:$0xff] }
 0x125   : > { %1357 = vrot.lane.b32.xlu0 %v6532_v2, %s5760_s6  ;;  %v2106_v18 = vsel %vm2103_vm12, %v2065_v55, %v1540_v50  ;;  %v1861_v50 = vsel %vm1857_vm6, %v5671_v9, %v6105_v21 }
 0x126   : > { %v6549_v34 = vpop.permute.xlu1 %1013  ;;  %v2405_v10 = vand.u32 4294901760, %v2404_v16  ;;  %v5669_v16 = vld [vmem:[%s5814_s22 + $0x88] sm:$0xff] }
 0x127   : > { %v6559_v58 = vpop.permute.xlu0 %813  ;;  %v1681_v53 = vrot.slane %v5669_v16, 6  ;;  %v955_v16 = vrot.slane %v6575_v14, 3 }
 0x128   : > { %4935 = vmatmul.mubr.f32.vlgmr.msra.gmra.mrb[0].mxu1 %v2405_v10  ;;  %1559 = vrot.lane.b32.xlu1 %v1480_v59, %s5761_s11  ;;  %v1481_v59 = vrot.slane %v6575_v14, 5 }
 0x129   : > { %1359 = vrot.lane.b32.xlu0 %v6554_v38, %s5760_s6  ;;  %v1682_v42 = vsel %vm1655_vm5, %v1679_v61, %v1681_v53 }
 0x12a   : > { %v1742_v11 = vpop.permute.xlu1 %1741 }
 0x12b   : > { %v2147_v41 = vsel %vm2144_vm13, %v2106_v18, %v1742_v11  ;;  %v1542_v10 = vpop.permute.xlu0 %1541  ;;  %v1902_v18 = vsel %vm1898_vm7, %v1861_v50, %v6350_v19 }
 0x12c   : > { %v2205_v36 = vsel %vm2197_vm14, %v2147_v41, 0  ;;  %1033 = vrot.lane.b32.xlu1 %v954_v62, %s5758_s30  ;;  %v1482_v62 = vsel %vm1453_vm4, %v1479_v44, %v1481_v59  ;;  %v1943_v21 = vsel %vm1939_vm8, %v1902_v18, %v6458_v33 }
 0x12d   : > { %v6584_v48 = vand.u32 4294901760, %v2205_v36  ;;  %833 = vrot.lane.b32.xlu0 %v6572_v37, %s5757_s29  ;;  %v1984_v43 = vsel %vm1980_vm9, %v1943_v21, %v6488_v23  ;;  %v1683_v23 = vrot.slane %v6575_v14, 6 }
 0x12e   : > { %v1216_v55 = vpop.permute.xlu1 %1215  ;;  %v2025_v19 = vsel %vm2021_vm10, %v1984_v43, %v6498_v0 }
 0x12f   : > { %v6600_v11 = vsub.f32 %v2205_v36, %v6584_v48  ;;  %v6602_v41 = vpop.permute.xlu0 %1015  ;;  %v2066_v33 = vsel %vm2062_vm11, %v2025_v19, %v1340_v17  ;;  %v956_v36 = vsel %vm923_vm2, %v953_v63, %v955_v16  ;;  %v6626_v63 = vld [vmem:[%s5814_s22 + $0x98] sm:$0xff]  ;;  %v1684_v43 = vsel %vm1655_vm5, %v1681_v53, %v1683_v23 }
 0x130   : > { %1761 = vrot.lane.b32.xlu1 %v1682_v42, %s5762_s23  ;;  %v2107_v9 = vsel %vm2103_vm12, %v2066_v33, %v1542_v10 }
 0x131   : > { %9006 = vst [vmem:[#allocation34_spill] sm:$0xff] %v6600_v11  ;;  %1561 = vrot.lane.b32.xlu0 %v1482_v62, %s5761_s11  ;;  %v2413_v61 = vand.u32 4294901760, %v6600_v11  ;;  %v1159_v62 = vrot.slane %v6626_v63, 4 }
 0x132   : > { %v6612_v44 = vpop.permute.xlu1 %1217 }
 0x133   : > { %v1744_v50 = vpop.permute.xlu0 %1743  ;;  %5147 = vmatprep.mubr.f32.mxu0 %v2413_v61  ;;  %v2414_v0 = vsub.f32 %v6600_v11, %v2413_v61  ;;  %v9008_v61 = vrot.slane %v5914_v49, 4 }
 0x134   : > { %v2148_v42 = vsel %vm2144_vm13, %v2107_v9, %v1744_v50  ;;  %1235 = vrot.lane.b32.xlu1 %v6532_v2, %s5759_s5 }
 0x135   : > { %v2208_v17 = vsel %vm2197_vm14, %v2148_v42, 0  ;;  %1035 = vrot.lane.b32.xlu0 %v956_v36, %s5758_s30  ;;  %v2415_v18 = vand.u32 4294901760, %v2414_v0  ;;  %v6645_v33 = vsel %vm1125_vm3, %v9008_v61, %v1159_v62  ;;  %v633_v36 = vrot.slane %v6626_v63, 2  ;;  %v5673_v0 = vld [vmem:[%s5814_s22 + $0x20] sm:$0xff] }
 0x136   : > { %v6629_v10 = vand.u32 4294901760, %v2208_v17  ;;  %v6631_v21 = vpop.permute.xlu1 %815  ;;  %v1862_v42 = vsel %vm1857_vm6, %v5673_v0, %v6119_v32 }
 0x137   : > { %v1342_v19 = vpop.permute.xlu0 %1341  ;;  %4937 = vmatprep.mubr.f32.mxu1 %v2415_v18  ;;  %v6662_v18 = vsel %vm595_vm1, %v631_v45, %v633_v36 }
 0x138   : > { %v6637_v2 = vsub.f32 %v2208_v17, %v6629_v10  ;;  %709 = vrot.lane.b32.xlu1 %v6525_v12, %s5756_s28  ;;  %v1903_v17 = vsel %vm1898_vm7, %v1862_v42, %v6362_v60 }
 0x139   : > { %1763 = vrot.lane.b32.xlu0 %v1684_v43, %s5762_s23  ;;  %v1483_v43 = vrot.slane %v6626_v63, 5  ;;  %v1944_v32 = vsel %vm1939_vm8, %v1903_v17, %v6511_v20 }
 0x13a   : > { %9007 = vst [vmem:[#allocation35_spill] sm:$0xff] %v6637_v2  ;;  %v1544_v9 = vpop.permute.xlu1 %1543  ;;  %v2423_v53 = vand.u32 4294901760, %v6637_v2 }
 0x13b   : > { %v1344_v50 = vpop.permute.xlu0 %1343  ;;  %v1484_v45 = vsel %vm1453_vm4, %v1481_v59, %v1483_v43  ;;  %v5675_v59 = vld [vmem:[%s5814_s22 + $0x28] sm:$0xff] }
 0x13c   : > { %5148 = vmatmul.mubr.f32.gmra.mrb[2].mxu0 %v2423_v53  ;;  %1361 = vrot.lane.b32.xlu1 %v6645_v33, %s5760_s6  ;;  %v2424_v12 = vsub.f32 %v6637_v2, %v2423_v53  ;;  %v6670_v53 = vld [vmem:[%s5814_s22 + $0xa0] sm:$0xff] }
 0x13d   : > { %1237 = vrot.lane.b32.xlu0 %v6554_v38, %s5759_s5  ;;  %v1161_v60 = vrot.slane %v6670_v53, 4  ;;  %v1985_v38 = vsel %vm1980_vm9, %v1944_v32, %v6549_v34  ;;  %v957_v34 = vrot.slane %v6626_v63, 3  ;;  %v635_v32 = vrot.slane %v6670_v53, 2 }
 0x13e   : > { %v6667_v61 = vpop.permute.xlu1 %1017  ;;  %v2425_v0 = vand.u32 4294901760, %v2424_v12  ;;  %v2026_v49 = vsel %vm2021_vm10, %v1985_v38, %v1216_v55  ;;  %v1863_v38 = vsel %vm1857_vm6, %v5675_v59, %v6115_v27  ;;  %v1485_v27 = vrot.slane %v6670_v53, 5 }
 0x13f   : > { %v6675_v42 = vpop.permute.xlu0 %817  ;;  %v2067_v20 = vsel %vm2062_vm11, %v2026_v49, %v1342_v19  ;;  %v6691_v55 = vsel %vm1125_vm3, %v1159_v62, %v1161_v60  ;;  %v958_v62 = vsel %vm923_vm2, %v955_v16, %v957_v34  ;;  %v1685_v49 = vrot.slane %v6626_v63, 6 }
 0x140   : > { %4938 = vmatmul.mubr.f32.gmra.mrb[2].mxu1 %v2425_v0  ;;  %835 = vrot.lane.b32.xlu1 %v6662_v18, %s5757_s29  ;;  %v2108_v12 = vsel %vm2103_vm12, %v2067_v20, %v1544_v9  ;;  %v1904_v20 = vsel %vm1898_vm7, %v1863_v38, %v6359_v29  ;;  %v959_v38 = vrot.slane %v6670_v53, 3 }
 0x141   : > { %711 = vrot.lane.b32.xlu0 %v6572_v37, %s5756_s28 }
 0x142   : > { %v1746_v17 = vpop.permute.xlu1 %1745 }
 0x143   : > { %v2149_v19 = vsel %vm2144_vm13, %v2108_v12, %v1746_v17  ;;  %v1546_v0 = vpop.permute.xlu0 %1545  ;;  %v1945_v17 = vsel %vm1939_vm8, %v1904_v20, %v6559_v58  ;;  %v1686_v58 = vsel %vm1655_vm5, %v1683_v23, %v1685_v49 }
 0x144   : > { %v2211_v37 = vsel %vm2197_vm14, %v2149_v19, 0  ;;  %1563 = vrot.lane.b32.xlu1 %v1484_v45, %s5761_s11  ;;  %v6713_v45 = vsel %vm595_vm1, %v633_v36, %v635_v32  ;;  %v1986_v63 = vsel %vm1980_vm9, %v1945_v17, %v6602_v41  ;;  %v1486_v41 = vsel %vm1453_vm4, %v1483_v43, %v1485_v27 }
 0x145   : > { %v6700_v9 = vand.u32 4294901760, %v2211_v37  ;;  %1363 = vrot.lane.b32.xlu0 %v6691_v55, %s5760_s6  ;;  %v2027_v29 = vsel %vm2021_vm10, %v1986_v63, %v6612_v44  ;;  %v1687_v63 = vrot.slane %v6670_v53, 6 }
 0x146   : > { %v1220_v12 = vpop.permute.xlu1 %1219 }
 0x147   : > { %v6719_v19 = vsub.f32 %v2211_v37, %v6700_v9  ;;  %v6721_v16 = vpop.permute.xlu0 %1019  ;;  %v2068_v37 = vsel %vm2062_vm11, %v2027_v29, %v1344_v50 }
 0x148   : > { %1037 = vrot.lane.b32.xlu1 %v958_v62, %s5758_s30  ;;  %v2109_v44 = vsel %vm2103_vm12, %v2068_v37, %v1546_v0  ;;  %v960_v0 = vsel %vm923_vm2, %v957_v34, %v959_v38  ;;  %v1688_v34 = vsel %vm1655_vm5, %v1685_v49, %v1687_v63 }
 0x149   : > { %9009 = vst [vmem:[#allocation36_spill] sm:$0xff] %v6719_v19  ;;  %837 = vrot.lane.b32.xlu0 %v6713_v45, %s5757_s29  ;;  %v2433_v36 = vand.u32 4294901760, %v6719_v19 }
 0x14a   : > { %v6735_v59 = vpop.permute.xlu1 %1221 }
 0x14b   : > { %v1748_v62 = vpop.permute.xlu0 %1747  ;;  %5150 = vmatprep.mubr.f32.mxu0 %v2433_v36  ;;  %v2434_v20 = vsub.f32 %v6719_v19, %v2433_v36 }
 0x14c   : > { %v2150_v14 = vsel %vm2144_vm13, %v2109_v44, %v1748_v62  ;;  %1765 = vrot.lane.b32.xlu1 %v1686_v58, %s5762_s23  ;;  %v6762_v58 = vld [vmem:[%s5814_s22 + $0xa8] sm:$0xff] }
 0x14d   : > { %v2214_v23 = vsel %vm2197_vm14, %v2150_v14, 0  ;;  %1565 = vrot.lane.b32.xlu0 %v1486_v41, %s5761_s11  ;;  %v2435_v50 = vand.u32 4294901760, %v2434_v20  ;;  %v1163_v37 = vrot.slane %v6762_v58, 4  ;;  %v5677_v20 = vld [vmem:[%s5814_s22 + $0x30] sm:$0xff] }
 0x14e   : > { %v6747_v43 = vand.u32 4294901760, %v2214_v23  ;;  %v6749_v17 = vpop.permute.xlu1 %819  ;;  %v1864_v14 = vsel %vm1857_vm6, %v5677_v20, %v6143_v47 }
 0x14f   : > { %v1346_v29 = vpop.permute.xlu0 %1345  ;;  %4940 = vmatprep.mubr.f32.mxu1 %v2435_v50  ;;  %v6781_v49 = vsel %vm1125_vm3, %v1161_v60, %v1163_v37  ;;  %v637_v50 = vrot.slane %v6762_v58, 2 }
 0x150   : > { %v6756_v36 = vsub.f32 %v2214_v23, %v6747_v43  ;;  %1239 = vrot.lane.b32.xlu1 %v6645_v33, %s5759_s5  ;;  %v1905_v23 = vsel %vm1898_vm7, %v1864_v14, %v6372_v30 }
 0x151   : > { %1039 = vrot.lane.b32.xlu0 %v960_v0, %s5758_s30  ;;  %v1946_v47 = vsel %vm1939_vm8, %v1905_v23, %v6631_v21  ;;  %v6801_v21 = vsel %vm595_vm1, %v635_v32, %v637_v50 }
 0x152   : > { %9010 = vst [vmem:[#allocation37_spill] sm:$0xff] %v6756_v36  ;;  %v1548_v41 = vpop.permute.xlu1 %1547  ;;  %v2443_v44 = vand.u32 4294901760, %v6756_v36 }
 0x153   : > { %v1348_v62 = vpop.permute.xlu0 %1347 }
 0x154   : > { %5151 = vmatmul.mubr.f32.gmra.mrb[4].mxu0 %v2443_v44  ;;  %713 = vrot.lane.b32.xlu1 %v6662_v18, %s5756_s28  ;;  %v2444_v33 = vsub.f32 %v6756_v36, %v2443_v44  ;;  %v1987_v44 = vsel %vm1980_vm9, %v1946_v47, %v6667_v61  ;;  %v1487_v61 = vrot.slane %v6762_v58, 5 }
 0x155   : > { %1767 = vrot.lane.b32.xlu0 %v1688_v34, %s5762_s23  ;;  %v2028_v34 = vsel %vm2021_vm10, %v1987_v44, %v1220_v12  ;;  %v6806_v12 = vld [vmem:[%s5814_s22 + $0xb0] sm:$0xff]  ;;  %v961_v44 = vrot.slane %v6762_v58, 3 }
 0x156   : > { %v6786_v0 = vpop.permute.xlu1 %1021  ;;  %v2445_v18 = vand.u32 4294901760, %v2444_v33  ;;  %v2069_v60 = vsel %vm2062_vm11, %v2028_v34, %v1346_v29  ;;  %v1165_v33 = vrot.slane %v6806_v12, 4 }
 0x157   : > { %v6790_v30 = vpop.permute.xlu0 %821  ;;  %v2110_v20 = vsel %vm2103_vm12, %v2069_v60, %v1548_v41  ;;  %v1488_v41 = vsel %vm1453_vm4, %v1485_v27, %v1487_v61 }
 0x158   : > { %4941 = vmatmul.mubr.f32.gmra.mrb[4].mxu1 %v2445_v18  ;;  %1365 = vrot.lane.b32.xlu1 %v6781_v49, %s5760_s6 }
 0x159   : > { %1241 = vrot.lane.b32.xlu0 %v6691_v55, %s5759_s5  ;;  %v5679_v55 = vld [vmem:[%s5814_s22 + $0x38] sm:$0xff] }
 0x15a   : > { %v1750_v14 = vpop.permute.xlu1 %1749  ;;  %v1865_v32 = vsel %vm1857_vm6, %v5679_v55, %v6136_v40  ;;  %v639_v40 = vrot.slane %v6806_v12, 2 }
 0x15b   : > { %v2151_v23 = vsel %vm2144_vm13, %v2110_v20, %v1750_v14  ;;  %v1550_v29 = vpop.permute.xlu0 %1549  ;;  %v1906_v34 = vsel %vm1898_vm7, %v1865_v32, %v6368_v54  ;;  %v6829_v20 = vsel %vm1125_vm3, %v1163_v37, %v1165_v33 }
 0x15c   : > { %v2217_v47 = vsel %vm2197_vm14, %v2151_v23, 0  ;;  %839 = vrot.lane.b32.xlu1 %v6801_v21, %s5757_s29 }
 0x15d   : > { %v6816_v18 = vand.u32 4294901760, %v2217_v47  ;;  %715 = vrot.lane.b32.xlu0 %v6713_v45, %s5756_s28  ;;  %v1947_v45 = vsel %vm1939_vm8, %v1906_v34, %v6675_v42  ;;  %v962_v42 = vsel %vm923_vm2, %v959_v38, %v961_v44 }
 0x15e   : > { %v1224_v60 = vpop.permute.xlu1 %1223  ;;  %v1988_v23 = vsel %vm1980_vm9, %v1947_v45, %v6721_v16  ;;  %v6857_v16 = vsel %vm595_vm1, %v637_v50, %v639_v40 }
 0x15f   : > { %v6835_v14 = vsub.f32 %v2217_v47, %v6816_v18  ;;  %v6837_v27 = vpop.permute.xlu0 %1023  ;;  %v2029_v54 = vsel %vm2021_vm10, %v1988_v23, %v6735_v59  ;;  %v1689_v47 = vrot.slane %v6762_v58, 6  ;;  %v1489_v59 = vrot.slane %v6806_v12, 5 }
 0x160   : > { %1567 = vrot.lane.b32.xlu1 %v1488_v41, %s5761_s11  ;;  %v2070_v55 = vsel %vm2062_vm11, %v2029_v54, %v1348_v62 }
 0x161   : > { %9011 = vst [vmem:[#allocation38_spill] sm:$0xff] %v6835_v14  ;;  %1367 = vrot.lane.b32.xlu0 %v6829_v20, %s5760_s6  ;;  %v2453_v37 = vand.u32 4294901760, %v6835_v14  ;;  %v2111_v41 = vsel %vm2103_vm12, %v2070_v55, %v1550_v29  ;;  %v1690_v50 = vsel %vm1655_vm5, %v1687_v63, %v1689_v47  ;;  %v1490_v54 = vsel %vm1453_vm4, %v1487_v61, %v1489_v59 }
 0x162   : > { %v6852_v32 = vpop.permute.xlu1 %1225  ;;  %v1691_v61 = vrot.slane %v6806_v12, 6 }
 0x163   : > { %v1752_v34 = vpop.permute.xlu0 %1751  ;;  %5153 = vmatprep.mubr.f32.mxu0 %v2453_v37  ;;  %v2454_v45 = vsub.f32 %v6835_v14, %v2453_v37  ;;  %v8888_v37 = vrot.slane %v6806_v12, 3 }
 0x164   : > { %v2152_v38 = vsel %vm2144_vm13, %v2111_v41, %v1752_v34  ;;  %1041 = vrot.lane.b32.xlu1 %v962_v42, %s5758_s30 }
 0x165   : > { %v2220_v58 = vsel %vm2197_vm14, %v2152_v38, 0  ;;  %841 = vrot.lane.b32.xlu0 %v6857_v16, %s5757_s29  ;;  %v2455_v62 = vand.u32 4294901760, %v2454_v45  ;;  %v964_v41 = vsel %vm923_vm2, %v961_v44, %v8888_v37  ;;  %v5680_v45 = vld [vmem:[%s5814_s22 + $0x40] sm:$0xff] }
 0x166   : > { %v6870_v29 = vand.u32 4294901760, %v2220_v58  ;;  %v6872_v23 = vpop.permute.xlu1 %823  ;;  %v1866_v38 = vsel %vm1857_vm6, %v5680_v45, %v6173_v6 }
 0x167   : > { %v1350_v42 = vpop.permute.xlu0 %1349  ;;  %4943 = vmatprep.mubr.f32.mxu1 %v2455_v62  ;;  %v1907_v62 = vsel %vm1898_vm7, %v1866_v38, %v6380_v4 }
 0x168   : > { %v6879_v55 = vsub.f32 %v2220_v58, %v6870_v29  ;;  %1769 = vrot.lane.b32.xlu1 %v1690_v50, %s5762_s23  ;;  %v6898_v50 = vld [vmem:[%s5814_s22 + $0xb8] sm:$0xff] }
 0x169   : > { %1569 = vrot.lane.b32.xlu0 %v1490_v54, %s5761_s11  ;;  %v1167_v44 = vrot.slane %v6898_v50, 4  ;;  %v1948_v54 = vsel %vm1939_vm8, %v1907_v62, %v6749_v17 }
 0x16a   : > { %9012 = vst [vmem:[#allocation39_spill] sm:$0xff] %v6879_v55  ;;  %v1552_v53 = vpop.permute.xlu1 %1551  ;;  %v2463_v63 = vand.u32 4294901760, %v6879_v55  ;;  %v1989_v4 = vsel %vm1980_vm9, %v1948_v54, %v6786_v0  ;;  %v641_v0 = vrot.slane %v6898_v50, 2  ;;  %v1491_v54 = vrot.slane %v6898_v50, 5 }
 0x16b   : > { %v1352_v34 = vpop.permute.xlu0 %1351 }
 0x16c   : > { %5154 = vmatmul.mubr.f32.gmra.mrb[6].mxu0 %v2463_v63  ;;  %1243 = vrot.lane.b32.xlu1 %v6781_v49, %s5759_s5  ;;  %v2464_v58 = vsub.f32 %v6879_v55, %v2463_v63  ;;  %v1692_v49 = vsel %vm1655_vm5, %v1689_v47, %v1691_v61  ;;  %v6920_v47 = vsel %vm1125_vm3, %v1165_v33, %v1167_v44 }
 0x16d   : > { %1043 = vrot.lane.b32.xlu0 %v964_v41, %s5758_s30  ;;  %v2030_v41 = vsel %vm2021_vm10, %v1989_v4, %v1224_v60  ;;  %v6944_v4 = vld [vmem:[%s5814_s22 + $0xc0] sm:$0xff] }
 0x16e   : > { %v6903_v37 = vpop.permute.xlu1 %1025  ;;  %v2465_v6 = vand.u32 4294901760, %v2464_v58  ;;  %v2071_v17 = vsel %vm2062_vm11, %v2030_v41, %v1350_v42  ;;  %v5682_v42 = vld [vmem:[%s5814_s22 + $0x48] sm:$0xff] }
 0x16f   : > { %v6910_v63 = vpop.permute.xlu0 %825  ;;  %v2112_v45 = vsel %vm2103_vm12, %v2071_v17, %v1552_v53  ;;  %v1867_v62 = vsel %vm1857_vm6, %v5682_v42, %v6166_v8  ;;  %v6938_v53 = vsel %vm595_vm1, %v639_v40, %v641_v0  ;;  %v1169_v8 = vrot.slane %v6944_v4, 4 }
 0x170   : > { %4944 = vmatmul.mubr.f32.gmra.mrb[6].mxu1 %v2465_v6  ;;  %717 = vrot.lane.b32.xlu1 %v6801_v21, %s5756_s28  ;;  %v1908_v6 = vsel %vm1898_vm7, %v1867_v62, %v6376_v52 }
 0x171   : > { %1771 = vrot.lane.b32.xlu0 %v1692_v49, %s5762_s23  ;;  %v1949_v41 = vsel %vm1939_vm8, %v1908_v6, %v6790_v30  ;;  %v1492_v30 = vsel %vm1453_vm4, %v1489_v59, %v1491_v54 }
 0x172   : > { %v1754_v38 = vpop.permute.xlu1 %1753  ;;  %v1990_v40 = vsel %vm1980_vm9, %v1949_v41, %v6837_v27 }
 0x173   : > { %v2153_v60 = vsel %vm2144_vm13, %v2112_v45, %v1754_v38  ;;  %v1554_v58 = vpop.permute.xlu0 %1553  ;;  %v2031_v52 = vsel %vm2021_vm10, %v1990_v40, %v6852_v32  ;;  %v965_v38 = vrot.slane %v6898_v50, 3  ;;  %v643_v32 = vrot.slane %v6944_v4, 2 }
 0x174   : > { %v2223_v21 = vsel %vm2197_vm14, %v2153_v60, 0  ;;  %1369 = vrot.lane.b32.xlu1 %v6920_v47, %s5760_s6  ;;  %v2072_v60 = vsel %vm2062_vm11, %v2031_v52, %v1352_v34 }
 0x175   : > { %v6931_v33 = vand.u32 4294901760, %v2223_v21  ;;  %1245 = vrot.lane.b32.xlu0 %v6829_v20, %s5759_s5 }
 0x176   : > { %v1228_v49 = vpop.permute.xlu1 %1227 }
 0x177   : > { %v6950_v20 = vsub.f32 %v2223_v21, %v6931_v33  ;;  %v6952_v17 = vpop.permute.xlu0 %1027  ;;  %v6973_v21 = vsel %vm1125_vm3, %v1167_v44, %v1169_v8  ;;  %v9014_v44 = vrot.slane %v6806_v12, 3 }
 0x178   : > { %843 = vrot.lane.b32.xlu1 %v6938_v53, %s5757_s29 }
 0x179   : > { %9013 = vst [vmem:[#allocation40_spill] sm:$0xff] %v6950_v20  ;;  %719 = vrot.lane.b32.xlu0 %v6857_v16, %s5756_s28  ;;  %v2473_v45 = vand.u32 4294901760, %v6950_v20  ;;  %v2113_v16 = vsel %vm2103_vm12, %v2072_v60, %v1554_v58  ;;  %v966_v41 = vsel %vm923_vm2, %v9014_v44, %v965_v38  ;;  %v1693_v58 = vrot.slane %v6898_v50, 6 }
 0x17a   : > { %v6968_v27 = vpop.permute.xlu1 %1229 }
 0x17b   : > { %v1756_v42 = vpop.permute.xlu0 %1755  ;;  %5156 = vmatprep.mubr.f32.mxu0 %v2473_v45  ;;  %v2474_v62 = vsub.f32 %v6950_v20, %v2473_v45  ;;  %v6994_v45 = vsel %vm595_vm1, %v641_v0, %v643_v32  ;;  %v1694_v50 = vsel %vm1655_vm5, %v1691_v61, %v1693_v58 }
 0x17c   : > { %v2154_v59 = vsel %vm2144_vm13, %v2113_v16, %v1756_v42  ;;  %1571 = vrot.lane.b32.xlu1 %v1492_v30, %s5761_s11  ;;  %v8889_v30 = vrot.slane %v6944_v4, 5 }
 0x17d   : > { %v2226_v34 = vsel %vm2197_vm14, %v2154_v59, 0  ;;  %1371 = vrot.lane.b32.xlu0 %v6973_v21, %s5760_s6  ;;  %v2475_v6 = vand.u32 4294901760, %v2474_v62  ;;  %v967_v59 = vrot.slane %v6944_v4, 3 }
 0x17e   : > { %v6987_v40 = vand.u32 4294901760, %v2226_v34  ;;  %v6989_v52 = vpop.permute.xlu1 %827  ;;  %v1494_v62 = vsel %vm1453_vm4, %v1491_v54, %v8889_v30 }
 0x17f   : > { %v1354_v60 = vpop.permute.xlu0 %1353  ;;  %4946 = vmatprep.mubr.f32.mxu1 %v2475_v6  ;;  %v5684_v6 = vld [vmem:[%s5814_s22 + $0x50] sm:$0xff] }
 0x180   : > { %v6998_v16 = vsub.f32 %v2226_v34, %v6987_v40  ;;  %1045 = vrot.lane.b32.xlu1 %v966_v41, %s5758_s30  ;;  %v1868_v44 = vsel %vm1857_vm6, %v5684_v6, %v6196_v22  ;;  %v968_v22 = vsel %vm923_vm2, %v965_v38, %v967_v59 }
 0x181   : > { %845 = vrot.lane.b32.xlu0 %v6994_v45, %s5757_s29  ;;  %v1909_v61 = vsel %vm1898_vm7, %v1868_v44, %v6388_v39 }
 0x182   : > { %9015 = vst [vmem:[#allocation41_spill] sm:$0xff] %v6998_v16  ;;  %v1556_v42 = vpop.permute.xlu1 %1555  ;;  %v2483_v0 = vand.u32 4294901760, %v6998_v16  ;;  %v1950_v54 = vsel %vm1939_vm8, %v1909_v61, %v6872_v23 }
 0x183   : > { %v1356_v34 = vpop.permute.xlu0 %1355 }
 0x184   : > { %5157 = vmatmul.mubr.f32.gmra.mrb[8].mxu0 %v2483_v0  ;;  %1773 = vrot.lane.b32.xlu1 %v1694_v50, %s5762_s23  ;;  %v2484_v12 = vsub.f32 %v6998_v16, %v2483_v0  ;;  %v1695_v50 = vrot.slane %v6944_v4, 6  ;;  %v1991_v0 = vsel %vm1980_vm9, %v1950_v54, %v6903_v37 }
 0x185   : > { %1573 = vrot.lane.b32.xlu0 %v1494_v62, %s5761_s11  ;;  %v2032_v39 = vsel %vm2021_vm10, %v1991_v0, %v1228_v49  ;;  %v7037_v62 = vld [vmem:[%s5814_s22 + $0xc8] sm:$0xff] }
 0x186   : > { %v7021_v41 = vpop.permute.xlu1 %1029  ;;  %v2485_v30 = vand.u32 4294901760, %v2484_v12  ;;  %v2073_v23 = vsel %vm2062_vm11, %v2032_v39, %v1354_v60  ;;  %v1171_v38 = vrot.slane %v7037_v62, 4  ;;  %v1696_v12 = vsel %vm1655_vm5, %v1693_v58, %v1695_v50  ;;  %v5686_v60 = vld [vmem:[%s5814_s22 + $0x58] sm:$0xff] }
 0x187   : > { %v7029_v6 = vpop.permute.xlu0 %829  ;;  %v2114_v44 = vsel %vm2103_vm12, %v2073_v23, %v1556_v42  ;;  %v1869_v61 = vsel %vm1857_vm6, %v5686_v60, %v6187_v15  ;;  %v645_v42 = vrot.slane %v7037_v62, 2 }
 0x188   : > { %4947 = vmatmul.mubr.f32.gmra.mrb[8].mxu1 %v2485_v30  ;;  %1247 = vrot.lane.b32.xlu1 %v6920_v47, %s5759_s5  ;;  %v7057_v58 = vsel %vm1125_vm3, %v1169_v8, %v1171_v38 }
 0x189   : > { %1047 = vrot.lane.b32.xlu0 %v968_v22, %s5758_s30  ;;  %v1910_v22 = vsel %vm1898_vm7, %v1869_v61, %v6384_v51  ;;  %v9017_v61 = vrot.slane %v6944_v4, 5 }
 0x18a   : > { %v1758_v37 = vpop.permute.xlu1 %1757  ;;  %v1951_v0 = vsel %vm1939_vm8, %v1910_v22, %v6910_v63  ;;  %v7081_v63 = vsel %vm595_vm1, %v643_v32, %v645_v42 }
 0x18b   : > { %v2155_v49 = vsel %vm2144_vm13, %v2114_v44, %v1758_v37  ;;  %v1558_v30 = vpop.permute.xlu0 %1557  ;;  %v1992_v23 = vsel %vm1980_vm9, %v1951_v0, %v6952_v17  ;;  %v1495_v44 = vrot.slane %v7037_v62, 5 }
 0x18c   : > { %v2229_v47 = vsel %vm2197_vm14, %v2155_v49, 0  ;;  %721 = vrot.lane.b32.xlu1 %v6938_v53, %s5756_s28  ;;  %v2033_v8 = vsel %vm2021_vm10, %v1992_v23, %v6968_v27 }
 0x18d   : > { %v7051_v54 = vand.u32 4294901760, %v2229_v47  ;;  %1775 = vrot.lane.b32.xlu0 %v1696_v12, %s5762_s23  ;;  %v2074_v17 = vsel %vm2062_vm11, %v2033_v8, %v1356_v34  ;;  %v7088_v12 = vld [vmem:[%s5814_s22 + $0xd0] sm:$0xff]  ;;  %v1496_v22 = vsel %vm1453_vm4, %v9017_v61, %v1495_v44  ;;  %v5688_v61 = vld [vmem:[%s5814_s22 + $0x60] sm:$0xff] }
 0x18e   : > { %v1232_v53 = vpop.permute.xlu1 %1231  ;;  %v8891_v27 = vrot.slane %v7088_v12, 4  ;;  %v2115_v49 = vsel %vm2103_vm12, %v2074_v17, %v1558_v30  ;;  %v969_v30 = vrot.slane %v7037_v62, 3 }
 0x18f   : > { %v7065_v15 = vsub.f32 %v2229_v47, %v7051_v54  ;;  %v7067_v39 = vpop.permute.xlu0 %1031 }
 0x190   : > { %1373 = vrot.lane.b32.xlu1 %v7057_v58, %s5760_s6  ;;  %v7110_v8 = vsel %vm1125_vm3, %v1171_v38, %v8891_v27 }
 0x191   : > { %9016 = vst [vmem:[#allocation42_spill] sm:$0xff] %v7065_v15  ;;  %1249 = vrot.lane.b32.xlu0 %v6973_v21, %s5759_s5  ;;  %v2493_v51 = vand.u32 4294901760, %v7065_v15 }
 0x192   : > { %v7085_v37 = vpop.permute.xlu1 %1233 }
 0x193   : > { %v1760_v21 = vpop.permute.xlu0 %1759  ;;  %5159 = vmatprep.mubr.f32.mxu0 %v2493_v51  ;;  %v2494_v47 = vsub.f32 %v7065_v15, %v2493_v51  ;;  %v8890_v51 = vrot.slane %v7088_v12, 2 }
 0x194   : > { %v2156_v60 = vsel %vm2144_vm13, %v2115_v49, %v1760_v21  ;;  %847 = vrot.lane.b32.xlu1 %v7081_v63, %s5757_s29  ;;  %v970_v49 = vsel %vm923_vm2, %v967_v59, %v969_v30  ;;  %v1697_v21 = vrot.slane %v7037_v62, 6 }
 0x195   : > { %v2232_v32 = vsel %vm2197_vm14, %v2156_v60, 0  ;;  %723 = vrot.lane.b32.xlu0 %v6994_v45, %s5756_s28  ;;  %v2495_v34 = vand.u32 4294901760, %v2494_v47  ;;  %v7127_v60 = vsel %vm595_vm1, %v645_v42, %v8890_v51 }
 0x196   : > { %v7103_v0 = vand.u32 4294901760, %v2232_v32  ;;  %v7105_v23 = vpop.permute.xlu1 %831  ;;  %v1698_v42 = vsel %vm1655_vm5, %v1695_v50, %v1697_v21 }
 0x197   : > { %v1358_v45 = vpop.permute.xlu0 %1357  ;;  %4949 = vmatprep.mubr.f32.mxu1 %v2495_v34 }
 0x198   : > { %v7114_v17 = vsub.f32 %v2232_v32, %v7103_v0  ;;  %1575 = vrot.lane.b32.xlu1 %v1496_v22, %s5761_s11  ;;  %v1497_v32 = vrot.slane %v7088_v12, 5  ;;  %v1870_v22 = vsel %vm1857_vm6, %v5688_v61, %v6214_v56 }
 0x199   : > { %1375 = vrot.lane.b32.xlu0 %v7110_v8, %s5760_s6  ;;  %v1911_v62 = vsel %vm1898_vm7, %v1870_v22, %v6397_v57 }
 0x19a   : > { %9018 = vst [vmem:[#allocation43_spill] sm:$0xff] %v7114_v17  ;;  %v1560_v38 = vpop.permute.xlu1 %1559  ;;  %v2503_v47 = vand.u32 4294901760, %v7114_v17  ;;  %v1952_v51 = vsel %vm1939_vm8, %v1911_v62, %v6989_v52 }
 0x19b   : > { %v1360_v34 = vpop.permute.xlu0 %1359  ;;  %v1993_v57 = vsel %vm1980_vm9, %v1952_v51, %v7021_v41  ;;  %v8893_v41 = vrot.slane %v7088_v12, 6 }
 0x19c   : > { %5160 = vmatmul.mubr.f32.gmra.mrb[10].mxu0 %v2503_v47  ;;  %1049 = vrot.lane.b32.xlu1 %v970_v49, %s5758_s30  ;;  %v2504_v59 = vsub.f32 %v7114_v17, %v2503_v47  ;;  %v1498_v49 = vsel %vm1453_vm4, %v1495_v44, %v1497_v32  ;;  %v971_v47 = vrot.slane %v7088_v12, 3  ;;  %v2034_v4 = vsel %vm2021_vm10, %v1993_v57, %v1232_v53 }
 0x19d   : > { %849 = vrot.lane.b32.xlu0 %v7127_v60, %s5757_s29  ;;  %v2075_v52 = vsel %vm2062_vm11, %v2034_v4, %v1358_v45  ;;  %v5689_v45 = vld [vmem:[%s5814_s22 + $0x68] sm:$0xff] }
 0x19e   : > { %v7144_v27 = vpop.permute.xlu1 %1033  ;;  %v2505_v56 = vand.u32 4294901760, %v2504_v59  ;;  %v2116_v50 = vsel %vm2103_vm12, %v2075_v52, %v1560_v38  ;;  %v972_v22 = vsel %vm923_vm2, %v969_v30, %v971_v47  ;;  %v1871_v62 = vsel %vm1857_vm6, %v5689_v45, %v6208_v26 }
 0x19f   : > { %v7152_v61 = vpop.permute.xlu0 %833 }
 0x1a0   : > { %4950 = vmatmul.mubr.f32.gmra.mrb[10].mxu1 %v2505_v56  ;;  %1777 = vrot.lane.b32.xlu1 %v1698_v42, %s5762_s23  ;;  %v7174_v42 = vld [vmem:[%s5814_s22 + $0xd8] sm:$0xff]  ;;  %v1912_v56 = vsel %vm1898_vm7, %v1871_v62, %v6393_v24 }
 0x1a1   : > { %1577 = vrot.lane.b32.xlu0 %v1498_v49, %s5761_s11  ;;  %v1175_v30 = vrot.slane %v7174_v42, 4  ;;  %v1953_v26 = vsel %vm1939_vm8, %v1912_v56, %v7029_v6  ;;  %v9020_v6 = vrot.slane %v7088_v12, 4 }
 0x1a2   : > { %v1762_v44 = vpop.permute.xlu1 %1761  ;;  %v1994_v52 = vsel %vm1980_vm9, %v1953_v26, %v7067_v39 }
 0x1a3   : > { %v2157_v51 = vsel %vm2144_vm13, %v2116_v50, %v1762_v44  ;;  %v1562_v53 = vpop.permute.xlu0 %1561  ;;  %v2035_v24 = vsel %vm2021_vm10, %v1994_v52, %v7085_v37  ;;  %v7202_v50 = vsel %vm1125_vm3, %v9020_v6, %v1175_v30  ;;  %v649_v44 = vrot.slane %v7174_v42, 2  ;;  %v7225_v52 = vld [vmem:[%s5814_s22 + $0xe0] sm:$0xff] }
 0x1a4   : > { %v2235_v59 = vsel %vm2197_vm14, %v2157_v51, 0  ;;  %1251 = vrot.lane.b32.xlu1 %v7057_v58, %s5759_s5  ;;  %v1700_v58 = vsel %vm1655_vm5, %v1697_v21, %v8893_v41  ;;  %v2076_v39 = vsel %vm2062_vm11, %v2035_v24, %v1360_v34  ;;  %v9021_v34 = vrot.slane %v7088_v12, 2 }
 0x1a5   : > { %v7170_v38 = vand.u32 4294901760, %v2235_v59  ;;  %1051 = vrot.lane.b32.xlu0 %v972_v22, %s5758_s30  ;;  %v8892_v24 = vrot.slane %v7225_v52, 4 }
 0x1a6   : > { %v7179_v49 = vpop.permute.xlu1 %1235  ;;  %v7219_v56 = vsel %vm595_vm1, %v9021_v34, %v649_v44 }
 0x1a7   : > { %v7187_v57 = vsub.f32 %v2235_v59, %v7170_v38  ;;  %v7189_v4 = vpop.permute.xlu0 %1035 }
 0x1a8   : > { %725 = vrot.lane.b32.xlu1 %v7081_v63, %s5756_s28  ;;  %v2117_v63 = vsel %vm2103_vm12, %v2076_v39, %v1562_v53  ;;  %v1499_v53 = vrot.slane %v7174_v42, 5  ;;  %v973_v39 = vrot.slane %v7174_v42, 3 }
 0x1a9   : > { %9019 = vst [vmem:[#allocation44_spill] sm:$0xff] %v7187_v57  ;;  %1779 = vrot.lane.b32.xlu0 %v1700_v58, %s5762_s23  ;;  %v2513_v21 = vand.u32 4294901760, %v7187_v57 }
 0x1aa   : > { %v7206_v22 = vpop.permute.xlu1 %709  ;;  %v1500_v6 = vsel %vm1453_vm4, %v1497_v32, %v1499_v53  ;;  %v974_v32 = vsel %vm923_vm2, %v971_v47, %v973_v39 }
 0x1ab   : > { %v1764_v51 = vpop.permute.xlu0 %1763  ;;  %5162 = vmatprep.mubr.f32.mxu0 %v2513_v21  ;;  %v2514_v37 = vsub.f32 %v7187_v57, %v2513_v21 }
 0x1ac   : > { %v2158_v59 = vsel %vm2144_vm13, %v2117_v63, %v1764_v51  ;;  %1377 = vrot.lane.b32.xlu1 %v7202_v50, %s5760_s6 }
 0x1ad   : > { %v2238_v45 = vsel %vm2197_vm14, %v2158_v59, 0  ;;  %1253 = vrot.lane.b32.xlu0 %v7110_v8, %s5759_s5  ;;  %v2515_v62 = vand.u32 4294901760, %v2514_v37  ;;  %v7247_v37 = vsel %vm1125_vm3, %v1175_v30, %v8892_v24  ;;  %v8895_v59 = vrot.slane %v7225_v52, 2 }
 0x1ae   : > { %v7222_v58 = vand.u32 4294901760, %v2238_v45  ;;  %v1362_v26 = vpop.permute.xlu1 %1361 }
 0x1af   : > { %v7228_v21 = vpop.permute.xlu0 %1237  ;;  %4952 = vmatprep.mubr.f32.mxu1 %v2515_v62  ;;  %v1701_v62 = vrot.slane %v7174_v42, 6  ;;  %v7263_v24 = vsel %vm595_vm1, %v649_v44, %v8895_v59  ;;  %v9023_v42 = vrot.slane %v7088_v12, 6 }
 0x1b0   : > { %v7231_v8 = vsub.f32 %v2238_v45, %v7222_v58  ;;  %851 = vrot.lane.b32.xlu1 %v7219_v56, %s5757_s29 }
 0x1b1   : > { %727 = vrot.lane.b32.xlu0 %v7127_v60, %s5756_s28  ;;  %v1702_v44 = vsel %vm1655_vm5, %v9023_v42, %v1701_v62 }
 0x1b2   : > { %9022 = vst [vmem:[#allocation45_spill] sm:$0xff] %v7231_v8  ;;  %v7241_v63 = vpop.permute.xlu1 %835  ;;  %v2523_v51 = vand.u32 4294901760, %v7231_v8 }
 0x1b3   : > { %v7250_v45 = vpop.permute.xlu0 %711 }
 0x1b4   : > { %5163 = vmatmul.mubr.f32.gmra.mrb[12].mxu0 %v2523_v51  ;;  %1579 = vrot.lane.b32.xlu1 %v1500_v6, %s5761_s11  ;;  %v2524_v60 = vsub.f32 %v7231_v8, %v2523_v51  ;;  %v1501_v6 = vrot.slane %v7225_v52, 5  ;;  %v5692_v51 = vld [vmem:[%s5814_s22 + $0x70] sm:$0xff] }
 0x1b5   : > { %1379 = vrot.lane.b32.xlu0 %v7247_v37, %s5760_s6  ;;  %v1872_v8 = vsel %vm1857_vm6, %v5692_v51, %v6224_v1 }
 0x1b6   : > { %v1564_v30 = vpop.permute.xlu1 %1563  ;;  %v2525_v34 = vand.u32 4294901760, %v2524_v60  ;;  %v1913_v47 = vsel %vm1898_vm7, %v1872_v8, %v6407_v35  ;;  %v1502_v1 = vsel %vm1453_vm4, %v1499_v53, %v1501_v6 }
 0x1b7   : > { %v1364_v41 = vpop.permute.xlu0 %1363  ;;  %v1954_v60 = vsel %vm1939_vm8, %v1913_v47, %v7105_v23 }
 0x1b8   : > { %4953 = vmatmul.mubr.f32.gmra.mrb[12].mxu1 %v2525_v34  ;;  %1053 = vrot.lane.b32.xlu1 %v974_v32, %s5758_s30  ;;  %v975_v32 = vrot.slane %v7225_v52, 3  ;;  %v1995_v35 = vsel %vm1980_vm9, %v1954_v60, %v7144_v27  ;;  %v8897_v27 = vrot.slane %v7225_v52, 6  ;;  %v7310_v60 = vld [vmem:[%s5814_s22 + $0xe8] sm:$0xff] }
 0x1b9   : > { %853 = vrot.lane.b32.xlu0 %v7263_v24, %s5757_s29  ;;  %v2036_v12 = vsel %vm2021_vm10, %v1995_v35, %v7179_v49 }
 0x1ba   : > { %v7279_v59 = vpop.permute.xlu1 %1037  ;;  %v2077_v23 = vsel %vm2062_vm11, %v2036_v12, %v1362_v26  ;;  %v976_v51 = vsel %vm923_vm2, %v973_v39, %v975_v32  ;;  %v5693_v26 = vld [vmem:[%s5814_s22 + $0x78] sm:$0xff]  ;;  %v1179_v39 = vrot.slane %v7310_v60, 4 }
 0x1bb   : > { %v7287_v8 = vpop.permute.xlu0 %837  ;;  %v2118_v53 = vsel %vm2103_vm12, %v2077_v23, %v1564_v30 }
 0x1bc   : > { %1781 = vrot.lane.b32.xlu1 %v1702_v44, %s5762_s23  ;;  %v1873_v44 = vsel %vm1857_vm6, %v5693_v26, %v6220_v13 }
 0x1bd   : > { %1581 = vrot.lane.b32.xlu0 %v1502_v1, %s5761_s11  ;;  %v1914_v1 = vsel %vm1898_vm7, %v1873_v44, %v6404_v25 }
 0x1be   : > { %v1766_v34 = vpop.permute.xlu1 %1765  ;;  %v1955_v13 = vsel %vm1939_vm8, %v1914_v1, %v7152_v61  ;;  %v9025_v61 = vrot.slane %v7225_v52, 4 }
 0x1bf   : > { %v2159_v47 = vsel %vm2144_vm13, %v2118_v53, %v1766_v34  ;;  %v1566_v42 = vpop.permute.xlu0 %1565  ;;  %v1996_v53 = vsel %vm1980_vm9, %v1955_v13, %v7189_v4 }
 0x1c0   : > { %v2241_v49 = vsel %vm2197_vm14, %v2159_v47, 0  ;;  %1255 = vrot.lane.b32.xlu1 %v7202_v50, %s5759_s5  ;;  %v1704_v50 = vsel %vm1655_vm5, %v1701_v62, %v8897_v27  ;;  %v2037_v25 = vsel %vm2021_vm10, %v1996_v53, %v7228_v21  ;;  %v7338_v34 = vsel %vm1125_vm3, %v9025_v61, %v1179_v39 }
 0x1c1   : > { %v7306_v30 = vand.u32 4294901760, %v2241_v49  ;;  %1055 = vrot.lane.b32.xlu0 %v976_v51, %s5758_s30  ;;  %v653_v51 = vrot.slane %v7310_v60, 2  ;;  %v2078_v4 = vsel %vm2062_vm11, %v2037_v25, %v1364_v41  ;;  %v9026_v41 = vrot.slane %v7225_v52, 2  ;;  %v7361_v25 = vld [vmem:[%s5814_s22 + $0xf0] sm:$0xff] }
 0x1c2   : > { %v7315_v35 = vpop.permute.xlu1 %1239 }
 0x1c3   : > { %v7323_v12 = vsub.f32 %v2241_v49, %v7306_v30  ;;  %v7325_v23 = vpop.permute.xlu0 %1039 }
 0x1c4   : > { %729 = vrot.lane.b32.xlu1 %v7219_v56, %s5756_s28  ;;  %v2119_v56 = vsel %vm2103_vm12, %v2078_v4, %v1566_v42  ;;  %v1503_v42 = vrot.slane %v7310_v60, 5 }
 0x1c5   : > { %9024 = vst [vmem:[#allocation46_spill] sm:$0xff] %v7323_v12  ;;  %1783 = vrot.lane.b32.xlu0 %v1704_v50, %s5762_s23  ;;  %v2533_v62 = vand.u32 4294901760, %v7323_v12  ;;  %v7355_v50 = vsel %vm595_vm1, %v9026_v41, %v653_v51  ;;  %v1705_v41 = vrot.slane %v7310_v60, 6 }
 0x1c6   : > { %v7342_v47 = vpop.permute.xlu1 %713  ;;  %v1504_v4 = vsel %vm1453_vm4, %v1501_v6, %v1503_v42 }
 0x1c7   : > { %v1768_v49 = vpop.permute.xlu0 %1767  ;;  %5165 = vmatprep.mubr.f32.mxu0 %v2533_v62  ;;  %v2534_v21 = vsub.f32 %v7323_v12, %v2533_v62  ;;  %v8896_v62 = vrot.slane %v7361_v25, 4 }
 0x1c8   : > { %v2160_v26 = vsel %vm2144_vm13, %v2119_v56, %v1768_v49  ;;  %1381 = vrot.lane.b32.xlu1 %v7338_v34, %s5760_s6  ;;  %v977_v56 = vrot.slane %v7310_v60, 3  ;;  %v9028_v60 = vrot.slane %v7225_v52, 6 }
 0x1c9   : > { %v2244_v44 = vsel %vm2197_vm14, %v2160_v26, 0  ;;  %1257 = vrot.lane.b32.xlu0 %v7247_v37, %s5759_s5  ;;  %v2535_v1 = vand.u32 4294901760, %v2534_v21  ;;  %v7383_v26 = vsel %vm1125_vm3, %v1179_v39, %v8896_v62 }
 0x1ca   : > { %v7358_v13 = vand.u32 4294901760, %v2244_v44  ;;  %v1366_v53 = vpop.permute.xlu1 %1365  ;;  %v978_v6 = vsel %vm923_vm2, %v975_v32, %v977_v56 }
 0x1cb   : > { %v7364_v61 = vpop.permute.xlu0 %1241  ;;  %4955 = vmatprep.mubr.f32.mxu1 %v2535_v1 }
 0x1cc   : > { %v7367_v37 = vsub.f32 %v2244_v44, %v7358_v13  ;;  %855 = vrot.lane.b32.xlu1 %v7355_v50, %s5757_s29  ;;  %v8900_v44 = vrot.slane %v7361_v25, 2 }
 0x1cd   : > { %731 = vrot.lane.b32.xlu0 %v7263_v24, %s5756_s28 }
 0x1ce   : > { %9027 = vst [vmem:[#allocation47_spill] sm:$0xff] %v7367_v37  ;;  %v7377_v49 = vpop.permute.xlu1 %839  ;;  %v2543_v21 = vand.u32 4294901760, %v7367_v37  ;;  %v7399_v27 = vsel %vm595_vm1, %v653_v51, %v8900_v44  ;;  %v1706_v51 = vsel %vm1655_vm5, %v9028_v60, %v1705_v41 }
 0x1cf   : > { %v7386_v1 = vpop.permute.xlu0 %715 }
 0x1d0   : > { %5166 = vmatmul.mubr.f32.gmra.mrb[14].mxu0 %v2543_v21  ;;  %1583 = vrot.lane.b32.xlu1 %v1504_v4, %s5761_s11  ;;  %v2544_v24 = vsub.f32 %v7367_v37, %v2543_v21  ;;  %v1505_v4 = vrot.slane %v7361_v25, 5  ;;  %v5696_v21 = vld [vmem:[%s5814_s22 + $0x80] sm:$0xff] }
 0x1d1   : > { %1383 = vrot.lane.b32.xlu0 %v7383_v26, %s5760_s6  ;;  %v1874_v37 = vsel %vm1857_vm6, %v5696_v21, %v6235_v46 }
 0x1d2   : > { %v1568_v39 = vpop.permute.xlu1 %1567  ;;  %v2545_v62 = vand.u32 4294901760, %v2544_v24  ;;  %v1915_v32 = vsel %vm1898_vm7, %v1874_v37, %v7206_v22  ;;  %v1506_v46 = vsel %vm1453_vm4, %v1503_v42, %v1505_v4 }
 0x1d3   : > { %v1368_v12 = vpop.permute.xlu0 %1367  ;;  %v1956_v24 = vsel %vm1939_vm8, %v1915_v32, %v7241_v63 }
 0x1d4   : > { %4956 = vmatmul.mubr.f32.gmra.mrb[14].mxu1 %v2545_v62  ;;  %1057 = vrot.lane.b32.xlu1 %v978_v6, %s5758_s30  ;;  %v979_v62 = vrot.slane %v7361_v25, 3  ;;  %v1997_v22 = vsel %vm1980_vm9, %v1956_v24, %v7279_v59  ;;  %v8902_v59 = vrot.slane %v7361_v25, 6  ;;  %v7446_v24 = vld [vmem:[%s5814_s22 + $0xf8] sm:$0xff] }
 0x1d5   : > { %857 = vrot.lane.b32.xlu0 %v7399_v27, %s5757_s29  ;;  %v2038_v52 = vsel %vm2021_vm10, %v1997_v22, %v7315_v35 }
 0x1d6   : > { %v7415_v44 = vpop.permute.xlu1 %1041  ;;  %v2079_v63 = vsel %vm2062_vm11, %v2038_v52, %v1366_v53  ;;  %v980_v21 = vsel %vm923_vm2, %v977_v56, %v979_v62  ;;  %v5697_v53 = vld [vmem:[%s5814_s22 + $0x88] sm:$0xff]  ;;  %v1183_v56 = vrot.slane %v7446_v24, 4 }
 0x1d7   : > { %v7423_v37 = vpop.permute.xlu0 %841  ;;  %v2120_v42 = vsel %vm2103_vm12, %v2079_v63, %v1568_v39 }
 0x1d8   : > { %1785 = vrot.lane.b32.xlu1 %v1706_v51, %s5762_s23  ;;  %v1875_v51 = vsel %vm1857_vm6, %v5697_v53, %v6229_v7 }
 0x1d9   : > { %1585 = vrot.lane.b32.xlu0 %v1506_v46, %s5761_s11  ;;  %v1916_v46 = vsel %vm1898_vm7, %v1875_v51, %v7250_v45 }
 0x1da   : > { %v1770_v6 = vpop.permute.xlu1 %1769  ;;  %v1957_v7 = vsel %vm1939_vm8, %v1916_v46, %v7287_v8  ;;  %v9030_v8 = vrot.slane %v7361_v25, 4 }
 0x1db   : > { %v2161_v32 = vsel %vm2144_vm13, %v2120_v42, %v1770_v6  ;;  %v1570_v60 = vpop.permute.xlu0 %1569  ;;  %v1998_v42 = vsel %vm1980_vm9, %v1957_v7, %v7325_v23 }
 0x1dc   : > { %v2247_v35 = vsel %vm2197_vm14, %v2161_v32, 0  ;;  %1259 = vrot.lane.b32.xlu1 %v7338_v34, %s5759_s5  ;;  %v1708_v34 = vsel %vm1655_vm5, %v1705_v41, %v8902_v59  ;;  %v2039_v45 = vsel %vm2021_vm10, %v1998_v42, %v7364_v61  ;;  %v7474_v6 = vsel %vm1125_vm3, %v9030_v8, %v1183_v56 }
 0x1dd   : > { %v7442_v39 = vand.u32 4294901760, %v2247_v35  ;;  %1059 = vrot.lane.b32.xlu0 %v980_v21, %s5758_s30  ;;  %v657_v21 = vrot.slane %v7446_v24, 2  ;;  %v2080_v23 = vsel %vm2062_vm11, %v2039_v45, %v1368_v12  ;;  %v9031_v12 = vrot.slane %v7361_v25, 2  ;;  %v7497_v45 = vld [vmem:[%s5814_s22 + $0x100] sm:$0xff] }
 0x1de   : > { %v7451_v22 = vpop.permute.xlu1 %1243 }
 0x1df   : > { %v7459_v52 = vsub.f32 %v2247_v35, %v7442_v39  ;;  %v7461_v63 = vpop.permute.xlu0 %1043 }
 0x1e0   : > { %733 = vrot.lane.b32.xlu1 %v7355_v50, %s5756_s28  ;;  %v2121_v50 = vsel %vm2103_vm12, %v2080_v23, %v1570_v60  ;;  %v1507_v60 = vrot.slane %v7446_v24, 5 }
 0x1e1   : > { %9029 = vst [vmem:[#allocation48_spill] sm:$0xff] %v7459_v52  ;;  %1787 = vrot.lane.b32.xlu0 %v1708_v34, %s5762_s23  ;;  %v2553_v41 = vand.u32 4294901760, %v7459_v52  ;;  %v7491_v34 = vsel %vm595_vm1, %v9031_v12, %v657_v21  ;;  %v1709_v12 = vrot.slane %v7446_v24, 6 }
 0x1e2   : > { %v7478_v32 = vpop.permute.xlu1 %717  ;;  %v1508_v23 = vsel %vm1453_vm4, %v1505_v4, %v1507_v60 }
 0x1e3   : > { %v1772_v35 = vpop.permute.xlu0 %1771  ;;  %5168 = vmatprep.mubr.f32.mxu0 %v2553_v41  ;;  %v2554_v61 = vsub.f32 %v7459_v52, %v2553_v41  ;;  %v8901_v41 = vrot.slane %v7497_v45, 4 }
 0x1e4   : > { %v2162_v53 = vsel %vm2144_vm13, %v2121_v50, %v1772_v35  ;;  %1385 = vrot.lane.b32.xlu1 %v7474_v6, %s5760_s6  ;;  %v981_v50 = vrot.slane %v7446_v24, 3  ;;  %v9034_v24 = vrot.slane %v7361_v25, 6 }
 0x1e5   : > { %v2250_v51 = vsel %vm2197_vm14, %v2162_v53, 0  ;;  %1261 = vrot.lane.b32.xlu0 %v7383_v26, %s5759_s5  ;;  %v2555_v46 = vand.u32 4294901760, %v2554_v61  ;;  %v7519_v53 = vsel %vm1125_vm3, %v1183_v56, %v8901_v41 }
 0x1e6   : > { %v7494_v7 = vand.u32 4294901760, %v2250_v51  ;;  %v1370_v42 = vpop.permute.xlu1 %1369  ;;  %v982_v4 = vsel %vm923_vm2, %v979_v62, %v981_v50 }
 0x1e7   : > { %v7500_v8 = vpop.permute.xlu0 %1245  ;;  %4958 = vmatprep.mubr.f32.mxu1 %v2555_v46 }
 0x1e8   : > { %v7503_v26 = vsub.f32 %v2250_v51, %v7494_v7  ;;  %859 = vrot.lane.b32.xlu1 %v7491_v34, %s5757_s29  ;;  %v8906_v51 = vrot.slane %v7497_v45, 2 }
 0x1e9   : > { %735 = vrot.lane.b32.xlu0 %v7399_v27, %s5756_s28 }
 0x1ea   : > { %9032 = vst [vmem:[#allocation49_spill] sm:$0xff] %v7503_v26  ;;  %v7513_v35 = vpop.permute.xlu1 %843  ;;  %v2563_v61 = vand.u32 4294901760, %v7503_v26  ;;  %v7535_v59 = vsel %vm595_vm1, %v657_v21, %v8906_v51  ;;  %v1710_v21 = vsel %vm1655_vm5, %v9034_v24, %v1709_v12 }
 0x1eb   : > { %v7522_v46 = vpop.permute.xlu0 %719 }
 0x1ec   : > { %5169 = vmatmul.mubr.f32.gmra.mrb[16].mxu0 %v2563_v61  ;;  %1587 = vrot.lane.b32.xlu1 %v1508_v23, %s5761_s11  ;;  %v2564_v27 = vsub.f32 %v7503_v26, %v2563_v61  ;;  %v1509_v23 = vrot.slane %v7497_v45, 5  ;;  %v5700_v61 = vld [vmem:[%s5814_s22 + $0x90] sm:$0xff]  ;;  %v9033_v26 = vld [vmem:[#allocation11_spill] sm:$0xff] }
 0x1ed   : > { %1387 = vrot.lane.b32.xlu0 %v7519_v53, %s5760_s6  ;;  %v1876_v57 = vsel %vm1857_vm6, %v5700_v61, %v9033_v26  ;;  %v983_v26 = vrot.slane %v7497_v45, 3 }
 0x1ee   : > { %v1572_v56 = vpop.permute.xlu1 %1571  ;;  %v2565_v41 = vand.u32 4294901760, %v2564_v27  ;;  %v1917_v62 = vsel %vm1898_vm7, %v1876_v57, %v7342_v47 }
 0x1ef   : > { %v1372_v52 = vpop.permute.xlu0 %1371  ;;  %v1958_v27 = vsel %vm1939_vm8, %v1917_v62, %v7377_v49  ;;  %v984_v61 = vsel %vm923_vm2, %v981_v50, %v983_v26 }
 0x1f0   : > { %4959 = vmatmul.mubr.f32.gmra.mrb[16].mxu1 %v2565_v41  ;;  %1061 = vrot.lane.b32.xlu1 %v982_v4, %s5758_s30  ;;  %v1510_v41 = vsel %vm1453_vm4, %v1507_v60, %v1509_v23  ;;  %v1999_v57 = vsel %vm1980_vm9, %v1958_v27, %v7415_v44  ;;  %v8907_v44 = vrot.slane %v7497_v45, 6 }
 0x1f1   : > { %861 = vrot.lane.b32.xlu0 %v7535_v59, %s5757_s29  ;;  %v2040_v25 = vsel %vm2021_vm10, %v1999_v57, %v7451_v22 }
 0x1f2   : > { %v7551_v51 = vpop.permute.xlu1 %1045  ;;  %v2081_v49 = vsel %vm2062_vm11, %v2040_v25, %v1370_v42  ;;  %v5701_v42 = vld [vmem:[%s5814_s22 + $0x98] sm:$0xff] }
 0x1f3   : > { %v7559_v47 = vpop.permute.xlu0 %845  ;;  %v2122_v60 = vsel %vm2103_vm12, %v2081_v49, %v1572_v56 }
 0x1f4   : > { %1789 = vrot.lane.b32.xlu1 %v1710_v21, %s5762_s23  ;;  %v9035_v21 = vld [vmem:[#allocation10_spill] sm:$0xff] }
 0x1f5   : > { %1589 = vrot.lane.b32.xlu0 %v1510_v41, %s5761_s11  ;;  %v1877_v27 = vsel %vm1857_vm6, %v5701_v42, %v9035_v21  ;;  %v7582_v41 = vld [vmem:[%s5814_s22 + $0x108] sm:$0xff] }
 0x1f6   : > { %v1774_v4 = vpop.permute.xlu1 %1773  ;;  %v1187_v50 = vrot.slane %v7582_v41, 4  ;;  %v1918_v57 = vsel %vm1898_vm7, %v1877_v27, %v7386_v1 }
 0x1f7   : > { %v2163_v62 = vsel %vm2144_vm13, %v2122_v60, %v1774_v4  ;;  %v1574_v24 = vpop.permute.xlu0 %1573  ;;  %v1959_v49 = vsel %vm1939_vm8, %v1918_v57, %v7423_v37  ;;  %v9037_v37 = vrot.slane %v7497_v45, 4 }
 0x1f8   : > { %v2253_v22 = vsel %vm2197_vm14, %v2163_v62, 0  ;;  %1263 = vrot.lane.b32.xlu1 %v7474_v6, %s5759_s5  ;;  %v1712_v6 = vsel %vm1655_vm5, %v1709_v12, %v8907_v44  ;;  %v1713_v44 = vrot.slane %v7582_v41, 6 }
 0x1f9   : > { %v7578_v56 = vand.u32 4294901760, %v2253_v22  ;;  %1063 = vrot.lane.b32.xlu0 %v984_v61, %s5758_s30  ;;  %v2000_v61 = vsel %vm1980_vm9, %v1959_v49, %v7461_v63  ;;  %v7610_v62 = vsel %vm1125_vm3, %v9037_v37, %v1187_v50 }
 0x1fa   : > { %v7587_v25 = vpop.permute.xlu1 %1247  ;;  %v2041_v1 = vsel %vm2021_vm10, %v2000_v61, %v7500_v8 }
 0x1fb   : > { %v7595_v60 = vsub.f32 %v2253_v22, %v7578_v56  ;;  %v7597_v4 = vpop.permute.xlu0 %1047  ;;  %v661_v22 = vrot.slane %v7582_v41, 2  ;;  %v2082_v63 = vsel %vm2062_vm11, %v2041_v1, %v1372_v52  ;;  %v9038_v52 = vrot.slane %v7497_v45, 2 }
 0x1fc   : > { %737 = vrot.lane.b32.xlu1 %v7491_v34, %s5756_s28  ;;  %v2123_v34 = vsel %vm2103_vm12, %v2082_v63, %v1574_v24  ;;  %v1511_v24 = vrot.slane %v7582_v41, 5 }
 0x1fd   : > { %9036 = vst [vmem:[#allocation11_spill] sm:$0xff] %v7595_v60  ;;  %1791 = vrot.lane.b32.xlu0 %v1712_v6, %s5762_s23  ;;  %v2573_v12 = vand.u32 4294901760, %v7595_v60  ;;  %v7627_v49 = vsel %vm595_vm1, %v9038_v52, %v661_v22 }
 0x1fe   : > { %v7614_v42 = vpop.permute.xlu1 %721 }
 0x1ff   : > { %v1776_v21 = vpop.permute.xlu0 %1775  ;;  %5171 = vmatprep.mubr.f32.mxu0 %v2573_v12  ;;  %v2574_v8 = vsub.f32 %v7595_v60, %v2573_v12  ;;  %v7633_v12 = vld [vmem:[%s5814_s22 + $0x110] sm:$0xff] }
 0x200   : > { %v2164_v27 = vsel %vm2144_vm13, %v2123_v34, %v1776_v21  ;;  %1389 = vrot.lane.b32.xlu1 %v7610_v62, %s5760_s6  ;;  %v8908_v37 = vrot.slane %v7633_v12, 4  ;;  %v1512_v34 = vsel %vm1453_vm4, %v1509_v23, %v1511_v24  ;;  %v985_v21 = vrot.slane %v7582_v41, 3 }
 0x201   : > { %v2256_v57 = vsel %vm2197_vm14, %v2164_v27, 0  ;;  %1265 = vrot.lane.b32.xlu0 %v7519_v53, %s5759_s5  ;;  %v2575_v6 = vand.u32 4294901760, %v2574_v8  ;;  %v9041_v41 = vrot.slane %v7497_v45, 6 }
 0x202   : > { %v7630_v61 = vand.u32 4294901760, %v2256_v57  ;;  %v1374_v1 = vpop.permute.xlu1 %1373  ;;  %v986_v23 = vsel %vm923_vm2, %v983_v26, %v985_v21 }
 0x203   : > { %v7636_v63 = vpop.permute.xlu0 %1249  ;;  %4961 = vmatprep.mubr.f32.mxu1 %v2575_v6  ;;  %v8913_v6 = vrot.slane %v7633_v12, 2 }
 0x204   : > { %v7639_v53 = vsub.f32 %v2256_v57, %v7630_v61  ;;  %863 = vrot.lane.b32.xlu1 %v7627_v49, %s5757_s29  ;;  %v7655_v57 = vsel %vm1125_vm3, %v1187_v50, %v8908_v37 }
 0x205   : > { %739 = vrot.lane.b32.xlu0 %v7535_v59, %s5756_s28  ;;  %v7671_v60 = vsel %vm595_vm1, %v661_v22, %v8913_v6  ;;  %v1714_v22 = vsel %vm1655_vm5, %v9041_v41, %v1713_v44 }
 0x206   : > { %9039 = vst [vmem:[#allocation10_spill] sm:$0xff] %v7639_v53  ;;  %v7649_v8 = vpop.permute.xlu1 %847  ;;  %v2583_v27 = vand.u32 4294901760, %v7639_v53 }
 0x207   : > { %v7658_v52 = vpop.permute.xlu0 %723 }
 0x208   : > { %5172 = vmatmul.mubr.f32.gmra.mrb[18].mxu0 %v2583_v27  ;;  %1591 = vrot.lane.b32.xlu1 %v1512_v34, %s5761_s11  ;;  %v2584_v59 = vsub.f32 %v7639_v53, %v2583_v27  ;;  %v1513_v34 = vrot.slane %v7633_v12, 5  ;;  %v5704_v27 = vld [vmem:[%s5814_s22 + $0xa0] sm:$0xff]  ;;  %v9040_v53 = vld [vmem:[#allocation13_spill] sm:$0xff] }
 0x209   : > { %1391 = vrot.lane.b32.xlu0 %v7655_v57, %s5760_s6  ;;  %v1878_v15 = vsel %vm1857_vm6, %v5704_v27, %v9040_v53  ;;  %v987_v53 = vrot.slane %v7633_v12, 3 }
 0x20a   : > { %v1576_v50 = vpop.permute.xlu1 %1575  ;;  %v2585_v37 = vand.u32 4294901760, %v2584_v59  ;;  %v1919_v26 = vsel %vm1898_vm7, %v1878_v15, %v7478_v32 }
 0x20b   : > { %v1376_v17 = vpop.permute.xlu0 %1375  ;;  %v1960_v59 = vsel %vm1939_vm8, %v1919_v26, %v7513_v35  ;;  %v988_v27 = vsel %vm923_vm2, %v985_v21, %v987_v53 }
 0x20c   : > { %4962 = vmatmul.mubr.f32.gmra.mrb[18].mxu1 %v2585_v37  ;;  %1065 = vrot.lane.b32.xlu1 %v986_v23, %s5758_s30  ;;  %v1514_v37 = vsel %vm1453_vm4, %v1511_v24, %v1513_v34  ;;  %v2001_v15 = vsel %vm1980_vm9, %v1960_v59, %v7551_v51  ;;  %v8914_v51 = vrot.slane %v7633_v12, 6 }
 0x20d   : > { %865 = vrot.lane.b32.xlu0 %v7671_v60, %s5757_s29  ;;  %v2042_v45 = vsel %vm2021_vm10, %v2001_v15, %v7587_v25 }
 0x20e   : > { %v7687_v6 = vpop.permute.xlu1 %1049  ;;  %v2083_v35 = vsel %vm2062_vm11, %v2042_v45, %v1374_v1  ;;  %v5705_v1 = vld [vmem:[%s5814_s22 + $0xa8] sm:$0xff] }
 0x20f   : > { %v7695_v32 = vpop.permute.xlu0 %849  ;;  %v2124_v24 = vsel %vm2103_vm12, %v2083_v35, %v1576_v50 }
 0x210   : > { %1793 = vrot.lane.b32.xlu1 %v1714_v22, %s5762_s23  ;;  %v9042_v22 = vld [vmem:[#allocation12_spill] sm:$0xff] }
 0x211   : > { %1593 = vrot.lane.b32.xlu0 %v1514_v37, %s5761_s11  ;;  %v1879_v59 = vsel %vm1857_vm6, %v5705_v1, %v9042_v22  ;;  %v7718_v37 = vld [vmem:[%s5814_s22 + $0x118] sm:$0xff] }
 0x212   : > { %v1778_v23 = vpop.permute.xlu1 %1777  ;;  %v1191_v21 = vrot.slane %v7718_v37, 4  ;;  %v1920_v15 = vsel %vm1898_vm7, %v1879_v59, %v7522_v46 }
 0x213   : > { %v2165_v26 = vsel %vm2144_vm13, %v2124_v24, %v1778_v23  ;;  %v1578_v41 = vpop.permute.xlu0 %1577  ;;  %v1961_v35 = vsel %vm1939_vm8, %v1920_v15, %v7559_v47  ;;  %v9044_v47 = vrot.slane %v7633_v12, 4 }
 0x214   : > { %v2259_v25 = vsel %vm2197_vm14, %v2165_v26, 0  ;;  %1267 = vrot.lane.b32.xlu1 %v7610_v62, %s5759_s5  ;;  %v1716_v62 = vsel %vm1655_vm5, %v1713_v44, %v8914_v51  ;;  %v1717_v51 = vrot.slane %v7718_v37, 6 }
 0x215   : > { %v7714_v50 = vand.u32 4294901760, %v2259_v25  ;;  %1067 = vrot.lane.b32.xlu0 %v988_v27, %s5758_s30  ;;  %v2002_v27 = vsel %vm1980_vm9, %v1961_v35, %v7597_v4  ;;  %v7746_v26 = vsel %vm1125_vm3, %v9044_v47, %v1191_v21 }
 0x216   : > { %v7723_v45 = vpop.permute.xlu1 %1251  ;;  %v2043_v46 = vsel %vm2021_vm10, %v2002_v27, %v7636_v63 }
 0x217   : > { %v7731_v24 = vsub.f32 %v2259_v25, %v7714_v50  ;;  %v7733_v23 = vpop.permute.xlu0 %1051  ;;  %v665_v25 = vrot.slane %v7718_v37, 2  ;;  %v2084_v4 = vsel %vm2062_vm11, %v2043_v46, %v1376_v17  ;;  %v9045_v17 = vrot.slane %v7633_v12, 2 }
 0x218   : > { %741 = vrot.lane.b32.xlu1 %v7627_v49, %s5756_s28  ;;  %v2125_v49 = vsel %vm2103_vm12, %v2084_v4, %v1578_v41  ;;  %v1515_v41 = vrot.slane %v7718_v37, 5 }
 0x219   : > { %9043 = vst [vmem:[#allocation13_spill] sm:$0xff] %v7731_v24  ;;  %1795 = vrot.lane.b32.xlu0 %v1716_v62, %s5762_s23  ;;  %v2593_v44 = vand.u32 4294901760, %v7731_v24  ;;  %v7763_v35 = vsel %vm595_vm1, %v9045_v17, %v665_v25 }
 0x21a   : > { %v7750_v1 = vpop.permute.xlu1 %725 }
 0x21b   : > { %v1780_v22 = vpop.permute.xlu0 %1779  ;;  %5174 = vmatprep.mubr.f32.mxu0 %v2593_v44  ;;  %v2594_v63 = vsub.f32 %v7731_v24, %v2593_v44  ;;  %v7769_v44 = vld [vmem:[%s5814_s22 + $0x120] sm:$0xff] }
 0x21c   : > { %v2166_v59 = vsel %vm2144_vm13, %v2125_v49, %v1780_v22  ;;  %1393 = vrot.lane.b32.xlu1 %v7746_v26, %s5760_s6  ;;  %v8915_v47 = vrot.slane %v7769_v44, 4  ;;  %v1516_v49 = vsel %vm1453_vm4, %v1513_v34, %v1515_v41  ;;  %v989_v22 = vrot.slane %v7718_v37, 3 }
 0x21d   : > { %v2262_v15 = vsel %vm2197_vm14, %v2166_v59, 0  ;;  %1269 = vrot.lane.b32.xlu0 %v7655_v57, %s5759_s5  ;;  %v2595_v62 = vand.u32 4294901760, %v2594_v63  ;;  %v9048_v37 = vrot.slane %v7633_v12, 6 }
 0x21e   : > { %v7766_v27 = vand.u32 4294901760, %v2262_v15  ;;  %v1378_v46 = vpop.permute.xlu1 %1377  ;;  %v990_v34 = vsel %vm923_vm2, %v987_v53, %v989_v22 }
 0x21f   : > { %v7772_v4 = vpop.permute.xlu0 %1253  ;;  %4964 = vmatprep.mubr.f32.mxu1 %v2595_v62  ;;  %v8920_v62 = vrot.slane %v7769_v44, 2 }
 0x220   : > { %v7775_v57 = vsub.f32 %v2262_v15, %v7766_v27  ;;  %867 = vrot.lane.b32.xlu1 %v7763_v35, %s5757_s29  ;;  %v7791_v15 = vsel %vm1125_vm3, %v1191_v21, %v8915_v47 }
 0x221   : > { %743 = vrot.lane.b32.xlu0 %v7671_v60, %s5756_s28  ;;  %v7807_v24 = vsel %vm595_vm1, %v665_v25, %v8920_v62  ;;  %v1718_v25 = vsel %vm1655_vm5, %v9048_v37, %v1717_v51 }
 0x222   : > { %9046 = vst [vmem:[#allocation12_spill] sm:$0xff] %v7775_v57  ;;  %v7785_v63 = vpop.permute.xlu1 %851  ;;  %v2603_v59 = vand.u32 4294901760, %v7775_v57 }
 0x223   : > { %v7794_v17 = vpop.permute.xlu0 %727 }
 0x224   : > { %5175 = vmatmul.mubr.f32.gmra.mrb[20].mxu0 %v2603_v59  ;;  %1595 = vrot.lane.b32.xlu1 %v1516_v49, %s5761_s11  ;;  %v2604_v60 = vsub.f32 %v7775_v57, %v2603_v59  ;;  %v1517_v49 = vrot.slane %v7769_v44, 5  ;;  %v5708_v59 = vld [vmem:[%s5814_s22 + $0xb0] sm:$0xff]  ;;  %v9047_v57 = vld [vmem:[#allocation15_spill] sm:$0xff] }
 0x225   : > { %1395 = vrot.lane.b32.xlu0 %v7791_v15, %s5760_s6  ;;  %v1880_v20 = vsel %vm1857_vm6, %v5708_v59, %v9047_v57  ;;  %v991_v57 = vrot.slane %v7769_v44, 3 }
 0x226   : > { %v1580_v21 = vpop.permute.xlu1 %1579  ;;  %v2605_v47 = vand.u32 4294901760, %v2604_v60  ;;  %v1921_v53 = vsel %vm1898_vm7, %v1880_v20, %v7614_v42 }
 0x227   : > { %v1380_v16 = vpop.permute.xlu0 %1379  ;;  %v1962_v60 = vsel %vm1939_vm8, %v1921_v53, %v7649_v8  ;;  %v992_v59 = vsel %vm923_vm2, %v989_v22, %v991_v57 }
 0x228   : > { %4965 = vmatmul.mubr.f32.gmra.mrb[20].mxu1 %v2605_v47  ;;  %1069 = vrot.lane.b32.xlu1 %v990_v34, %s5758_s30  ;;  %v1518_v47 = vsel %vm1453_vm4, %v1515_v41, %v1517_v49  ;;  %v2003_v20 = vsel %vm1980_vm9, %v1962_v60, %v7687_v6  ;;  %v8921_v6 = vrot.slane %v7769_v44, 6 }
 0x229   : > { %869 = vrot.lane.b32.xlu0 %v7807_v24, %s5757_s29  ;;  %v2044_v12 = vsel %vm2021_vm10, %v2003_v20, %v7723_v45 }
 0x22a   : > { %v7823_v62 = vpop.permute.xlu1 %1053  ;;  %v2085_v8 = vsel %vm2062_vm11, %v2044_v12, %v1378_v46  ;;  %v5709_v46 = vld [vmem:[%s5814_s22 + $0xb8] sm:$0xff] }
 0x22b   : > { %v7831_v42 = vpop.permute.xlu0 %853  ;;  %v2126_v41 = vsel %vm2103_vm12, %v2085_v8, %v1580_v21 }
 0x22c   : > { %1797 = vrot.lane.b32.xlu1 %v1718_v25, %s5762_s23  ;;  %v9049_v25 = vld [vmem:[#allocation14_spill] sm:$0xff] }
 0x22d   : > { %1597 = vrot.lane.b32.xlu0 %v1518_v47, %s5761_s11  ;;  %v1881_v60 = vsel %vm1857_vm6, %v5709_v46, %v9049_v25  ;;  %v7854_v47 = vld [vmem:[%s5814_s22 + $0x128] sm:$0xff] }
 0x22e   : > { %v1782_v34 = vpop.permute.xlu1 %1781  ;;  %v1195_v22 = vrot.slane %v7854_v47, 4  ;;  %v1922_v20 = vsel %vm1898_vm7, %v1881_v60, %v7658_v52 }
 0x22f   : > { %v2167_v53 = vsel %vm2144_vm13, %v2126_v41, %v1782_v34  ;;  %v1582_v37 = vpop.permute.xlu0 %1581  ;;  %v1963_v8 = vsel %vm1939_vm8, %v1922_v20, %v7695_v32  ;;  %v9052_v32 = vrot.slane %v7769_v44, 4 }
 0x230   : > { %v2265_v45 = vsel %vm2197_vm14, %v2167_v53, 0  ;;  %1271 = vrot.lane.b32.xlu1 %v7746_v26, %s5759_s5  ;;  %v1720_v26 = vsel %vm1655_vm5, %v1717_v51, %v8921_v6  ;;  %v1721_v6 = vrot.slane %v7854_v47, 6 }
 0x231   : > { %v7850_v21 = vand.u32 4294901760, %v2265_v45  ;;  %1071 = vrot.lane.b32.xlu0 %v992_v59, %s5758_s30  ;;  %v2004_v59 = vsel %vm1980_vm9, %v1963_v8, %v7733_v23  ;;  %v7882_v53 = vsel %vm1125_vm3, %v9052_v32, %v1195_v22 }
 0x232   : > { %v7859_v12 = vpop.permute.xlu1 %1255  ;;  %v2045_v52 = vsel %vm2021_vm10, %v2004_v59, %v7772_v4 }
 0x233   : > { %9050 = vst [vmem:[#allocation15_spill] sm:$0xff] %v7850_v21  ;;  %v7867_v41 = vsub.f32 %v2265_v45, %v7850_v21  ;;  %v7869_v34 = vpop.permute.xlu0 %1055  ;;  %v669_v45 = vrot.slane %v7854_v47, 2  ;;  %v2086_v23 = vsel %vm2062_vm11, %v2045_v52, %v1380_v16  ;;  %v9053_v16 = vrot.slane %v7769_v44, 2 }
 0x234   : > { %745 = vrot.lane.b32.xlu1 %v7763_v35, %s5756_s28  ;;  %v2127_v35 = vsel %vm2103_vm12, %v2086_v23, %v1582_v37  ;;  %v1519_v37 = vrot.slane %v7854_v47, 5 }
 0x235   : > { %9051 = vst [vmem:[#allocation14_spill] sm:$0xff] %v7867_v41  ;;  %1799 = vrot.lane.b32.xlu0 %v1720_v26, %s5762_s23  ;;  %v2613_v51 = vand.u32 4294901760, %v7867_v41  ;;  %v7899_v8 = vsel %vm595_vm1, %v9053_v16, %v669_v45 }
 0x236   : > { %v7886_v46 = vpop.permute.xlu1 %729 }
 0x237   : > { %v1784_v25 = vpop.permute.xlu0 %1783  ;;  %5177 = vmatprep.mubr.f32.mxu0 %v2613_v51  ;;  %v2614_v4 = vsub.f32 %v7867_v41, %v2613_v51  ;;  %v7905_v51 = vld [vmem:[%s5814_s22 + $0x130] sm:$0xff] }
 0x238   : > { %v2168_v60 = vsel %vm2144_vm13, %v2127_v35, %v1784_v25  ;;  %1397 = vrot.lane.b32.xlu1 %v7882_v53, %s5760_s6  ;;  %v8922_v32 = vrot.slane %v7905_v51, 4  ;;  %v1520_v35 = vsel %vm1453_vm4, %v1517_v49, %v1519_v37  ;;  %v993_v25 = vrot.slane %v7854_v47, 3 }
 0x239   : > { %v2268_v20 = vsel %vm2197_vm14, %v2168_v60, 0  ;;  %1273 = vrot.lane.b32.xlu0 %v7791_v15, %s5759_s5  ;;  %v2615_v26 = vand.u32 4294901760, %v2614_v4 }
 0x23a   : > { %v7902_v59 = vand.u32 4294901760, %v2268_v20  ;;  %v1382_v52 = vpop.permute.xlu1 %1381  ;;  %v994_v49 = vsel %vm923_vm2, %v991_v57, %v993_v25 }
 0x23b   : > { %v7908_v23 = vpop.permute.xlu0 %1257  ;;  %4967 = vmatprep.mubr.f32.mxu1 %v2615_v26  ;;  %v8927_v26 = vrot.slane %v7905_v51, 2 }
 0x23c   : > { %9054 = vst [vmem:[#allocation50_spill] sm:$0xff] %v7902_v59  ;;  %v7911_v15 = vsub.f32 %v2268_v20, %v7902_v59  ;;  %871 = vrot.lane.b32.xlu1 %v7899_v8, %s5757_s29  ;;  %v7927_v20 = vsel %vm1125_vm3, %v1195_v22, %v8922_v32 }
 0x23d   : > { %747 = vrot.lane.b32.xlu0 %v7807_v24, %s5756_s28  ;;  %v7943_v41 = vsel %vm595_vm1, %v669_v45, %v8927_v26  ;;  %v8929_v26 = vrot.slane %v7905_v51, 3 }
 0x23e   : > { %9055 = vst [vmem:[#allocation51_spill] sm:$0xff] %v7911_v15  ;;  %v7921_v4 = vpop.permute.xlu1 %855  ;;  %v2623_v60 = vand.u32 4294901760, %v7911_v15 }
 0x23f   : > { %v7930_v16 = vpop.permute.xlu0 %731 }
 0x240   : > { %5178 = vmatmul.mubr.f32.gmra.mrb[22].mxu0 %v2623_v60  ;;  %1599 = vrot.lane.b32.xlu1 %v1520_v35, %s5761_s11  ;;  %v2624_v24 = vsub.f32 %v7911_v15, %v2623_v60  ;;  %v5712_v60 = vld [vmem:[%s5814_s22 + $0xc0] sm:$0xff]  ;;  %v9056_v15 = vld [vmem:[#allocation17_spill] sm:$0xff] }
 0x241   : > { %1399 = vrot.lane.b32.xlu0 %v7927_v20, %s5760_s6  ;;  %v1882_v14 = vsel %vm1857_vm6, %v5712_v60, %v9056_v15 }
 0x242   : > { %v1584_v22 = vpop.permute.xlu1 %1583  ;;  %v2625_v32 = vand.u32 4294901760, %v2624_v24  ;;  %v1923_v57 = vsel %vm1898_vm7, %v1882_v14, %v7750_v1  ;;  %v9057_v24 = vrot.slane %v7769_v44, 6 }
 0x243   : > { %v1384_v55 = vpop.permute.xlu0 %1383  ;;  %v1964_v35 = vsel %vm1939_vm8, %v1923_v57, %v7785_v63  ;;  %v5713_v63 = vld [vmem:[%s8868_s2] sm:$0xff] }
 0x244   : > { %4968 = vmatmul.mubr.f32.gmra.mrb[22].mxu1 %v2625_v32  ;;  %1073 = vrot.lane.b32.xlu1 %v994_v49, %s5758_s30  ;;  %v1722_v45 = vsel %vm1655_vm5, %v9057_v24, %v1721_v6  ;;  %v9058_v32 = vrot.slane %v7905_v51, 5  ;;  %v2005_v14 = vsel %vm1980_vm9, %v1964_v35, %v7823_v62  ;;  %v9059_v49 = vld [vmem:[#allocation2_spill] sm:$0xff]  ;;  %v9061_v62 = vld [vmem:[#allocation3_spill] sm:$0xff] }
 0x245   : > { %873 = vrot.lane.b32.xlu0 %v7943_v41, %s5757_s29  ;;  %v2046_v44 = vsel %vm2021_vm10, %v2005_v14, %v7859_v12  ;;  %v9060_v60 = vand.u32 4294901760, %v9059_v49  ;;  %v9062_v35 = vand.u32 4294901760, %v9061_v62 }
 0x246   : > { %v7960_v36 = vpop.permute.xlu1 %1057  ;;  %v1522_v15 = vsel %vm1453_vm4, %v1519_v37, %v9058_v32  ;;  %v5714_v37 = vld [vmem:[%s8868_s2 + $0x8] sm:$0xff]  ;;  %v2087_v12 = vsel %vm2062_vm11, %v2046_v44, %v1382_v52  ;;  %v9063_v44 = vld [vmem:[#allocation16_spill] sm:$0xff] }
 0x247   : > { %v7967_v1 = vpop.permute.xlu0 %857  ;;  %v7977_v57 = vsub.f32 %v5713_v63, %v9060_v60  ;;  %v7984_v24 = vsub.f32 %v5714_v37, %v9062_v35  ;;  %v2128_v32 = vsel %vm2103_vm12, %v2087_v12, %v1584_v22  ;;  %v8934_v63 = vrot.slane %v7905_v51, 6  ;;  %v5715_v22 = vld [vmem:[%s5814_s22 + $0xc8] sm:$0xff] }
 0x248   : > { %1801 = vrot.lane.b32.xlu1 %v1722_v45, %s5762_s23  ;;  %v996_v45 = vsel %vm923_vm2, %v993_v25, %v8929_v26  ;;  %v1883_v35 = vsel %vm1857_vm6, %v5715_v22, %v9063_v44  ;;  %v8008_v26 = vld [vmem:[%s5814_s22 + $0x138] sm:$0xff] }
 0x249   : > { %1601 = vrot.lane.b32.xlu0 %v1522_v15, %s5761_s11  ;;  %v2794_v49 = vand.u32 4294901760, %v7977_v57  ;;  %v2801_v60 = vand.u32 4294901760, %v7984_v24  ;;  %v1724_v19 = vsel %vm1655_vm5, %v1721_v6, %v8934_v63 }
 0x24a   : > { %v1786_v14 = vpop.permute.xlu1 %1785 }
 0x24b   : > { %v2169_v37 = vsel %vm2144_vm13, %v2128_v32, %v1786_v14  ;;  %v1586_v62 = vpop.permute.xlu0 %1585  ;;  %v2795_v25 = vsub.f32 %v7977_v57, %v2794_v49  ;;  %v2802_v15 = vsub.f32 %v7984_v24, %v2801_v60  ;;  %v1199_v32 = vrot.slane %v8008_v26, 4 }
 0x24c   : > { %v2271_v52 = vsel %vm2197_vm14, %v2169_v37, 0  ;;  %1275 = vrot.lane.b32.xlu1 %v7882_v53, %s5759_s5  ;;  %v5376_v14 = vpack.c.bf16 %v2801_v60, %v2794_v49  ;;  %v1924_v53 = vsel %vm1898_vm7, %v1883_v35, %v7794_v17  ;;  %v9066_v60 = vrot.slane %v7905_v51, 4 }
 0x24d   : > { %v8004_v12 = vand.u32 4294901760, %v2271_v52  ;;  %1075 = vrot.lane.b32.xlu0 %v996_v45, %s5758_s30  ;;  %v2796_v2 = vand.u32 4294901760, %v2795_v25  ;;  %v2803_v22 = vand.u32 4294901760, %v2802_v15  ;;  %v1965_v44 = vsel %vm1939_vm8, %v1924_v53, %v7831_v42 }
 0x24e   : > { %v8013_v37 = vpop.permute.xlu1 %1259  ;;  %5377 = vmatprep.subr.bf16.mxu0 %v5376_v14  ;;  %v2006_v17 = vsel %vm1980_vm9, %v1965_v44, %v7869_v34  ;;  %v673_v25 = vrot.slane %v8008_v26, 2  ;;  %v1523_v53 = vrot.slane %v8008_v26, 5 }
 0x24f   : > { %9064 = vst [vmem:[#allocation17_spill] sm:$0xff] %v8004_v12  ;;  %v8021_v45 = vsub.f32 %v2271_v52, %v8004_v12  ;;  %v8023_v11 = vpop.permute.xlu0 %1059  ;;  %v5352_v49 = vpack.c.bf16 %v2803_v22, %v2796_v2  ;;  %5379 = vmatpush3.bf16.msra.mxu0 %v5376_v14  ;;  %v2047_v6 = vsel %vm2021_vm10, %v2006_v17, %v7908_v23  ;;  %v9067_v14 = vrot.slane %v7905_v51, 2  ;;  %v8059_v17 = vld [vmem:[%s5983_s27] sm:$0xff] }
 0x250   : > { %749 = vrot.lane.b32.xlu1 %v7899_v8, %s5756_s28  ;;  %v8036_v52 = vsel %vm1125_vm3, %v9066_v60, %v1199_v32  ;;  %v2088_v34 = vsel %vm2062_vm11, %v2047_v6, %v1384_v55 }
 0x251   : > { %9065 = vst [vmem:[#allocation2_spill] sm:$0xff] %v8021_v45  ;;  %1803 = vrot.lane.b32.xlu0 %v1724_v19, %s5762_s23  ;;  %v2633_v42 = vand.u32 4294901760, %v8021_v45  ;;  %5353 = vmatprep.subr.bf16.mxu1 %v5352_v49  ;;  %v2129_v2 = vsel %vm2103_vm12, %v2088_v34, %v1586_v62  ;;  %v8053_v62 = vsel %vm595_vm1, %v9067_v14, %v673_v25  ;;  %v997_v34 = vrot.slane %v8008_v26, 3 }
 0x252   : > { %v8040_v15 = vpop.permute.xlu1 %733  ;;  %5355 = vmatpush3.bf16.msra.mxu1 %v5352_v49  ;;  %v8933_v49 = vrot.slane %v8059_v17, 4 }
 0x253   : > { %v1788_v8 = vpop.permute.xlu0 %1787  ;;  %5180 = vmatprep.mubr.f32.mxu0 %v2633_v42  ;;  %v2634_v19 = vsub.f32 %v8021_v45, %v2633_v42  ;;  %v9070_v42 = vrot.slane %v7905_v51, 5 }
 0x254   : > { %v2170_v23 = vsel %vm2144_vm13, %v2129_v2, %v1788_v8  ;;  %1401 = vrot.lane.b32.xlu1 %v8036_v52, %s5760_s6 }
 0x255   : > { %v2274_v35 = vsel %vm2197_vm14, %v2170_v23, 0  ;;  %1277 = vrot.lane.b32.xlu0 %v7927_v20, %s5759_s5  ;;  %v2635_v55 = vand.u32 4294901760, %v2634_v19  ;;  %v1524_v60 = vsel %vm1453_vm4, %v9070_v42, %v1523_v53  ;;  %v8081_v19 = vsel %vm1125_vm3, %v1199_v32, %v8933_v49 }
 0x256   : > { %v8056_v22 = vand.u32 4294901760, %v2274_v35  ;;  %v1386_v44 = vpop.permute.xlu1 %1385  ;;  %v8938_v23 = vrot.slane %v8059_v17, 2  ;;  %v1725_v42 = vrot.slane %v8008_v26, 6 }
 0x257   : > { %v8062_v6 = vpop.permute.xlu0 %1261  ;;  %4970 = vmatprep.mubr.f32.mxu1 %v2635_v55  ;;  %v9071_v55 = vrot.slane %v7905_v51, 3 }
 0x258   : > { %9068 = vst [vmem:[#allocation3_spill] sm:$0xff] %v8056_v22  ;;  %v8065_v20 = vsub.f32 %v2274_v35, %v8056_v22  ;;  %875 = vrot.lane.b32.xlu1 %v8053_v62, %s5757_s29  ;;  %v8097_v63 = vsel %vm595_vm1, %v673_v25, %v8938_v23  ;;  %v8940_v23 = vrot.slane %v8059_v17, 3 }
 0x259   : > { %751 = vrot.lane.b32.xlu0 %v7943_v41, %s5756_s28  ;;  %v998_v14 = vsel %vm923_vm2, %v9071_v55, %v997_v34 }
 0x25a   : > { %9069 = vst [vmem:[#allocation16_spill] sm:$0xff] %v8065_v20  ;;  %v8075_v2 = vpop.permute.xlu1 %859  ;;  %v2643_v8 = vand.u32 4294901760, %v8065_v20 }
 0x25b   : > { %v8084_v35 = vpop.permute.xlu0 %735 }
 0x25c   : > { %5181 = vmatmul.mubr.f32.gmra.mrb[24].mxu0 %v2643_v8  ;;  %1603 = vrot.lane.b32.xlu1 %v1524_v60, %s5761_s11  ;;  %v2644_v41 = vsub.f32 %v8065_v20, %v2643_v8  ;;  %v5718_v8 = vld [vmem:[%s5814_s22 + $0xd0] sm:$0xff]  ;;  %v9072_v20 = vld [vmem:[#allocation19_spill] sm:$0xff] }
 0x25d   : > { %1403 = vrot.lane.b32.xlu0 %v8081_v19, %s5760_s6  ;;  %v1884_v28 = vsel %vm1857_vm6, %v5718_v8, %v9072_v20  ;;  %v9075_v8 = vld [vmem:[#allocation5_spill] sm:$0xff] }
 0x25e   : > { %v1588_v32 = vpop.permute.xlu1 %1587  ;;  %v2645_v49 = vand.u32 4294901760, %v2644_v41  ;;  %v1925_v55 = vsel %vm1898_vm7, %v1884_v28, %v7886_v46  ;;  %v9073_v41 = vrot.slane %v7905_v51, 6 }
 0x25f   : > { %v1388_v45 = vpop.permute.xlu0 %1387  ;;  %v1966_v60 = vsel %vm1939_vm8, %v1925_v55, %v7921_v4  ;;  %v5719_v4 = vld [vmem:[%s8868_s2 + $0x10] sm:$0xff]  ;;  %v9076_v55 = vand.u32 4294901760, %v9075_v8 }
 0x260   : > { %4971 = vmatmul.mubr.f32.gmra.mrb[24].mxu1 %v2645_v49  ;;  %1077 = vrot.lane.b32.xlu1 %v998_v14, %s5758_s30  ;;  %v1726_v25 = vsel %vm1655_vm5, %v9073_v41, %v1725_v42  ;;  %v9074_v49 = vrot.slane %v8059_v17, 5  ;;  %v2007_v28 = vsel %vm1980_vm9, %v1966_v60, %v7960_v36  ;;  %v9077_v36 = vld [vmem:[#allocation6_spill] sm:$0xff] }
 0x261   : > { %877 = vrot.lane.b32.xlu0 %v8097_v63, %s5757_s29  ;;  %v2048_v14 = vsel %vm2021_vm10, %v2007_v28, %v8013_v37  ;;  %v8131_v41 = vsub.f32 %v5719_v4, %v9076_v55  ;;  %v9078_v60 = vand.u32 4294901760, %v9077_v36  ;;  %v8148_v55 = vld [vmem:[%s5983_s27 + $0x8] sm:$0xff] }
 0x262   : > { %v8114_v5 = vpop.permute.xlu1 %1061  ;;  %v1526_v20 = vsel %vm1453_vm4, %v1523_v53, %v9074_v49  ;;  %v5720_v53 = vld [vmem:[%s8868_s2 + $0x18] sm:$0xff]  ;;  %v2089_v37 = vsel %vm2062_vm11, %v2048_v14, %v1386_v44 }
 0x263   : > { %v8121_v46 = vpop.permute.xlu0 %861  ;;  %v8138_v49 = vsub.f32 %v5720_v53, %v9078_v60  ;;  %v2130_v28 = vsel %vm2103_vm12, %v2089_v37, %v1588_v32  ;;  %v2808_v36 = vand.u32 4294901760, %v8131_v41  ;;  %v5721_v14 = vld [vmem:[%s5814_s22 + $0xd8] sm:$0xff]  ;;  %v9079_v37 = vld [vmem:[#allocation18_spill] sm:$0xff] }
 0x264   : > { %1805 = vrot.lane.b32.xlu1 %v1726_v25, %s5762_s23  ;;  %v1000_v25 = vsel %vm923_vm2, %v997_v34, %v8940_v23  ;;  %v1885_v23 = vsel %vm1857_vm6, %v5721_v14, %v9079_v37 }
 0x265   : > { %1605 = vrot.lane.b32.xlu0 %v1526_v20, %s5761_s11  ;;  %v2815_v53 = vand.u32 4294901760, %v8138_v49  ;;  %v2809_v34 = vsub.f32 %v8131_v41, %v2808_v36 }
 0x266   : > { %v1790_v4 = vpop.permute.xlu1 %1789 }
 0x267   : > { %v2171_v60 = vsel %vm2144_vm13, %v2130_v28, %v1790_v4  ;;  %v1590_v44 = vpop.permute.xlu0 %1589  ;;  %v2816_v32 = vsub.f32 %v8138_v49, %v2815_v53  ;;  %v1203_v28 = vrot.slane %v8148_v55, 4  ;;  %v5380_v4 = vpack.c.bf16 %v2815_v53, %v2808_v36 }
 0x268   : > { %v2277_v20 = vsel %vm2197_vm14, %v2171_v60, 0  ;;  %1279 = vrot.lane.b32.xlu1 %v8036_v52, %s5759_s5  ;;  %v1926_v60 = vsel %vm1898_vm7, %v1885_v23, %v7930_v16  ;;  %v9081_v52 = vrot.slane %v8059_v17, 6  ;;  %v2810_v59 = vand.u32 4294901760, %v2809_v34 }
 0x269   : > { %v8161_v8 = vand.u32 4294901760, %v2277_v20  ;;  %1079 = vrot.lane.b32.xlu0 %v1000_v25, %s5758_s30  ;;  %v2817_v21 = vand.u32 4294901760, %v2816_v32  ;;  %v1967_v14 = vsel %vm1939_vm8, %v1926_v60, %v7967_v1  ;;  %5381 = vmatprep.subr.bf16.mxu0 %v5380_v4  ;;  %v9083_v36 = vrot.slane %v8059_v17, 4 }
 0x26a   : > { %v8167_v22 = vpop.permute.xlu1 %1263  ;;  %v1728_v12 = vsel %vm1655_vm5, %v1725_v42, %v9081_v52  ;;  %v2008_v16 = vsel %vm1980_vm9, %v1967_v14, %v8023_v11  ;;  %5383 = vmatpush3.bf16.msra.mxu0 %v5380_v4  ;;  %v799_v11 = vrot.slane %v8148_v55, 2  ;;  %v1527_v60 = vrot.slane %v8148_v55, 5 }
 0x26b   : > { %9080 = vst [vmem:[#allocation19_spill] sm:$0xff] %v8161_v8  ;;  %v8175_v37 = vsub.f32 %v2277_v20, %v8161_v8  ;;  %v8177_v25 = vpop.permute.xlu0 %1063  ;;  %v5356_v23 = vpack.c.bf16 %v2817_v21, %v2810_v59  ;;  %v2049_v42 = vsel %vm2021_vm10, %v2008_v16, %v8062_v6  ;;  %v8190_v53 = vsel %vm1125_vm3, %v9083_v36, %v1203_v28  ;;  %v9089_v8 = vld [vmem:[#allocation21_spill] sm:$0xff] }
 0x26c   : > { %753 = vrot.lane.b32.xlu1 %v8053_v62, %s5756_s28  ;;  %v2090_v20 = vsel %vm2062_vm11, %v2049_v42, %v1388_v45  ;;  %v8199_v62 = vld [vmem:[%s5983_s27 + $0x10] sm:$0xff]  ;;  %v1001_v36 = vrot.slane %v8148_v55, 3 }
 0x26d   : > { %9082 = vst [vmem:[#allocation5_spill] sm:$0xff] %v8175_v37  ;;  %1807 = vrot.lane.b32.xlu0 %v1728_v12, %s5762_s23  ;;  %v2653_v1 = vand.u32 4294901760, %v8175_v37  ;;  %5357 = vmatprep.subr.bf16.mxu1 %v5356_v23  ;;  %v2131_v21 = vsel %vm2103_vm12, %v2090_v20, %v1590_v44  ;;  %v9084_v44 = vrot.slane %v8059_v17, 2  ;;  %v8949_v16 = vrot.slane %v8199_v62, 4 }
 0x26e   : > { %v8194_v34 = vpop.permute.xlu1 %737  ;;  %5359 = vmatpush3.bf16.msra.mxu1 %v5356_v23 }
 0x26f   : > { %v1792_v59 = vpop.permute.xlu0 %1791  ;;  %5183 = vmatprep.mubr.f32.mxu0 %v2653_v1  ;;  %v2654_v12 = vsub.f32 %v8175_v37, %v2653_v1  ;;  %v800_v4 = vsel %vm595_vm1, %v9084_v44, %v799_v11  ;;  %v1729_v44 = vrot.slane %v8148_v55, 6  ;;  %v9090_v55 = vrot.slane %v8059_v17, 6 }
 0x270   : > { %v2172_v6 = vsel %vm2144_vm13, %v2131_v21, %v1792_v59  ;;  %1405 = vrot.lane.b32.xlu1 %v8190_v53, %s5760_s6  ;;  %v1206_v59 = vsel %vm1125_vm3, %v1203_v28, %v8949_v16  ;;  %v8955_v16 = vrot.slane %v8199_v62, 5 }
 0x271   : > { %v2280_v32 = vsel %vm2197_vm14, %v2172_v6, 0  ;;  %1281 = vrot.lane.b32.xlu0 %v8081_v19, %s5759_s5  ;;  %v2655_v45 = vand.u32 4294901760, %v2654_v12  ;;  %v9087_v19 = vrot.slane %v8059_v17, 5  ;;  %v801_v12 = vrot.slane %v8199_v62, 2 }
 0x272   : > { %v8211_v52 = vand.u32 4294901760, %v2280_v32  ;;  %v1390_v14 = vpop.permute.xlu1 %1389 }
 0x273   : > { %v8214_v23 = vpop.permute.xlu0 %1265  ;;  %4973 = vmatprep.mubr.f32.mxu1 %v2655_v45  ;;  %v1528_v1 = vsel %vm1453_vm4, %v9087_v19, %v1527_v60  ;;  %v802_v28 = vsel %vm595_vm1, %v799_v11, %v801_v12 }
 0x274   : > { %9085 = vst [vmem:[#allocation6_spill] sm:$0xff] %v8211_v52  ;;  %v8217_v42 = vsub.f32 %v2280_v32, %v8211_v52  ;;  %879 = vrot.lane.b32.xlu1 %v800_v4, %s5757_s29  ;;  %v9088_v32 = vrot.slane %v8059_v17, 3  ;;  %v5722_v52 = vld [vmem:[%s5814_s22 + $0xe0] sm:$0xff] }
 0x275   : > { %755 = vrot.lane.b32.xlu0 %v8097_v63, %s5756_s28 }
 0x276   : > { %9086 = vst [vmem:[#allocation18_spill] sm:$0xff] %v8217_v42  ;;  %v8226_v20 = vpop.permute.xlu1 %863  ;;  %v2663_v21 = vand.u32 4294901760, %v8217_v42  ;;  %v1002_v45 = vsel %vm923_vm2, %v9088_v32, %v1001_v36 }
 0x277   : > { %v8233_v6 = vpop.permute.xlu0 %739 }
 0x278   : > { %5184 = vmatmul.mubr.f32.gmra.mrb[26].mxu0 %v2663_v21  ;;  %1607 = vrot.lane.b32.xlu1 %v1528_v1, %s5761_s11  ;;  %v2664_v63 = vsub.f32 %v8217_v42, %v2663_v21  ;;  %v1886_v1 = vsel %vm1857_vm6, %v5722_v52, %v9089_v8  ;;  %v1530_v8 = vsel %vm1453_vm4, %v1527_v60, %v8955_v16  ;;  %v1003_v52 = vrot.slane %v8199_v62, 3  ;;  %v9094_v16 = vld [vmem:[#allocation4_spill] sm:$0xff] }
 0x279   : > { %1407 = vrot.lane.b32.xlu0 %v1206_v59, %s5760_s6  ;;  %v1927_v21 = vsel %vm1898_vm7, %v1886_v1, %v8040_v15 }
 0x27a   : > { %v1592_v4 = vpop.permute.xlu1 %1591  ;;  %v2665_v19 = vand.u32 4294901760, %v2664_v63  ;;  %v1730_v63 = vsel %vm1655_vm5, %v9090_v55, %v1729_v44  ;;  %v1968_v11 = vsel %vm1939_vm8, %v1927_v21, %v8075_v2  ;;  %v9091_v2 = vld [vmem:[#allocation9_spill] sm:$0xff]  ;;  %v1731_v21 = vrot.slane %v8199_v62, 6 }
 0x27b   : > { %v1392_v37 = vpop.permute.xlu0 %1391  ;;  %v2009_v15 = vsel %vm1980_vm9, %v1968_v11, %v8114_v5  ;;  %v1004_v5 = vsel %vm923_vm2, %v1001_v36, %v1003_v52  ;;  %v350_v55 = vld [vmem:[%s5983_s27 + $0x18] sm:$0xff] }
 0x27c   : > { %4974 = vmatmul.mubr.f32.gmra.mrb[26].mxu1 %v2665_v19  ;;  %1081 = vrot.lane.b32.xlu1 %v1002_v45, %s5758_s30  ;;  %v2050_v17 = vsel %vm2021_vm10, %v2009_v15, %v8167_v22  ;;  %v9092_v45 = vld [vmem:[#allocation8_spill] sm:$0xff]  ;;  %v351_v22 = vld [vmem:[%s5983_s27 + $0x20] sm:$0xff] }
 0x27d   : > { %881 = vrot.lane.b32.xlu0 %v802_v28, %s5757_s29  ;;  %v8271_v19 = vsub.f32 %v9092_v45, %v9091_v2  ;;  %v2091_v28 = vsel %vm2062_vm11, %v2050_v17, %v1390_v14  ;;  %v1329_v17 = vrot.slane %v350_v55, 4 }
 0x27e   : > { %v8256_v12 = vpop.permute.xlu1 %1065  ;;  %v2132_v60 = vsel %vm2103_vm12, %v2091_v28, %v1592_v4  ;;  %v5723_v4 = vld [vmem:[%s5814_s22 + $0xe8] sm:$0xff]  ;;  %v1331_v28 = vrot.slane %v351_v22, 4 }
 0x27f   : > { %v8264_v32 = vpop.permute.xlu0 %865 }
 0x280   : > { %1809 = vrot.lane.b32.xlu1 %v1730_v63, %s5762_s23  ;;  %v2822_v63 = vand.u32 4294901760, %v8271_v19 }
 0x281   : > { %1609 = vrot.lane.b32.xlu0 %v1530_v8, %s5761_s11  ;;  %v9093_v8 = vld [vmem:[#allocation20_spill] sm:$0xff] }
 0x282   : > { %v1794_v1 = vpop.permute.xlu1 %1793  ;;  %v2823_v14 = vsub.f32 %v8271_v19, %v2822_v63  ;;  %5212 = vmatprep.subr.mxu0 %v2822_v63  ;;  %v1887_v36 = vsel %vm1857_vm6, %v5723_v4, %v9093_v8 }
 0x283   : > { %v2173_v11 = vsel %vm2144_vm13, %v2132_v60, %v1794_v1  ;;  %v1594_v15 = vpop.permute.xlu0 %1593  ;;  %5213 = vmatpush3.msra.mxu0 %v2822_v63  ;;  %v1928_v60 = vsel %vm1898_vm7, %v1887_v36, %v8084_v35  ;;  %v1531_v35 = vrot.slane %v350_v55, 5  ;;  %v1533_v36 = vrot.slane %v351_v22, 5 }
 0x284   : > { %v2283_v45 = vsel %vm2197_vm14, %v2173_v11, 0  ;;  %1283 = vrot.lane.b32.xlu1 %v8190_v53, %s5759_s5  ;;  %v1732_v53 = vsel %vm1655_vm5, %v1729_v44, %v1731_v21  ;;  %v2824_v11 = vand.u32 4294901760, %v2823_v14  ;;  %5385 = vmatprep.subr.bf16.mxu0 %v9094_v16  ;;  %v1969_v4 = vsel %vm1939_vm8, %v1928_v60, %v8121_v46 }
 0x285   : > { %v8289_v52 = vand.u32 4294901760, %v2283_v45  ;;  %1083 = vrot.lane.b32.xlu0 %v1004_v5, %s5758_s30  ;;  %v2010_v63 = vsel %vm1980_vm9, %v1969_v4, %v8177_v25  ;;  %v9096_v25 = vrot.slane %v8199_v62, 4 }
 0x286   : > { %v8294_v1 = vpop.permute.xlu1 %1267  ;;  %5002 = vmatprep.subr.mxu1 %v2824_v11  ;;  %v2051_v44 = vsel %vm2021_vm10, %v2010_v63, %v8214_v23  ;;  %v1733_v63 = vrot.slane %v350_v55, 6 }
 0x287   : > { %v8301_v8 = vsub.f32 %v2283_v45, %v8289_v52  ;;  %v8303_v5 = vpop.permute.xlu0 %1067  ;;  %v1332_v45 = vsel %vm1125_vm3, %v1329_v17, %v1331_v28  ;;  %5003 = vmatpush3.msra.mxu1 %v2824_v11  ;;  %v2092_v14 = vsel %vm2062_vm11, %v2051_v44, %v1392_v37  ;;  %v1534_v28 = vsel %vm1453_vm4, %v1531_v35, %v1533_v36 }
 0x288   : > { %1285 = vrot.lane.b32.xlu1 %v1206_v59, %s5759_s5  ;;  %v1330_v59 = vsel %vm1125_vm3, %v9096_v25, %v1329_v17  ;;  %v2133_v4 = vsel %vm2103_vm12, %v2092_v14, %v1594_v15  ;;  %v1735_v44 = vrot.slane %v351_v22, 6  ;;  %v9097_v14 = vrot.slane %v8199_v62, 5 }
 0x289   : > { %9095 = vst [vmem:[#allocation21_spill] sm:$0xff] %v8301_v8  ;;  %1811 = vrot.lane.b32.xlu0 %v1732_v53, %s5762_s23  ;;  %v2673_v46 = vand.u32 4294901760, %v8301_v8  ;;  %v1734_v62 = vsel %vm1655_vm5, %v1731_v21, %v1733_v63 }
 0x28a   : > { %v8314_v60 = vpop.permute.xlu1 %741  ;;  %v1736_v55 = vsel %vm1655_vm5, %v1733_v63, %v1735_v44 }
 0x28b   : > { %v1796_v42 = vpop.permute.xlu0 %1795  ;;  %5186 = vmatprep.mubr.f32.mxu0 %v2673_v46  ;;  %v2674_v23 = vsub.f32 %v8301_v8, %v2673_v46  ;;  %v1532_v46 = vsel %vm1453_vm4, %v9097_v14, %v1531_v35 }
 0x28c   : > { %v2174_v53 = vsel %vm2144_vm13, %v2133_v4, %v1796_v42  ;;  %1411 = vrot.lane.b32.xlu1 %v1332_v45, %s5760_s6 }
 0x28d   : > { %v2286_v37 = vsel %vm2197_vm14, %v2174_v53, 0  ;;  %1409 = vrot.lane.b32.xlu0 %v1330_v59, %s5760_s6  ;;  %v2675_v11 = vand.u32 4294901760, %v2674_v23  ;;  %v8348_v23 = vpack.c.bf16 %v7984_v24, %v7977_v57 }
 0x28e   : > { %v8326_v17 = vand.u32 4294901760, %v2286_v37  ;;  %v1394_v15 = vpop.permute.xlu1 %1393 }
 0x28f   : > { %v1270_v25 = vpop.permute.xlu0 %1269  ;;  %4976 = vmatprep.mubr.f32.mxu1 %v2675_v11  ;;  %5361 = vmatprep.subr.bf16.mxu1 %v8348_v23 }
 0x290   : > { %v8332_v42 = vsub.f32 %v2286_v37, %v8326_v17  ;;  %1613 = vrot.lane.b32.xlu1 %v1534_v28, %s5761_s11  ;;  %v5724_v28 = vld [vmem:[%s5814_s22 + $0xf0] sm:$0xff]  ;;  %v9099_v37 = vld [vmem:[#allocation23_spill] sm:$0xff] }
 0x291   : > { %1611 = vrot.lane.b32.xlu0 %v1532_v46, %s5761_s11  ;;  %v1888_v21 = vsel %vm1857_vm6, %v5724_v28, %v9099_v37 }
 0x292   : > { %9098 = vst [vmem:[#allocation9_spill] sm:$0xff] %v8332_v42  ;;  %v8337_v22 = vpop.permute.xlu1 %867  ;;  %v2683_v36 = vand.u32 4294901760, %v8332_v42  ;;  %v1929_v11 = vsel %vm1898_vm7, %v1888_v21, %v8194_v34 }
 0x293   : > { %v8341_v45 = vpop.permute.xlu0 %743  ;;  %v1970_v63 = vsel %vm1939_vm8, %v1929_v11, %v8226_v20  ;;  %v9100_v20 = vld [vmem:[#allocation22_spill] sm:$0xff] }
 0x294   : > { %5187 = vmatmul.mubr.f32.gmra.mrb[28].mxu0 %v2683_v36  ;;  %1815 = vrot.lane.b32.xlu1 %v1736_v55, %s5762_s23  ;;  %v2684_v35 = vsub.f32 %v8332_v42, %v2683_v36  ;;  %v2011_v57 = vsel %vm1980_vm9, %v1970_v63, %v8256_v12 }
 0x295   : > { %1813 = vrot.lane.b32.xlu0 %v1734_v62, %s5762_s23  ;;  %v2052_v14 = vsel %vm2021_vm10, %v2011_v57, %v8294_v1 }
 0x296   : > { %v1596_v59 = vpop.permute.xlu1 %1595  ;;  %v2685_v4 = vand.u32 4294901760, %v2684_v35  ;;  %v2093_v46 = vsel %vm2062_vm11, %v2052_v14, %v1394_v15 }
 0x297   : > { %v1396_v53 = vpop.permute.xlu0 %1395  ;;  %v2134_v55 = vsel %vm2103_vm12, %v2093_v46, %v1596_v59 }
 0x298   : > { %4977 = vmatmul.mubr.f32.gmra.mrb[28].mxu1 %v2685_v4  ;;  %v5725_v4 = vld [vmem:[%s5814_s22 + $0xf8] sm:$0xff] }
 0x299   : > { %v1889_v28 = vsel %vm1857_vm6, %v5725_v4, %v9100_v20 }
 0x29a   : > { %v1070_v44 = vpop.permute.xlu1 %1069  ;;  %v1930_v12 = vsel %vm1898_vm7, %v1889_v28, %v8233_v6 }
 0x29b   : > { %v870_v24 = vpop.permute.xlu0 %869  ;;  %v1971_v15 = vsel %vm1939_vm8, %v1930_v12, %v8264_v32 }
 0x29c   : > { %v2012_v11 = vsel %vm1980_vm9, %v1971_v15, %v8303_v5 }
 0x29d   : > { %v2053_v63 = vsel %vm2021_vm10, %v2012_v11, %v1270_v25 }
 0x29e   : > { %v1798_v36 = vpop.permute.xlu1 %1797  ;;  %v2094_v14 = vsel %vm2062_vm11, %v2053_v63, %v1396_v53 }
 0x29f   : > { %v2175_v62 = vsel %vm2144_vm13, %v2134_v55, %v1798_v36  ;;  %v1598_v35 = vpop.permute.xlu0 %1597 }
 0x2a0   : > { %v2289_v34 = vsel %vm2197_vm14, %v2175_v62, 0  ;;  %v2135_v6 = vsel %vm2103_vm12, %v2094_v14, %v1598_v35  ;;  %v9103_v14 = vld [vmem:[#allocation25_spill] sm:$0xff] }
 0x2a1   : > { %v8369_v37 = vand.u32 4294901760, %v2289_v34 }
 0x2a2   : > { %v1272_v1 = vpop.permute.xlu1 %1271 }
 0x2a3   : > { %v8376_v59 = vsub.f32 %v2289_v34, %v8369_v37  ;;  %v1072_v21 = vpop.permute.xlu0 %1071 }
 0x2a5   : > { %9101 = vst [vmem:[#allocation8_spill] sm:$0xff] %v8376_v59  ;;  %v2693_v57 = vand.u32 4294901760, %v8376_v59 }
 0x2a6   : > { %v8383_v46 = vpop.permute.xlu1 %745 }
 0x2a7   : > { %v1800_v55 = vpop.permute.xlu0 %1799  ;;  %5189 = vmatprep.mubr.f32.mxu0 %v2693_v57  ;;  %v2694_v32 = vsub.f32 %v8376_v59, %v2693_v57  ;;  %v5726_v57 = vld [vmem:[%s5814_s22 + $0x100] sm:$0xff] }
 0x2a8   : > { %v2176_v36 = vsel %vm2144_vm13, %v2135_v6, %v1800_v55  ;;  %v1890_v6 = vsel %vm1857_vm6, %v5726_v57, %v9103_v14 }
 0x2a9   : > { %v2292_v62 = vsel %vm2197_vm14, %v2176_v36, 0  ;;  %v2695_v5 = vand.u32 4294901760, %v2694_v32  ;;  %v1931_v55 = vsel %vm1898_vm7, %v1890_v6, %v8314_v60  ;;  %v5727_v60 = vld [vmem:[%s5814_s22 + $0x108] sm:$0xff]  ;;  %v9104_v6 = vld [vmem:[#allocation24_spill] sm:$0xff] }
 0x2aa   : > { %v8389_v34 = vand.u32 4294901760, %v2292_v62  ;;  %v1398_v25 = vpop.permute.xlu1 %1397  ;;  %v1972_v32 = vsel %vm1939_vm8, %v1931_v55, %v8337_v22  ;;  %v1891_v22 = vsel %vm1857_vm6, %v5727_v60, %v9104_v6 }
 0x2ab   : > { %v1274_v4 = vpop.permute.xlu0 %1273  ;;  %4979 = vmatprep.mubr.f32.mxu1 %v2695_v5 }
 0x2ac   : > { %v8392_v53 = vsub.f32 %v2292_v62, %v8389_v34  ;;  %v2013_v62 = vsel %vm1980_vm9, %v1972_v32, %v1070_v44  ;;  %v1932_v44 = vsel %vm1898_vm7, %v1891_v22, %v8341_v45 }
 0x2ae   : > { %9102 = vst [vmem:[#allocation20_spill] sm:$0xff] %v8392_v53  ;;  %v872_v20 = vpop.permute.xlu1 %871  ;;  %v2703_v35 = vand.u32 4294901760, %v8392_v53 }
 0x2af   : > { %v8395_v28 = vpop.permute.xlu0 %747 }
 0x2b0   : > { %5190 = vmatmul.mubr.f32.gmra.mrb[30].mxu0 %v2703_v35  ;;  %v2704_v12 = vsub.f32 %v8392_v53, %v2703_v35  ;;  %v2054_v35 = vsel %vm2021_vm10, %v2013_v62, %v1272_v1 }
 0x2b2   : > { %v1600_v15 = vpop.permute.xlu1 %1599  ;;  %v2705_v11 = vand.u32 4294901760, %v2704_v12  ;;  %v2095_v12 = vsel %vm2062_vm11, %v2054_v35, %v1398_v25  ;;  %v1973_v25 = vsel %vm1939_vm8, %v1932_v44, %v870_v24 }
 0x2b3   : > { %v1400_v63 = vpop.permute.xlu0 %1399  ;;  %v2136_v53 = vsel %vm2103_vm12, %v2095_v12, %v1600_v15 }
 0x2b4   : > { %4980 = vmatmul.mubr.f32.gmra.mrb[30].mxu1 %v2705_v11 }
 0x2b6   : > { %v1074_v36 = vpop.permute.xlu1 %1073 }
 0x2b7   : > { %v874_v5 = vpop.permute.xlu0 %873 }
 0x2ba   : > { %v1802_v59 = vpop.permute.xlu1 %1801 }
 0x2bb   : > { %v2177_v57 = vsel %vm2144_vm13, %v2136_v53, %v1802_v59  ;;  %v1602_v11 = vpop.permute.xlu0 %1601  ;;  %v2014_v59 = vsel %vm1980_vm9, %v1973_v25, %v1072_v21 }
 0x2bc   : > { %v2295_v14 = vsel %vm2197_vm14, %v2177_v57, 0  ;;  %v2055_v53 = vsel %vm2021_vm10, %v2014_v59, %v1274_v4 }
 0x2bd   : > { %v8414_v55 = vand.u32 4294901760, %v2295_v14  ;;  %v2096_v35 = vsel %vm2062_vm11, %v2055_v53, %v1400_v63 }
 0x2be   : > { %v1276_v1 = vpop.permute.xlu1 %1275  ;;  %v2137_v57 = vsel %vm2103_vm12, %v2096_v35, %v1602_v11 }
 0x2bf   : > { %v8420_v15 = vsub.f32 %v2295_v14, %v8414_v55  ;;  %v1076_v32 = vpop.permute.xlu0 %1075 }
 0x2c1   : > { %9105 = vst [vmem:[#allocation4_spill] sm:$0xff] %v8420_v15  ;;  %v2713_v62 = vand.u32 4294901760, %v8420_v15 }
 0x2c2   : > { %v8426_v12 = vpop.permute.xlu1 %749 }
 0x2c3   : > { %v1804_v45 = vpop.permute.xlu0 %1803  ;;  %5192 = vmatprep.mubr.f32.mxu0 %v2713_v62  ;;  %v2714_v24 = vsub.f32 %v8420_v15, %v2713_v62 }
 0x2c4   : > { %v2178_v14 = vsel %vm2144_vm13, %v2137_v57, %v1804_v45  ;;  %v5728_v57 = vld [vmem:[%s5814_s22 + $0x110] sm:$0xff]  ;;  %v9108_v45 = vld [vmem:[#allocation27_spill] sm:$0xff] }
 0x2c5   : > { %v2298_v60 = vsel %vm2197_vm14, %v2178_v14, 0  ;;  %v2715_v21 = vand.u32 4294901760, %v2714_v24  ;;  %v1892_v24 = vsel %vm1857_vm6, %v5728_v57, %v9108_v45  ;;  %v5729_v45 = vld [vmem:[%s5814_s22 + $0x118] sm:$0xff] }
 0x2c6   : > { %v8432_v6 = vand.u32 4294901760, %v2298_v60  ;;  %v1402_v4 = vpop.permute.xlu1 %1401  ;;  %v1933_v14 = vsel %vm1898_vm7, %v1892_v24, %v8383_v46  ;;  %v9109_v46 = vld [vmem:[#allocation26_spill] sm:$0xff] }
 0x2c7   : > { %v1278_v22 = vpop.permute.xlu0 %1277  ;;  %4982 = vmatprep.mubr.f32.mxu1 %v2715_v21 }
 0x2c8   : > { %9106 = vst [vmem:[#allocation23_spill] sm:$0xff] %v8432_v6  ;;  %v8435_v63 = vsub.f32 %v2298_v60, %v8432_v6  ;;  %v1974_v60 = vsel %vm1939_vm8, %v1933_v14, %v872_v20  ;;  %v1893_v20 = vsel %vm1857_vm6, %v5729_v45, %v9109_v46 }
 0x2c9   : > { %v2015_v15 = vsel %vm1980_vm9, %v1974_v60, %v1074_v36  ;;  %v1934_v36 = vsel %vm1898_vm7, %v1893_v20, %v8395_v28 }
 0x2ca   : > { %9107 = vst [vmem:[#allocation22_spill] sm:$0xff] %v8435_v63  ;;  %v876_v44 = vpop.permute.xlu1 %875  ;;  %v2723_v11 = vand.u32 4294901760, %v8435_v63 }
 0x2cb   : > { %v8438_v25 = vpop.permute.xlu0 %751 }
 0x2cc   : > { %5193 = vmatmul.mubr.f32.gmra.mrb[32].mxu0 %v2723_v11  ;;  %v2724_v59 = vsub.f32 %v8435_v63, %v2723_v11  ;;  %v2056_v11 = vsel %vm2021_vm10, %v2015_v15, %v1276_v1  ;;  %v1975_v15 = vsel %vm1939_vm8, %v1934_v36, %v874_v5 }
 0x2ce   : > { %v1604_v53 = vpop.permute.xlu1 %1603  ;;  %v2725_v62 = vand.u32 4294901760, %v2724_v59  ;;  %v2097_v59 = vsel %vm2062_vm11, %v2056_v11, %v1402_v4 }
 0x2cf   : > { %v1404_v35 = vpop.permute.xlu0 %1403  ;;  %v2138_v63 = vsel %vm2103_vm12, %v2097_v59, %v1604_v53 }
 0x2d0   : > { %4983 = vmatmul.mubr.f32.gmra.mrb[32].mxu1 %v2725_v62 }
 0x2d2   : > { %v1078_v21 = vpop.permute.xlu1 %1077 }
 0x2d3   : > { %v878_v42 = vpop.permute.xlu0 %877 }
 0x2d6   : > { %v1806_v8 = vpop.permute.xlu1 %1805 }
 0x2d7   : > { %v2179_v6 = vsel %vm2144_vm13, %v2138_v63, %v1806_v8  ;;  %v1606_v57 = vpop.permute.xlu0 %1605  ;;  %v2016_v8 = vsel %vm1980_vm9, %v1975_v15, %v1076_v32 }
 0x2d8   : > { %v2301_v62 = vsel %vm2197_vm14, %v2179_v6, 0  ;;  %v2057_v6 = vsel %vm2021_vm10, %v2016_v8, %v1278_v22 }
 0x2d9   : > { %v8456_v24 = vand.u32 4294901760, %v2301_v62  ;;  %v2098_v14 = vsel %vm2062_vm11, %v2057_v6, %v1404_v35 }
 0x2da   : > { %v1280_v1 = vpop.permute.xlu1 %1279  ;;  %v2139_v11 = vsel %vm2103_vm12, %v2098_v14, %v1606_v57  ;;  %v5730_v14 = vld [vmem:[%s5814_s22 + $0x120] sm:$0xff]  ;;  %s5634_s22 = smul.u32 320, %s9169_s15 }
 0x2db   : > { %9110 = vst [vmem:[#allocation25_spill] sm:$0xff] %v8456_v24  ;;  %v8462_v4 = vsub.f32 %v2301_v62, %v8456_v24  ;;  %v1080_v53 = vpop.permute.xlu0 %1079 }
 0x2dc   : > { %s8736_s5 = scalar_lea.vmem %s8870_s4, %s5634_s22 }
 0x2dd   : > { %9111 = vst [vmem:[#allocation24_spill] sm:$0xff] %v8462_v4  ;;  %v2733_v63 = vand.u32 4294901760, %v8462_v4 }
 0x2de   : > { %v8468_v60 = vpop.permute.xlu1 %753 }
 0x2df   : > { %v1808_v28 = vpop.permute.xlu0 %1807  ;;  %5195 = vmatprep.mubr.f32.mxu0 %v2733_v63  ;;  %v2734_v5 = vsub.f32 %v8462_v4, %v2733_v63 }
 0x2e0   : > { %v2180_v59 = vsel %vm2144_vm13, %v2139_v11, %v1808_v28  ;;  %v9114_v11 = vld [vmem:[#allocation29_spill] sm:$0xff] }
 0x2e1   : > { %v2304_v62 = vsel %vm2197_vm14, %v2180_v59, 0  ;;  %v2735_v32 = vand.u32 4294901760, %v2734_v5  ;;  %v1894_v28 = vsel %vm1857_vm6, %v5730_v14, %v9114_v11  ;;  %v9115_v11 = vld [vmem:[#allocation28_spill] sm:$0xff] }
 0x2e2   : > { %v8474_v45 = vand.u32 4294901760, %v2304_v62  ;;  %v1406_v22 = vpop.permute.xlu1 %1405  ;;  %v1935_v5 = vsel %vm1898_vm7, %v1894_v28, %v8426_v12  ;;  %v1895_v12 = vsel %vm1857_vm6, %v7854_v47, %v9115_v11  ;;  %v9116_v11 = vld [vmem:[#allocation30_spill] sm:$0xff] }
 0x2e3   : > { %v1282_v46 = vpop.permute.xlu0 %1281  ;;  %4985 = vmatprep.mubr.f32.mxu1 %v2735_v32  ;;  %v1976_v59 = vsel %vm1939_vm8, %v1935_v5, %v876_v44 }
 0x2e4   : > { %9112 = vst [vmem:[#allocation27_spill] sm:$0xff] %v8474_v45  ;;  %v8477_v35 = vsub.f32 %v2304_v62, %v8474_v45  ;;  %v2017_v32 = vsel %vm1980_vm9, %v1976_v59, %v1078_v21  ;;  %v1936_v21 = vsel %vm1898_vm7, %v1895_v12, %v8438_v25  ;;  %v9117_v12 = vld [vmem:[#allocation31_spill] sm:$0xff] }
 0x2e5   : > { %v2058_v45 = vsel %vm2021_vm10, %v2017_v32, %v1280_v1 }
 0x2e6   : > { %9113 = vst [vmem:[#allocation26_spill] sm:$0xff] %v8477_v35  ;;  %v880_v20 = vpop.permute.xlu1 %879  ;;  %v2743_v57 = vand.u32 4294901760, %v8477_v35 }
 0x2e7   : > { %v756_v36 = vpop.permute.xlu0 %755 }
 0x2e8   : > { %5196 = vmatmul.mubr.f32.gmra.mrb[34].mxu0 %v2743_v57  ;;  %v2744_v15 = vsub.f32 %v8477_v35, %v2743_v57  ;;  %v2099_v57 = vsel %vm2062_vm11, %v2058_v45, %v1406_v22  ;;  %v1977_v45 = vsel %vm1939_vm8, %v1936_v21, %v878_v42  ;;  %v1896_v21 = vsel %vm1857_vm6, %v7905_v51, %v9117_v12 }
 0x2ea   : > { %v1608_v8 = vpop.permute.xlu1 %1607  ;;  %v2745_v6 = vand.u32 4294901760, %v2744_v15 }
 0x2eb   : > { %v1408_v63 = vpop.permute.xlu0 %1407  ;;  %v2140_v15 = vsel %vm2103_vm12, %v2099_v57, %v1608_v8 }
 0x2ec   : > { %4986 = vmatmul.mubr.f32.gmra.mrb[34].mxu1 %v2745_v6 }
 0x2ee   : > { %v1082_v62 = vpop.permute.xlu1 %1081 }
 0x2ef   : > { %v882_v4 = vpop.permute.xlu0 %881 }
 0x2f2   : > { %v1810_v35 = vpop.permute.xlu1 %1809 }
 0x2f3   : > { %v2181_v24 = vsel %vm2144_vm13, %v2140_v15, %v1810_v35  ;;  %v1610_v14 = vpop.permute.xlu0 %1609  ;;  %v2018_v35 = vsel %vm1980_vm9, %v1977_v45, %v1080_v53 }
 0x2f4   : > { %v2307_v6 = vsel %vm2197_vm14, %v2181_v24, 0  ;;  %v2059_v24 = vsel %vm2021_vm10, %v2018_v35, %v1282_v46  ;;  %v1937_v35 = vsel %vm1898_vm7, %v1896_v21, %v8468_v60 }
 0x2f5   : > { %v8496_v44 = vand.u32 4294901760, %v2307_v6  ;;  %v2100_v47 = vsel %vm2062_vm11, %v2059_v24, %v1408_v63  ;;  %v1897_v63 = vsel %vm1857_vm6, %v8008_v26, %v9116_v11 }
 0x2f6   : > { %v1284_v1 = vpop.permute.xlu1 %1283  ;;  %v2141_v59 = vsel %vm2103_vm12, %v2100_v47, %v1610_v14  ;;  %v1938_v45 = vsel %vm1898_vm7, %v1897_v63, %v756_v36 }
 0x2f7   : > { %v8502_v22 = vsub.f32 %v2307_v6, %v8496_v44  ;;  %v1084_v8 = vpop.permute.xlu0 %1083  ;;  %v1979_v24 = vsel %vm1939_vm8, %v1938_v45, %v882_v4 }
 0x2f8   : > { %v2020_v26 = vsel %vm1980_vm9, %v1979_v24, %v1084_v8 }
 0x2f9   : > { %v2753_v28 = vand.u32 4294901760, %v8502_v22 }
 0x2fa   : > { %v1286_v5 = vpop.permute.xlu1 %1285 }
 0x2fb   : > { %v1812_v32 = vpop.permute.xlu0 %1811  ;;  %5198 = vmatprep.mubr.f32.mxu0 %v2753_v28  ;;  %v2754_v25 = vsub.f32 %v8502_v22, %v2753_v28 }
 0x2fc   : > { %v2182_v42 = vsel %vm2144_vm13, %v2141_v59, %v1812_v32  ;;  %v1978_v59 = vsel %vm1939_vm8, %v1937_v35, %v880_v20 }
 0x2fd   : > { %v2310_v57 = vsel %vm2197_vm14, %v2182_v42, 0  ;;  %v2755_v15 = vand.u32 4294901760, %v2754_v25  ;;  %v2019_v25 = vsel %vm1980_vm9, %v1978_v59, %v1082_v62  ;;  %v2061_v42 = vsel %vm2021_vm10, %v2020_v26, %v1286_v5 }
 0x2fe   : > { %v8512_v6 = vand.u32 4294901760, %v2310_v57  ;;  %v1412_v53 = vpop.permute.xlu1 %1411  ;;  %v2060_v36 = vsel %vm2021_vm10, %v2019_v25, %v1284_v1  ;;  %v5364_v26 = vpack.c.bf16 %v8138_v49, %v8131_v41  ;;  %v9119_v41 = vld [vmem:[#allocation15_spill] sm:$0xff]  ;;  %v9120_v49 = vld [vmem:[#allocation50_spill] sm:$0xff] }
 0x2ff   : > { %v1410_v46 = vpop.permute.xlu0 %1409  ;;  %4988 = vmatprep.mubr.f32.mxu1 %v2755_v15  ;;  %v2102_v60 = vsel %vm2062_vm11, %v2061_v42, %v1412_v53  ;;  %v9125_v25 = vld [vmem:[#allocation23_spill] sm:$0xff]  ;;  %v9126_v42 = vld [vmem:[#allocation25_spill] sm:$0xff] }
 0x300   : > { %v8518_v14 = vsub.f32 %v2310_v57, %v8512_v6  ;;  %v2101_v4 = vsel %vm2062_vm11, %v2060_v36, %v1410_v46  ;;  %v9128_v36 = vld [vmem:[#allocation32_spill] sm:$0xff] }
 0x302   : > { %v1614_v28 = vpop.permute.xlu1 %1613  ;;  %v2763_v47 = vand.u32 4294901760, %v8518_v14 }
 0x303   : > { %v1612_v32 = vpop.permute.xlu0 %1611  ;;  %v2143_v57 = vsel %vm2103_vm12, %v2102_v60, %v1614_v28  ;;  %v9129_v60 = vld [vmem:[#allocation33_spill] sm:$0xff] }
 0x304   : > { %5199 = vmatmul.mubr.f32.gmra.mrb[36].mxu0 %v2763_v47  ;;  %v2764_v51 = vsub.f32 %v8518_v14, %v2763_v47  ;;  %v2142_v8 = vsel %vm2103_vm12, %v2101_v4, %v1612_v32  ;;  %v9118_v32 = vld [vmem:[#allocation7_spill] sm:$0xff]  ;;  %v9130_v4 = vld [vmem:[#allocation34_spill] sm:$0xff] }
 0x306   : > { %v1816_v15 = vpop.permute.xlu1 %1815  ;;  %v2765_v20 = vand.u32 4294901760, %v2764_v51  ;;  %v9127_v51 = vld [vmem:[#allocation27_spill] sm:$0xff] }
 0x307   : > { %v2184_v11 = vsel %vm2144_vm13, %v2143_v57, %v1816_v15  ;;  %v1814_v62 = vpop.permute.xlu0 %1813  ;;  %v9131_v57 = vld [vmem:[#allocation35_spill] sm:$0xff]  ;;  %v9154_v15 = vld [vmem:[#allocation5_spill] sm:$0xff] }
 0x308   : > { %v2316_v5 = vsel %vm2197_vm14, %v2184_v11, 0  ;;  %v2183_v63 = vsel %vm2144_vm13, %v2142_v8, %v1814_v62  ;;  %4989 = vmatmul.mubr.f32.gmra.mrb[36].mxu1 %v2765_v20  ;;  %v9155_v20 = vld [vmem:[#allocation18_spill] sm:$0xff]  ;;  %v9156_v8 = vld [vmem:[#allocation21_spill] sm:$0xff]  ;;  %v9158_v62 = vld [vmem:[#allocation8_spill] sm:$0xff] }
 0x309   : > { %v8541_v12 = vand.u32 4294901760, %v2316_v5  ;;  %v2313_v1 = vsel %vm2197_vm14, %v2183_v63, 0  ;;  %v9157_v11 = vld [vmem:[#allocation9_spill] sm:$0xff] }
 0x30a   : > { %v8544_v53 = vand.u32 4294901760, %v2313_v1 }
 0x30b   : > { %v8547_v46 = vsub.f32 %v2316_v5, %v8541_v12  ;;  %v9159_v5 = vld [vmem:[#allocation20_spill] sm:$0xff] }
 0x30c   : > { %v8550_v21 = vsub.f32 %v2313_v1, %v8544_v53 }
 0x30d   : > { %v2783_v45 = vand.u32 4294901760, %v8547_v46 }
 0x30e   : > { %v2773_v35 = vand.u32 4294901760, %v8550_v21 }
 0x30f   : > { %v2784_v24 = vsub.f32 %v8547_v46, %v2783_v45 }
 0x310   : > { %5201 = vmatprep.mubr.f32.mxu0 %v2773_v35  ;;  %v2774_v28 = vsub.f32 %v8550_v21, %v2773_v35 }
 0x311   : > { %5202 = vmatmul.mubr.f32.gmra.mrb[38].mxu0 %v2783_v45  ;;  %v2785_v47 = vand.u32 4294901760, %v2784_v24 }
 0x312   : > { %5214 = vmatprep.mubr.f32.mxu0 %v6474_v3  ;;  %v2775_v59 = vand.u32 4294901760, %v2774_v28 }
 0x314   : > { %4991 = vmatprep.mubr.f32.mxu1 %v2775_v59 }
 0x315   : > { %4992 = vmatmul.mubr.f32.gmra.mrb[38].mxu1 %v2785_v47  ;;  %5215 = vmatmul.mubr.f32.vlgmr.msra.gmra.mrb[0].mxu0 %v6509_v31 }
 0x316   : > { %5004 = vmatprep.mubr.f32.mxu1 %v6474_v3  ;;  %5217 = vmatprep.mubr.f32.mxu0 %v6584_v48 }
 0x317   : > { %5387 = vmatpush3.bf16.msra.mxu0 %v9094_v16  ;;  %v9121_v16 = vld [vmem:[#allocation17_spill] sm:$0xff] }
 0x318   : > { %5389 = vmatprep.subr.bf16.mxu0 %v9118_v32 }
 0x319   : > { %5005 = vmatmul.mubr.f32.vlgmr.msra.gmra.mrb[0].mxu1 %v6509_v31  ;;  %5218 = vmatmul.mubr.f32.gmra.mrb[2].mxu0 %v6629_v10 }
 0x31a   : > { %5363 = vmatpush3.bf16.msra.mxu1 %v8348_v23  ;;  %5007 = vmatprep.mubr.f32.mxu1 %v6584_v48  ;;  %v9124_v23 = vld [vmem:[#allocation6_spill] sm:$0xff] }
 0x31b   : > { %5220 = vmatprep.mubr.f32.mxu0 %v6700_v9  ;;  %5365 = vmatprep.subr.bf16.mxu1 %v5364_v26 }
 0x31c   : > { %5391 = vmatpush3.bf16.msra.mxu0 %v9118_v32 }
 0x31d   : > { %5008 = vmatmul.mubr.f32.gmra.mrb[2].mxu1 %v6629_v10  ;;  %5221 = vmatmul.mubr.f32.gmra.mrb[4].mxu0 %v6747_v43 }
 0x31e   : > { %5010 = vmatprep.mubr.f32.mxu1 %v6700_v9  ;;  %5223 = vmatprep.mubr.f32.mxu0 %v6816_v18 }
 0x31f   : > { %5367 = vmatpush3.bf16.msra.mxu1 %v5364_v26  ;;  %5282 = vmatprep.subr.mxu0 %v9091_v2 }
 0x320   : > { %5072 = vmatprep.subr.mxu1 %v8271_v19  ;;  %5283 = vmatpush3.msra.mxu0 %v9091_v2  ;;  %v9122_v2 = vld [vmem:[#allocation3_spill] sm:$0xff] }
 0x321   : > { %5011 = vmatmul.mubr.f32.gmra.mrb[4].mxu1 %v6747_v43  ;;  %5224 = vmatmul.mubr.f32.gmra.mrb[6].mxu0 %v6870_v29 }
 0x322   : > { %5013 = vmatprep.mubr.f32.mxu1 %v6816_v18  ;;  %5226 = vmatprep.mubr.f32.mxu0 %v6931_v33 }
 0x323   : > { %5073 = vmatpush3.msra.mxu1 %v8271_v19  ;;  %v9123_v19 = vld [vmem:[#allocation19_spill] sm:$0xff] }
 0x325   : > { %5014 = vmatmul.mubr.f32.gmra.mrb[6].mxu1 %v6870_v29  ;;  %5227 = vmatmul.mubr.f32.gmra.mrb[8].mxu0 %v6987_v40 }
 0x326   : > { %5016 = vmatprep.mubr.f32.mxu1 %v6931_v33  ;;  %5229 = vmatprep.mubr.f32.mxu0 %v7051_v54 }
 0x329   : > { %5017 = vmatmul.mubr.f32.gmra.mrb[8].mxu1 %v6987_v40  ;;  %5230 = vmatmul.mubr.f32.gmra.mrb[10].mxu0 %v7103_v0 }
 0x32a   : > { %5019 = vmatprep.mubr.f32.mxu1 %v7051_v54  ;;  %5232 = vmatprep.mubr.f32.mxu0 %v7170_v38 }
 0x32d   : > { %5020 = vmatmul.mubr.f32.gmra.mrb[10].mxu1 %v7103_v0  ;;  %5233 = vmatmul.mubr.f32.gmra.mrb[12].mxu0 %v7222_v58 }
 0x32e   : > { %5022 = vmatprep.mubr.f32.mxu1 %v7170_v38  ;;  %5235 = vmatprep.mubr.f32.mxu0 %v7306_v30 }
 0x331   : > { %5023 = vmatmul.mubr.f32.gmra.mrb[12].mxu1 %v7222_v58  ;;  %5236 = vmatmul.mubr.f32.gmra.mrb[14].mxu0 %v7358_v13 }
 0x332   : > { %5025 = vmatprep.mubr.f32.mxu1 %v7306_v30  ;;  %5238 = vmatprep.mubr.f32.mxu0 %v7442_v39 }
 0x335   : > { %5026 = vmatmul.mubr.f32.gmra.mrb[14].mxu1 %v7358_v13  ;;  %5239 = vmatmul.mubr.f32.gmra.mrb[16].mxu0 %v7494_v7 }
 0x336   : > { %5028 = vmatprep.mubr.f32.mxu1 %v7442_v39  ;;  %5241 = vmatprep.mubr.f32.mxu0 %v7578_v56 }
 0x339   : > { %5029 = vmatmul.mubr.f32.gmra.mrb[16].mxu1 %v7494_v7  ;;  %5242 = vmatmul.mubr.f32.gmra.mrb[18].mxu0 %v7630_v61 }
 0x33a   : > { %5031 = vmatprep.mubr.f32.mxu1 %v7578_v56  ;;  %5244 = vmatprep.mubr.f32.mxu0 %v7714_v50 }
 0x33d   : > { %5032 = vmatmul.mubr.f32.gmra.mrb[18].mxu1 %v7630_v61  ;;  %5245 = vmatmul.mubr.f32.gmra.mrb[20].mxu0 %v7766_v27 }
 0x33e   : > { %5034 = vmatprep.mubr.f32.mxu1 %v7714_v50  ;;  %5247 = vmatprep.mubr.f32.mxu0 %v9119_v41 }
 0x341   : > { %5035 = vmatmul.mubr.f32.gmra.mrb[20].mxu1 %v7766_v27  ;;  %5248 = vmatmul.mubr.f32.gmra.mrb[22].mxu0 %v9120_v49 }
 0x342   : > { %5037 = vmatprep.mubr.f32.mxu1 %v9119_v41  ;;  %5250 = vmatprep.mubr.f32.mxu0 %v9121_v16 }
 0x345   : > { %5038 = vmatmul.mubr.f32.gmra.mrb[22].mxu1 %v9120_v49  ;;  %5251 = vmatmul.mubr.f32.gmra.mrb[24].mxu0 %v9122_v2 }
 0x346   : > { %5040 = vmatprep.mubr.f32.mxu1 %v9121_v16  ;;  %5253 = vmatprep.mubr.f32.mxu0 %v9123_v19 }
 0x349   : > { %5041 = vmatmul.mubr.f32.gmra.mrb[24].mxu1 %v9122_v2  ;;  %5254 = vmatmul.mubr.f32.gmra.mrb[26].mxu0 %v9124_v23 }
 0x34a   : > { %5043 = vmatprep.mubr.f32.mxu1 %v9123_v19  ;;  %5256 = vmatprep.mubr.f32.mxu0 %v8289_v52 }
 0x34d   : > { %5044 = vmatmul.mubr.f32.gmra.mrb[26].mxu1 %v9124_v23  ;;  %5257 = vmatmul.mubr.f32.gmra.mrb[28].mxu0 %v8326_v17 }
 0x34e   : > { %5046 = vmatprep.mubr.f32.mxu1 %v8289_v52  ;;  %5259 = vmatprep.mubr.f32.mxu0 %v8369_v37 }
 0x351   : > { %5047 = vmatmul.mubr.f32.gmra.mrb[28].mxu1 %v8326_v17  ;;  %5260 = vmatmul.mubr.f32.gmra.mrb[30].mxu0 %v8389_v34 }
 0x352   : > { %5049 = vmatprep.mubr.f32.mxu1 %v8369_v37  ;;  %5262 = vmatprep.mubr.f32.mxu0 %v8414_v55 }
 0x355   : > { %5050 = vmatmul.mubr.f32.gmra.mrb[30].mxu1 %v8389_v34  ;;  %5263 = vmatmul.mubr.f32.gmra.mrb[32].mxu0 %v9125_v25 }
 0x356   : > { %5052 = vmatprep.mubr.f32.mxu1 %v8414_v55  ;;  %5265 = vmatprep.mubr.f32.mxu0 %v9126_v42 }
 0x359   : > { %5053 = vmatmul.mubr.f32.gmra.mrb[32].mxu1 %v9125_v25  ;;  %5266 = vmatmul.mubr.f32.gmra.mrb[34].mxu0 %v9127_v51 }
 0x35a   : > { %5055 = vmatprep.mubr.f32.mxu1 %v9126_v42  ;;  %5268 = vmatprep.mubr.f32.mxu0 %v8496_v44 }
 0x35d   : > { %5056 = vmatmul.mubr.f32.gmra.mrb[34].mxu1 %v9127_v51  ;;  %5269 = vmatmul.mubr.f32.gmra.mrb[36].mxu0 %v8512_v6 }
 0x35e   : > { %5058 = vmatprep.mubr.f32.mxu1 %v8496_v44  ;;  %5271 = vmatprep.mubr.f32.mxu0 %v8544_v53 }
 0x361   : > { %5059 = vmatmul.mubr.f32.gmra.mrb[36].mxu1 %v8512_v6  ;;  %5272 = vmatmul.mubr.f32.gmra.mrb[38].mxu0 %v8541_v12 }
 0x362   : > { %5061 = vmatprep.mubr.f32.mxu1 %v8544_v53  ;;  %5284 = vmatprep.mubr.f32.mxu0 %v6474_v3  ;;  %v9132_v3 = vld [vmem:[#allocation36_spill] sm:$0xff] }
 0x365   : > { %5062 = vmatmul.mubr.f32.gmra.mrb[38].mxu1 %v8541_v12  ;;  %5285 = vmatmul.mubr.f32.vlgmr.msra.gmra.mrb[0].mxu0 %v6509_v31  ;;  %v9133_v31 = vld [vmem:[#allocation37_spill] sm:$0xff] }
 0x366   : > { %5074 = vmatprep.mubr.f32.mxu1 %v9128_v36  ;;  %5287 = vmatprep.mubr.f32.mxu0 %v6584_v48  ;;  %v9134_v48 = vld [vmem:[#allocation38_spill] sm:$0xff] }
 0x369   : > { %5075 = vmatmul.mubr.f32.vlgmr.msra.gmra.mrb[0].mxu1 %v9129_v60  ;;  %5288 = vmatmul.mubr.f32.gmra.mrb[2].mxu0 %v6629_v10  ;;  %v9135_v10 = vld [vmem:[#allocation39_spill] sm:$0xff] }
 0x36a   : > { %5077 = vmatprep.mubr.f32.mxu1 %v9130_v4  ;;  %5290 = vmatprep.mubr.f32.mxu0 %v6700_v9  ;;  %v9136_v9 = vld [vmem:[#allocation40_spill] sm:$0xff] }
 0x36d   : > { %5078 = vmatmul.mubr.f32.gmra.mrb[2].mxu1 %v9131_v57  ;;  %5291 = vmatmul.mubr.f32.gmra.mrb[4].mxu0 %v6747_v43  ;;  %v9137_v43 = vld [vmem:[#allocation41_spill] sm:$0xff] }
 0x36e   : > { %5080 = vmatprep.mubr.f32.mxu1 %v9132_v3  ;;  %5293 = vmatprep.mubr.f32.mxu0 %v6816_v18  ;;  %v9138_v18 = vld [vmem:[#allocation42_spill] sm:$0xff] }
 0x371   : > { %5081 = vmatmul.mubr.f32.gmra.mrb[4].mxu1 %v9133_v31  ;;  %5294 = vmatmul.mubr.f32.gmra.mrb[6].mxu0 %v6870_v29  ;;  %v9139_v29 = vld [vmem:[#allocation43_spill] sm:$0xff] }
 0x372   : > { %5083 = vmatprep.mubr.f32.mxu1 %v9134_v48  ;;  %5296 = vmatprep.mubr.f32.mxu0 %v6931_v33  ;;  %v9140_v33 = vld [vmem:[#allocation44_spill] sm:$0xff] }
 0x375   : > { %5084 = vmatmul.mubr.f32.gmra.mrb[6].mxu1 %v9135_v10  ;;  %5297 = vmatmul.mubr.f32.gmra.mrb[8].mxu0 %v6987_v40  ;;  %v9141_v40 = vld [vmem:[#allocation45_spill] sm:$0xff] }
 0x376   : > { %5086 = vmatprep.mubr.f32.mxu1 %v9136_v9  ;;  %5299 = vmatprep.mubr.f32.mxu0 %v7051_v54  ;;  %v9142_v54 = vld [vmem:[#allocation46_spill] sm:$0xff] }
 0x379   : > { %5087 = vmatmul.mubr.f32.gmra.mrb[8].mxu1 %v9137_v43  ;;  %5300 = vmatmul.mubr.f32.gmra.mrb[10].mxu0 %v7103_v0  ;;  %v9143_v0 = vld [vmem:[#allocation47_spill] sm:$0xff] }
 0x37a   : > { %5089 = vmatprep.mubr.f32.mxu1 %v9138_v18  ;;  %5302 = vmatprep.mubr.f32.mxu0 %v7170_v38  ;;  %v9144_v38 = vld [vmem:[#allocation48_spill] sm:$0xff] }
 0x37d   : > { %5090 = vmatmul.mubr.f32.gmra.mrb[10].mxu1 %v9139_v29  ;;  %5303 = vmatmul.mubr.f32.gmra.mrb[12].mxu0 %v7222_v58  ;;  %v9145_v58 = vld [vmem:[#allocation49_spill] sm:$0xff] }
 0x37e   : > { %5092 = vmatprep.mubr.f32.mxu1 %v9140_v33  ;;  %5305 = vmatprep.mubr.f32.mxu0 %v7306_v30  ;;  %v9146_v30 = vld [vmem:[#allocation11_spill] sm:$0xff] }
 0x381   : > { %5093 = vmatmul.mubr.f32.gmra.mrb[12].mxu1 %v9141_v40  ;;  %5306 = vmatmul.mubr.f32.gmra.mrb[14].mxu0 %v7358_v13  ;;  %v9147_v13 = vld [vmem:[#allocation10_spill] sm:$0xff] }
 0x382   : > { %5095 = vmatprep.mubr.f32.mxu1 %v9142_v54  ;;  %5308 = vmatprep.mubr.f32.mxu0 %v7442_v39  ;;  %v9148_v39 = vld [vmem:[#allocation13_spill] sm:$0xff] }
 0x385   : > { %5096 = vmatmul.mubr.f32.gmra.mrb[14].mxu1 %v9143_v0  ;;  %5309 = vmatmul.mubr.f32.gmra.mrb[16].mxu0 %v7494_v7  ;;  %v9149_v7 = vld [vmem:[#allocation12_spill] sm:$0xff] }
 0x386   : > { %5098 = vmatprep.mubr.f32.mxu1 %v9144_v38  ;;  %5311 = vmatprep.mubr.f32.mxu0 %v7578_v56  ;;  %v9150_v56 = vld [vmem:[#allocation14_spill] sm:$0xff] }
 0x389   : > { %5099 = vmatmul.mubr.f32.gmra.mrb[16].mxu1 %v9145_v58  ;;  %5312 = vmatmul.mubr.f32.gmra.mrb[18].mxu0 %v7630_v61  ;;  %v9151_v61 = vld [vmem:[#allocation51_spill] sm:$0xff] }
 0x38a   : > { %5101 = vmatprep.mubr.f32.mxu1 %v9146_v30  ;;  %5314 = vmatprep.mubr.f32.mxu0 %v7714_v50  ;;  %v9152_v50 = vld [vmem:[#allocation2_spill] sm:$0xff] }
 0x38d   : > { %5102 = vmatmul.mubr.f32.gmra.mrb[18].mxu1 %v9147_v13  ;;  %5315 = vmatmul.mubr.f32.gmra.mrb[20].mxu0 %v7766_v27  ;;  %v9153_v27 = vld [vmem:[#allocation16_spill] sm:$0xff] }
 0x38e   : > { %5104 = vmatprep.mubr.f32.mxu1 %v9148_v39  ;;  %5317 = vmatprep.mubr.f32.mxu0 %v9119_v41 }
 0x391   : > { %5105 = vmatmul.mubr.f32.gmra.mrb[20].mxu1 %v9149_v7  ;;  %5318 = vmatmul.mubr.f32.gmra.mrb[22].mxu0 %v9120_v49 }
 0x392   : > { %5107 = vmatprep.mubr.f32.mxu1 %v9150_v56  ;;  %5320 = vmatprep.mubr.f32.mxu0 %v9121_v16 }
 0x395   : > { %5108 = vmatmul.mubr.f32.gmra.mrb[22].mxu1 %v9151_v61  ;;  %5321 = vmatmul.mubr.f32.gmra.mrb[24].mxu0 %v9122_v2 }
 0x396   : > { %5110 = vmatprep.mubr.f32.mxu1 %v9152_v50  ;;  %5323 = vmatprep.mubr.f32.mxu0 %v9123_v19 }
 0x399   : > { %5111 = vmatmul.mubr.f32.gmra.mrb[24].mxu1 %v9153_v27  ;;  %5324 = vmatmul.mubr.f32.gmra.mrb[26].mxu0 %v9124_v23 }
 0x39a   : > { %5113 = vmatprep.mubr.f32.mxu1 %v9154_v15  ;;  %5326 = vmatprep.mubr.f32.mxu0 %v8289_v52  ;;  %v9160_v52 = vld [vmem:[#allocation4_spill] sm:$0xff] }
 0x39d   : > { %5114 = vmatmul.mubr.f32.gmra.mrb[26].mxu1 %v9155_v20  ;;  %5327 = vmatmul.mubr.f32.gmra.mrb[28].mxu0 %v8326_v17  ;;  %v9161_v17 = vld [vmem:[#allocation22_spill] sm:$0xff] }
 0x39e   : > { %5116 = vmatprep.mubr.f32.mxu1 %v9156_v8  ;;  %5329 = vmatprep.mubr.f32.mxu0 %v8369_v37  ;;  %v9162_v37 = vld [vmem:[#allocation24_spill] sm:$0xff] }
 0x3a1   : > { %5117 = vmatmul.mubr.f32.gmra.mrb[28].mxu1 %v9157_v11  ;;  %5330 = vmatmul.mubr.f32.gmra.mrb[30].mxu0 %v8389_v34  ;;  %v9163_v34 = vld [vmem:[#allocation26_spill] sm:$0xff] }
 0x3a2   : > { %5119 = vmatprep.mubr.f32.mxu1 %v9158_v62  ;;  %5332 = vmatprep.mubr.f32.mxu0 %v8414_v55 }
 0x3a5   : > { %5120 = vmatmul.mubr.f32.gmra.mrb[30].mxu1 %v9159_v5  ;;  %5333 = vmatmul.mubr.f32.gmra.mrb[32].mxu0 %v9125_v25 }
 0x3a6   : > { %5122 = vmatprep.mubr.f32.mxu1 %v9160_v52  ;;  %5335 = vmatprep.mubr.f32.mxu0 %v9126_v42 }
 0x3a9   : > { %5123 = vmatmul.mubr.f32.gmra.mrb[32].mxu1 %v9161_v17  ;;  %5336 = vmatmul.mubr.f32.gmra.mrb[34].mxu0 %v9127_v51 }
 0x3aa   : > { %5125 = vmatprep.mubr.f32.mxu1 %v9162_v37  ;;  %5338 = vmatprep.mubr.f32.mxu0 %v8496_v44  ;;  %v8730_v44 = vld [vmem:[%s8869_s3] ss:$0 sm:$0xff] }
 0x3ad   : > { %5126 = vmatmul.mubr.f32.gmra.mrb[34].mxu1 %v9163_v34  ;;  %5339 = vmatmul.mubr.f32.gmra.mrb[36].mxu0 %v8512_v6 }
 0x3ae   : > { %5128 = vmatprep.mubr.f32.mxu1 %v8502_v22  ;;  %5341 = vmatprep.mubr.f32.mxu0 %v8544_v53 }
 0x3b1   : > { %5129 = vmatmul.mubr.f32.gmra.mrb[36].mxu1 %v8518_v14  ;;  %5342 = vmatmul.mubr.f32.gmra.mrb[38].mxu0 %v8541_v12 }
 0x3b2   : > { %5131 = vmatprep.mubr.f32.mxu1 %v8550_v21 }
 0x3b5   : > { %5132 = vmatmul.mubr.f32.gmra.mrb[38].mxu1 %v8547_v46 }
 0x438   : > { %v5286_v55 = vpop.f32.mrb[0].mxu0 }
 0x439   : > { %v4258_v63 = vpop.f32.mrb[1].mxu0 }
 0x43c   : > { %v5076_v6 = vpop.f32.mrb[0].mxu1  ;;  %v5289_v22 = vpop.f32.mrb[2].mxu0 }
 0x43d   : > { %v5392_v1 = vadd.f32 %v5076_v6, %v8730_v44  ;;  %v3199_v53 = vpop.f32.mrb[1].mxu1  ;;  %v4270_v14 = vpop.f32.mrb[3].mxu0 }
 0x43e   : > { %v5394_v12 = vadd.f32 %v8730_v44, %v3199_v53 }
 0x43f   : > { %v5393_v46 = vadd.f32 %v5392_v1, %v5286_v55 }
 0x440   : > { %v5395_v21 = vadd.f32 %v5394_v12, %v4258_v63  ;;  %v5079_v45 = vpop.f32.mrb[2].mxu1  ;;  %v5292_v35 = vpop.f32.mrb[4].mxu0 }
 0x441   : > { %4497 = vst.msk [vmem:[%s8736_s5 + $0x8] sm:$0xff] %vm1898_vm7, %v5393_v46  ;;  %v5396_v24 = vadd.f32 %v5079_v45, %v8730_v44  ;;  %v3213_v28 = vpop.f32.mrb[3].mxu1  ;;  %v4282_v47 = vpop.f32.mrb[5].mxu0 }
 0x442   : > { %4496 = vst.msk [vmem:[%s8736_s5] sm:$0xff] %vm1898_vm7, %v5395_v21  ;;  %v5398_v59 = vadd.f32 %v8730_v44, %v3213_v28 }
 0x443   : > { %v5397_v26 = vadd.f32 %v5396_v24, %v5289_v22 }
 0x444   : > { %v5399_v32 = vadd.f32 %v5398_v59, %v4270_v14  ;;  %v5082_v41 = vpop.f32.mrb[4].mxu1  ;;  %v5295_v49 = vpop.f32.mrb[6].mxu0 }
 0x445   : > { %4499 = vst.msk [vmem:[%s8736_s5 + $0x18] sm:$0xff] %vm1898_vm7, %v5397_v26  ;;  %v5400_v16 = vadd.f32 %v5082_v41, %v8730_v44  ;;  %v3227_v2 = vpop.f32.mrb[5].mxu1  ;;  %v4294_v19 = vpop.f32.mrb[7].mxu0 }
 0x446   : > { %4498 = vst.msk [vmem:[%s8736_s5 + $0x10] sm:$0xff] %vm1898_vm7, %v5399_v32  ;;  %v5402_v23 = vadd.f32 %v8730_v44, %v3227_v2 }
 0x447   : > { %v5401_v25 = vadd.f32 %v5400_v16, %v5292_v35 }
 0x448   : > { %v5403_v42 = vadd.f32 %v5402_v23, %v4282_v47  ;;  %v5085_v51 = vpop.f32.mrb[6].mxu1  ;;  %v5298_v36 = vpop.f32.mrb[8].mxu0 }
 0x449   : > { %4501 = vst.msk [vmem:[%s8736_s5 + $0x28] sm:$0xff] %vm1898_vm7, %v5401_v25  ;;  %v5404_v60 = vadd.f32 %v5085_v51, %v8730_v44  ;;  %v3241_v4 = vpop.f32.mrb[7].mxu1  ;;  %v4306_v57 = vpop.f32.mrb[9].mxu0 }
 0x44a   : > { %4500 = vst.msk [vmem:[%s8736_s5 + $0x20] sm:$0xff] %vm1898_vm7, %v5403_v42  ;;  %v5406_v3 = vadd.f32 %v8730_v44, %v3241_v4 }
 0x44b   : > { %v5405_v31 = vadd.f32 %v5404_v60, %v5295_v49 }
 0x44c   : > { %v5407_v48 = vadd.f32 %v5406_v3, %v4294_v19  ;;  %v5088_v10 = vpop.f32.mrb[8].mxu1  ;;  %v5301_v9 = vpop.f32.mrb[10].mxu0 }
 0x44d   : > { %4503 = vst.msk [vmem:[%s8736_s5 + $0x38] sm:$0xff] %vm1898_vm7, %v5405_v31  ;;  %v5408_v43 = vadd.f32 %v5088_v10, %v8730_v44  ;;  %v3255_v18 = vpop.f32.mrb[9].mxu1  ;;  %v4318_v29 = vpop.f32.mrb[11].mxu0 }
 0x44e   : > { %4502 = vst.msk [vmem:[%s8736_s5 + $0x30] sm:$0xff] %vm1898_vm7, %v5407_v48  ;;  %v5410_v33 = vadd.f32 %v8730_v44, %v3255_v18 }
 0x44f   : > { %v5409_v40 = vadd.f32 %v5408_v43, %v5298_v36 }
 0x450   : > { %v5411_v54 = vadd.f32 %v5410_v33, %v4306_v57  ;;  %v5091_v0 = vpop.f32.mrb[10].mxu1  ;;  %v5304_v38 = vpop.f32.mrb[12].mxu0 }
 0x451   : > { %4505 = vst.msk [vmem:[%s8736_s5 + $0x48] sm:$0xff] %vm1898_vm7, %v5409_v40  ;;  %v5412_v58 = vadd.f32 %v5091_v0, %v8730_v44  ;;  %v3269_v30 = vpop.f32.mrb[11].mxu1  ;;  %v4330_v13 = vpop.f32.mrb[13].mxu0 }
 0x452   : > { %4504 = vst.msk [vmem:[%s8736_s5 + $0x40] sm:$0xff] %vm1898_vm7, %v5411_v54  ;;  %v5414_v39 = vadd.f32 %v8730_v44, %v3269_v30 }
 0x453   : > { %v5413_v7 = vadd.f32 %v5412_v58, %v5301_v9 }
 0x454   : > { %v5415_v56 = vadd.f32 %v5414_v39, %v4318_v29  ;;  %v5094_v61 = vpop.f32.mrb[12].mxu1  ;;  %v5307_v50 = vpop.f32.mrb[14].mxu0 }
 0x455   : > { %4507 = vst.msk [vmem:[%s8736_s5 + $0x58] sm:$0xff] %vm1898_vm7, %v5413_v7  ;;  %v5416_v27 = vadd.f32 %v5094_v61, %v8730_v44  ;;  %v3283_v15 = vpop.f32.mrb[13].mxu1  ;;  %v4342_v20 = vpop.f32.mrb[15].mxu0 }
 0x456   : > { %4506 = vst.msk [vmem:[%s8736_s5 + $0x50] sm:$0xff] %vm1898_vm7, %v5415_v56  ;;  %v5418_v8 = vadd.f32 %v8730_v44, %v3283_v15 }
 0x457   : > { %v5417_v11 = vadd.f32 %v5416_v27, %v5304_v38 }
 0x458   : > { %v5419_v62 = vadd.f32 %v5418_v8, %v4330_v13  ;;  %v5097_v5 = vpop.f32.mrb[14].mxu1  ;;  %v5310_v52 = vpop.f32.mrb[16].mxu0 }
 0x459   : > { %4509 = vst.msk [vmem:[%s8736_s5 + $0x68] sm:$0xff] %vm1898_vm7, %v5417_v11  ;;  %v5420_v17 = vadd.f32 %v5097_v5, %v8730_v44  ;;  %v3297_v37 = vpop.f32.mrb[15].mxu1  ;;  %v4354_v34 = vpop.f32.mrb[17].mxu0 }
 0x45a   : > { %4508 = vst.msk [vmem:[%s8736_s5 + $0x60] sm:$0xff] %vm1898_vm7, %v5419_v62  ;;  %v5422_v55 = vadd.f32 %v8730_v44, %v3297_v37 }
 0x45b   : > { %v5421_v63 = vadd.f32 %v5420_v17, %v5307_v50 }
 0x45c   : > { %v5423_v6 = vadd.f32 %v5422_v55, %v4342_v20  ;;  %v5100_v22 = vpop.f32.mrb[16].mxu1  ;;  %v5313_v1 = vpop.f32.mrb[18].mxu0 }
 0x45d   : > { %4511 = vst.msk [vmem:[%s8736_s5 + $0x78] sm:$0xff] %vm1898_vm7, %v5421_v63  ;;  %v5424_v53 = vadd.f32 %v5100_v22, %v8730_v44  ;;  %v3311_v14 = vpop.f32.mrb[17].mxu1  ;;  %v4366_v12 = vpop.f32.mrb[19].mxu0 }
 0x45e   : > { %4510 = vst.msk [vmem:[%s8736_s5 + $0x70] sm:$0xff] %vm1898_vm7, %v5423_v6  ;;  %v5426_v46 = vadd.f32 %v8730_v44, %v3311_v14 }
 0x45f   : > { %v5425_v21 = vadd.f32 %v5424_v53, %v5310_v52 }
 0x460   : > { %v5427_v45 = vadd.f32 %v5426_v46, %v4354_v34  ;;  %v5103_v35 = vpop.f32.mrb[18].mxu1  ;;  %v5316_v24 = vpop.f32.mrb[20].mxu0 }
 0x461   : > { %4513 = vst.msk [vmem:[%s8736_s5 + $0x88] sm:$0xff] %vm1898_vm7, %v5425_v21  ;;  %v5428_v28 = vadd.f32 %v5103_v35, %v8730_v44  ;;  %v3325_v47 = vpop.f32.mrb[19].mxu1  ;;  %v4378_v59 = vpop.f32.mrb[21].mxu0 }
 0x462   : > { %4512 = vst.msk [vmem:[%s8736_s5 + $0x80] sm:$0xff] %vm1898_vm7, %v5427_v45  ;;  %v5430_v26 = vadd.f32 %v8730_v44, %v3325_v47 }
 0x463   : > { %v5429_v32 = vadd.f32 %v5428_v28, %v5313_v1 }
 0x464   : > { %v5431_v41 = vadd.f32 %v5430_v26, %v4366_v12  ;;  %v5106_v49 = vpop.f32.mrb[20].mxu1  ;;  %v5319_v16 = vpop.f32.mrb[22].mxu0 }
 0x465   : > { %4515 = vst.msk [vmem:[%s8736_s5 + $0x98] sm:$0xff] %vm1898_vm7, %v5429_v32  ;;  %v5432_v2 = vadd.f32 %v5106_v49, %v8730_v44  ;;  %v3339_v19 = vpop.f32.mrb[21].mxu1  ;;  %v4390_v23 = vpop.f32.mrb[23].mxu0 }
 0x466   : > { %4514 = vst.msk [vmem:[%s8736_s5 + $0x90] sm:$0xff] %vm1898_vm7, %v5431_v41  ;;  %v5434_v25 = vadd.f32 %v8730_v44, %v3339_v19 }
 0x467   : > { %v5433_v42 = vadd.f32 %v5432_v2, %v5316_v24 }
 0x468   : > { %v5435_v51 = vadd.f32 %v5434_v25, %v4378_v59  ;;  %v5109_v36 = vpop.f32.mrb[22].mxu1  ;;  %v5322_v60 = vpop.f32.mrb[24].mxu0 }
 0x469   : > { %4517 = vst.msk [vmem:[%s8736_s5 + $0xa8] sm:$0xff] %vm1898_vm7, %v5433_v42  ;;  %v5436_v4 = vadd.f32 %v5109_v36, %v8730_v44  ;;  %v3353_v57 = vpop.f32.mrb[23].mxu1  ;;  %v4402_v3 = vpop.f32.mrb[25].mxu0 }
 0x46a   : > { %4516 = vst.msk [vmem:[%s8736_s5 + $0xa0] sm:$0xff] %vm1898_vm7, %v5435_v51  ;;  %v5438_v31 = vadd.f32 %v8730_v44, %v3353_v57 }
 0x46b   : > { %v5437_v48 = vadd.f32 %v5436_v4, %v5319_v16 }
 0x46c   : > { %v5439_v10 = vadd.f32 %v5438_v31, %v4390_v23  ;;  %v5112_v9 = vpop.f32.mrb[24].mxu1  ;;  %v5325_v43 = vpop.f32.mrb[26].mxu0 }
 0x46d   : > { %4519 = vst.msk [vmem:[%s8736_s5 + $0xb8] sm:$0xff] %vm1898_vm7, %v5437_v48  ;;  %v5440_v18 = vadd.f32 %v5112_v9, %v8730_v44  ;;  %v3367_v29 = vpop.f32.mrb[25].mxu1  ;;  %v4414_v33 = vpop.f32.mrb[27].mxu0 }
 0x46e   : > { %4518 = vst.msk [vmem:[%s8736_s5 + $0xb0] sm:$0xff] %vm1898_vm7, %v5439_v10  ;;  %v5442_v40 = vadd.f32 %v8730_v44, %v3367_v29 }
 0x46f   : > { %v5441_v54 = vadd.f32 %v5440_v18, %v5322_v60 }
 0x470   : > { %v5443_v0 = vadd.f32 %v5442_v40, %v4402_v3  ;;  %v5115_v38 = vpop.f32.mrb[26].mxu1  ;;  %v5328_v58 = vpop.f32.mrb[28].mxu0 }
 0x471   : > { %4521 = vst.msk [vmem:[%s8736_s5 + $0xc8] sm:$0xff] %vm1898_vm7, %v5441_v54  ;;  %v5444_v30 = vadd.f32 %v5115_v38, %v8730_v44  ;;  %v3381_v13 = vpop.f32.mrb[27].mxu1  ;;  %v4426_v39 = vpop.f32.mrb[29].mxu0 }
 0x472   : > { %4520 = vst.msk [vmem:[%s8736_s5 + $0xc0] sm:$0xff] %vm1898_vm7, %v5443_v0  ;;  %v5446_v7 = vadd.f32 %v8730_v44, %v3381_v13 }
 0x473   : > { %v5445_v56 = vadd.f32 %v5444_v30, %v5325_v43 }
 0x474   : > { %v5447_v61 = vadd.f32 %v5446_v7, %v4414_v33  ;;  %v5118_v50 = vpop.f32.mrb[28].mxu1  ;;  %v5331_v27 = vpop.f32.mrb[30].mxu0 }
 0x475   : > { %4523 = vst.msk [vmem:[%s8736_s5 + $0xd8] sm:$0xff] %vm1898_vm7, %v5445_v56  ;;  %v5448_v15 = vadd.f32 %v5118_v50, %v8730_v44  ;;  %v3395_v20 = vpop.f32.mrb[29].mxu1  ;;  %v4438_v8 = vpop.f32.mrb[31].mxu0 }
 0x476   : > { %4522 = vst.msk [vmem:[%s8736_s5 + $0xd0] sm:$0xff] %vm1898_vm7, %v5447_v61  ;;  %v5450_v11 = vadd.f32 %v8730_v44, %v3395_v20 }
 0x477   : > { %v5449_v62 = vadd.f32 %v5448_v15, %v5328_v58 }
 0x478   : > { %v5451_v5 = vadd.f32 %v5450_v11, %v4426_v39  ;;  %v5121_v52 = vpop.f32.mrb[30].mxu1  ;;  %v5334_v17 = vpop.f32.mrb[32].mxu0 }
 0x479   : > { %4525 = vst.msk [vmem:[%s8736_s5 + $0xe8] sm:$0xff] %vm1898_vm7, %v5449_v62  ;;  %v5452_v37 = vadd.f32 %v5121_v52, %v8730_v44  ;;  %v3409_v34 = vpop.f32.mrb[31].mxu1  ;;  %v4450_v55 = vpop.f32.mrb[33].mxu0 }
 0x47a   : > { %4524 = vst.msk [vmem:[%s8736_s5 + $0xe0] sm:$0xff] %vm1898_vm7, %v5451_v5  ;;  %v5454_v63 = vadd.f32 %v8730_v44, %v3409_v34 }
 0x47b   : > { %v5453_v6 = vadd.f32 %v5452_v37, %v5331_v27 }
 0x47c   : > { %v5455_v22 = vadd.f32 %v5454_v63, %v4438_v8  ;;  %v5124_v1 = vpop.f32.mrb[32].mxu1  ;;  %v5337_v53 = vpop.f32.mrb[34].mxu0 }
 0x47d   : > { %4527 = vst.msk [vmem:[%s8736_s5 + $0xf8] sm:$0xff] %vm1898_vm7, %v5453_v6  ;;  %v5456_v14 = vadd.f32 %v5124_v1, %v8730_v44  ;;  %v3423_v12 = vpop.f32.mrb[33].mxu1  ;;  %v4462_v46 = vpop.f32.mrb[35].mxu0 }
 0x47e   : > { %4526 = vst.msk [vmem:[%s8736_s5 + $0xf0] sm:$0xff] %vm1898_vm7, %v5455_v22  ;;  %v5458_v21 = vadd.f32 %v8730_v44, %v3423_v12 }
 0x47f   : > { %v5457_v45 = vadd.f32 %v5456_v14, %v5334_v17 }
 0x480   : > { %v5459_v35 = vadd.f32 %v5458_v21, %v4450_v55  ;;  %v5127_v24 = vpop.f32.mrb[34].mxu1  ;;  %v5340_v28 = vpop.f32.mrb[36].mxu0 }
 0x481   : > { %4529 = vst.msk [vmem:[%s8736_s5 + $0x108] sm:$0xff] %vm1898_vm7, %v5457_v45  ;;  %v5460_v47 = vadd.f32 %v5127_v24, %v8730_v44  ;;  %v3437_v59 = vpop.f32.mrb[35].mxu1  ;;  %v4474_v26 = vpop.f32.mrb[37].mxu0 }
 0x482   : > { %4528 = vst.msk [vmem:[%s8736_s5 + $0x100] sm:$0xff] %vm1898_vm7, %v5459_v35  ;;  %v5462_v32 = vadd.f32 %v8730_v44, %v3437_v59 }
 0x483   : > { %v5461_v41 = vadd.f32 %v5460_v47, %v5337_v53 }
 0x484   : > { %v5463_v49 = vadd.f32 %v5462_v32, %v4462_v46  ;;  %v5130_v16 = vpop.f32.mrb[36].mxu1  ;;  %v5343_v2 = vpop.f32.mrb[38].mxu0 }
 0x485   : > { %4531 = vst.msk [vmem:[%s8736_s5 + $0x118] sm:$0xff] %vm1898_vm7, %v5461_v41  ;;  %v5464_v19 = vadd.f32 %v5130_v16, %v8730_v44  ;;  %v3451_v23 = vpop.f32.mrb[37].mxu1  ;;  %v4486_v25 = vpop.f32.mrb[39].mxu0 }
 0x486   : > { %4530 = vst.msk [vmem:[%s8736_s5 + $0x110] sm:$0xff] %vm1898_vm7, %v5463_v49  ;;  %v5466_v42 = vadd.f32 %v8730_v44, %v3451_v23 }
 0x487   : > { %v5465_v51 = vadd.f32 %v5464_v19, %v5340_v28 }
 0x488   : > { %v5467_v36 = vadd.f32 %v5466_v42, %v4474_v26  ;;  %v5133_v60 = vpop.f32.mrb[38].mxu1 }
 0x489   : > { %4533 = vst.msk [vmem:[%s8736_s5 + $0x128] sm:$0xff] %vm1898_vm7, %v5465_v51  ;;  %v5468_v4 = vadd.f32 %v5133_v60, %v8730_v44  ;;  %v3465_v57 = vpop.f32.mrb[39].mxu1 }
 0x48a   : > { %4532 = vst.msk [vmem:[%s8736_s5 + $0x120] sm:$0xff] %vm1898_vm7, %v5467_v36  ;;  %v5470_v3 = vadd.f32 %v8730_v44, %v3465_v57 }
 0x48b   : > { %v5469_v31 = vadd.f32 %v5468_v4, %v5343_v2 }
 0x48c   : > { %v5471_v48 = vadd.f32 %v5470_v3, %v4486_v25 }
 0x48d   : > { %4535 = vst.msk [vmem:[%s8736_s5 + $0x138] sm:$0xff] %vm1898_vm7, %v5469_v31 }
 0x48e   : > { %4534 = vst.msk [vmem:[%s8736_s5 + $0x130] sm:$0xff] %vm1898_vm7, %v5471_v48 }
 0x48f PF: > { %s14_s17 = sadd.s32 1, %s5753_s17   ;;  %s9164_s15 = smov %s5749_s16 }
 0x490   : > { %p11_p5 = scmp.ge.s32.totalorder %s14_s17, 4   ;;  %s9165_s16 = smov %s9167_s18 }
 0x492   :  { %13 = sbr.rel (!%p11_p5) target bundleno = 2 (0x2), region = 69 }

</bundles_post_ra>
